<compile_context>
chip_gen: v7x
topology: tpu7x:2x2x1
jax: 0.10.0
libtpu: 0.0.40
codegen_flags: <defaults>
</compile_context>

<pallas_src>
import functools

import jax
import jax.numpy as jnp
from jax.experimental import pallas as pl
from jax.experimental.pallas import tpu as pltpu


# Static BPNet conv geometry (all odd kernel sizes, so 'same' padding
# dilation * (K - 1) // 2 matches PyTorch exactly).
K_ICONV = 21                    # input convolution taps
K_RCONV = 3                     # residual convolution taps
K_FCONV = 75                    # profile-head convolution taps
IPAD = (K_ICONV - 1) // 2       # 10
FPAD = (K_FCONV - 1) // 2       # 37
COUNT_HALO = 37                 # counts head pools over [start-37, end+37)


def _round_up(x, m):
    return ((x + m - 1) // m) * m


# ----------------------------------------------------------------------------
# Pallas kernel: full BPNet forward for one batch element per grid step
# ----------------------------------------------------------------------------
def _bpnet_kernel(xslab_ref, pctl_ref, cbias_ref,
                  iw_ref, ib_ref, rw_ref, rb_ref, fwh_ref, lwx_ref,
                  yprof_ref, ycnt_ref,
                  h_ref, hbf_ref,
                  *, n_layers, trimming, L, HP):
    F = ib_ref.shape[1]
    OL = yprof_ref.shape[2]
    start = trimming

    # ---- zero the bf16 halo (every grid step: megacore-safe) ----------------
    # Only the dilated residual convs read past the sequence ends; PyTorch
    # zero-pads, so the halo must be zero.
    zhalo = jnp.zeros((HP, F), jnp.bfloat16)
    hbf_ref[0:HP, :] = zhalo
    hbf_ref[HP + L:HP + L + HP, :] = zhalo

    # ---- (1) wide input convolution + ReLU ----------------------------------
    # im2col slab (L, 84) bf16 comes pre-built from the wrapper.
    h0 = jnp.dot(xslab_ref[0], iw_ref[...], preferred_element_type=jnp.float32)
    h0 = jnp.maximum(h0 + ib_ref[...], 0.0)
    h_ref[...] = h0                                   # f32 hidden state (no halo)
    hbf_ref[HP:HP + L, :] = h0.astype(jnp.bfloat16)   # bf16 mirror (with halo)

    # ---- (2) dilated residual stack ------------------------------------------
    # Per-tap (L,F)@(F,F) matmuls straight off the bf16 mirror (static offsets,
    # no concat, no per-read casts).  Residual accumulation stays in f32.
    for i in range(n_layers):
        d = 2 ** (i + 1)
        base = HP - d
        hc = rb_ref[i]                                 # (1, F) f32, broadcasts
        for k in range(K_RCONV):
            hc = hc + jnp.dot(hbf_ref[base + k * d:base + k * d + L, :],
                              rw_ref[i, k],
                              preferred_element_type=jnp.float32)
        h_new = h_ref[...] + jnp.maximum(hc, 0.0)
        h_ref[...] = h_new
        hbf_ref[HP:HP + L, :] = h_new.astype(jnp.bfloat16)

    # ---- (3a) profile head, accumulated transposed (lane-dense store) -------
    # prof[o, r] = pctl[o, r] + sum_{k,c} fw[o,c,k] * h[start + r + k - 37, c]
    # pctl already holds bias + the f32 control-track contribution (wrapper).
    hb = HP + start - FPAD
    prof = pctl_ref[0]                                 # (n_out, OL) f32
    for k in range(K_FCONV):
        prof = prof + jax.lax.dot_general(
            fwh_ref[k],                                # (n_out, F) bf16
            hbf_ref[hb + k:hb + k + OL, :],            # (OL, F)   bf16
            (((1,), (1,)), ((), ())),
            preferred_element_type=jnp.float32)
    yprof_ref[0] = prof.astype(yprof_ref.dtype)

    # ---- (3b) counts head, entirely on the VPU ------------------------------
    # cbias = log1p(sum(ctl window)) * w_ctl + b, precomputed by the wrapper.
    W = OL + 2 * COUNT_HALO
    wb = start - COUNT_HALO
    x_mean = jnp.sum(h_ref[wb:wb + W, :], axis=0, keepdims=True) * (1.0 / W)
    cnt = jnp.sum(x_mean * lwx_ref[...], axis=1, keepdims=True) + cbias_ref[0]
    ycnt_ref[0] = cnt.astype(ycnt_ref.dtype)


# ----------------------------------------------------------------------------
# Wrapper
# ----------------------------------------------------------------------------
def bpnet_forward(X, X_ctl, params, *, n_layers, trimming):
    """X: (B, 4, L), X_ctl: (B, n_ctl, L) -- PyTorch NCL layout.

    Returns (y_profile (B, n_out, out_len), y_counts (B, 1)).
    """
    # TODO(synk): X_ctl=None (n_control_tracks == 0) path is not implemented.
    B, in_ch, L = X.shape
    assert in_ch == 4
    n_ctl = X_ctl.shape[1]
    assert trimming >= COUNT_HALO, (
        "counts-head window [start-37, end+37) requires trimming >= 37")
    assert K_ICONV % 2 == 1 and K_RCONV % 2 == 1 and K_FCONV % 2 == 1
    out_len = L - 2 * trimming
    start, end = trimming, L - trimming

    F = params["ib"].shape[0]
    n_out = params["fb"].shape[0]
    assert params["iw"].shape == (F, 4, K_ICONV)
    assert params["rw"].shape == (n_layers, F, F, K_RCONV)
    assert params["fw"].shape == (n_out, F + n_ctl, K_FCONV)
    assert params["lw"].shape == (1, F + 1)

    # Residual halo reach, rounded up to a sublane multiple.
    HP = _round_up(max(2 ** n_layers, FPAD), 8)

    # ---- wrapper-side precompute (XLA) --------------------------------------
    # (a) input-conv im2col slab, bf16:  xslab[b, l, k*4+c] = xpad[b, l+k, c]
    x_nlc = jnp.transpose(X, (0, 2, 1)).astype(jnp.float32)
    xpad = jnp.pad(x_nlc, ((0, 0), (IPAD, IPAD), (0, 0)))          # (B, L+20, 4)
    xslab = jnp.concatenate([xpad[:, k:k + L, :] for k in range(K_ICONV)],
                            axis=-1).astype(jnp.bfloat16)          # (B, L, 84)

    # (b) control-track contribution to the profile head (f32) + bias.
    ctl = X_ctl.astype(jnp.float32)
    fw_ctl = params["fw"][:, F:, :].astype(jnp.float32)            # (n_out,n_ctl,75)
    pctl = jax.lax.conv_general_dilated(
        ctl, fw_ctl, window_strides=(1,), padding=[(FPAD, FPAD)],
        dimension_numbers=("NCW", "OIW", "NCW"))[:, :, start:end]
    pctl = pctl + params["fb"].astype(jnp.float32)[None, :, None]  # (B,n_out,OL)

    # (c) counts-head control term folded into a per-batch scalar bias.
    ctl_sum = jnp.sum(ctl[:, :, start - COUNT_HALO:end + COUNT_HALO],
                      axis=(1, 2))
    cbias = (jnp.log(ctl_sum + 1.0) * params["lw"][0, F]
             + params["lb"][0]).astype(jnp.float32).reshape(B, 1, 1)

    # ---- weights: tap-major layouts, bf16 for the MXU; biases stay f32 ------
    iw = jnp.transpose(params["iw"], (2, 1, 0)).reshape(
        K_ICONV * 4, F).astype(jnp.bfloat16)                       # (84, F)
    ib = params["ib"].reshape(1, F).astype(jnp.float32)
    rw = jnp.transpose(params["rw"], (0, 3, 2, 1)).astype(
        jnp.bfloat16)                                              # (nl, 3, Fin, Fout)
    rb = params["rb"].reshape(n_layers, 1, F).astype(jnp.float32)
    fwh = jnp.transpose(params["fw"][:, :F, :], (2, 0, 1)).astype(
        jnp.bfloat16)                                              # (75, n_out, F)
    lwx = params["lw"][:, :F].reshape(1, F).astype(jnp.float32)

    kernel = functools.partial(_bpnet_kernel, n_layers=n_layers,
                               trimming=trimming, L=L, HP=HP)

    def _wspec(shape):
        n = len(shape)
        return pl.BlockSpec(shape, lambda b: (0,) * n)

    y_prof, y_cnt = pl.pallas_call(
        kernel,
        out_shape=(
            jax.ShapeDtypeStruct((B, n_out, out_len), jnp.float32),
            jax.ShapeDtypeStruct((B, 1, 1), jnp.float32),
        ),
        grid=(B,),
        in_specs=[
            pl.BlockSpec((1, L, K_ICONV * 4), lambda b: (b, 0, 0)),
            pl.BlockSpec((1, n_out, out_len), lambda b: (b, 0, 0)),
            pl.BlockSpec((1, 1, 1), lambda b: (b, 0, 0)),
            _wspec((K_ICONV * 4, F)),
            _wspec((1, F)),
            _wspec((n_layers, K_RCONV, F, F)),
            _wspec((n_layers, 1, F)),
            _wspec((K_FCONV, n_out, F)),
            _wspec((1, F)),
        ],
        out_specs=(
            pl.BlockSpec((1, n_out, out_len), lambda b: (b, 0, 0)),
            pl.BlockSpec((1, 1, 1), lambda b: (b, 0, 0)),
        ),
        scratch_shapes=[
            pltpu.VMEM((L, F), jnp.float32),            # f32 hidden state
            pltpu.VMEM((L + 2 * HP, F), jnp.bfloat16),  # bf16 mirror + halo
        ],
        # One batch element per grid step; B >= 2 keeps both v7x TCs busy.
        compiler_params=pltpu.CompilerParams(
            dimension_semantics=("parallel",),
            vmem_limit_bytes=32 * 1024 * 1024),
    )(xslab, pctl, cbias, iw, ib, rw, rb, fwh, lwx)

    return y_prof, y_cnt.reshape(B, 1)


# ----------------------------------------------------------------------------
# Pure-JAX reference (mirrors the PyTorch forward exactly) for verification
# ----------------------------------------------------------------------------
def bpnet_reference(X, X_ctl, params, *, n_layers, trimming):
    def conv(x, w, b, dilation):
        pad = dilation * (w.shape[-1] - 1) // 2
        y = jax.lax.conv_general_dilated(
            x, w, window_strides=(1,), padding=[(pad, pad)],
            rhs_dilation=(dilation,),
            dimension_numbers=("NCW", "OIW", "NCW"))
        return y + b[None, :, None]

    start, end = trimming, X.shape[2] - trimming
    h = jax.nn.relu(conv(X, params["iw"], params["ib"], 1))
    for i in range(n_layers):
        hc = jax.nn.relu(conv(h, params["rw"][i], params["rb"][i], 2 ** (i + 1)))
        h = h + hc
    hcat = jnp.concatenate([h, X_ctl], axis=1)
    y_profile = conv(hcat, params["fw"], params["fb"], 1)[:, :, start:end]
    xm = jnp.mean(h[:, :, start - 37:end + 37], axis=2)
    cs = jnp.sum(X_ctl[:, :, start - 37:end + 37], axis=(1, 2))[:, None]
    feat = jnp.concatenate([xm, jnp.log(cs + 1.0)], axis=-1)
    y_counts = feat @ params["lw"].T + params["lb"]
    return y_profile, y_counts


# ----------------------------------------------------------------------------
# Deterministic parameter init (PyTorch weight layouts)
# ----------------------------------------------------------------------------
def init_params(key, n_filters, n_layers, n_outputs, n_control_tracks):
    ks = jax.random.split(key, 8)
    s = 0.05
    F = n_filters
    return {
        "iw": s * jax.random.normal(ks[0], (F, 4, K_ICONV), jnp.float32),
        "ib": s * jax.random.normal(ks[1], (F,), jnp.float32),
        "rw": s * jax.random.normal(ks[2], (n_layers, F, F, K_RCONV), jnp.float32),
        "rb": s * jax.random.normal(ks[3], (n_layers, F), jnp.float32),
        "fw": s * jax.random.normal(ks[4], (n_outputs, F + n_control_tracks,
                                            K_FCONV), jnp.float32),
        "fb": s * jax.random.normal(ks[5], (n_outputs,), jnp.float32),
        "lw": s * jax.random.normal(ks[6], (1, F + 1), jnp.float32),
        "lb": s * jax.random.normal(ks[7], (1,), jnp.float32),
    }


if __name__ == "__main__":
    # Small but consistent configuration.
    B = 2
    L = 128            # input_len
    n_filters = 32
    n_layers = 2       # dilations 2, 4
    n_outputs = 2
    n_ctl = 2
    trimming = 40      # >= 37 so the counts window stays inside the sequence
    out_len = L - 2 * trimming  # output_dim = 48

    key = jax.random.PRNGKey(0)
    k_par, k_seq, k_ctl = jax.random.split(key, 3)

    params = init_params(k_par, n_filters, n_layers, n_outputs, n_ctl)

    # One-hot DNA sequence, (B, 4, L); non-negative control tracks, (B, 2, L).
    seq_idx = jax.random.randint(k_seq, (B, L), 0, 4)
    X = jax.nn.one_hot(seq_idx, 4, axis=1, dtype=jnp.float32)          # (B,4,L)
    X_ctl = 2.0 * jax.random.uniform(k_ctl, (B, n_ctl, L), jnp.float32)

    y_profile, y_counts = bpnet_forward(X, X_ctl, params,
                                        n_layers=n_layers, trimming=trimming)
    jax.block_until_ready((y_profile, y_counts))

    # Verify against a pure-JAX (f32) reference of the PyTorch forward.
    ref_profile, ref_counts = bpnet_reference(X, X_ctl, params,
                                              n_layers=n_layers,
                                              trimming=trimming)
    assert y_profile.shape == (B, n_outputs, out_len)
    assert y_counts.shape == (B, 1)
    # bf16 MXU operands -> slightly looser tolerance than a pure-f32 kernel.
    assert jnp.allclose(y_profile, ref_profile, rtol=2e-2, atol=2e-2), (
        float(jnp.max(jnp.abs(y_profile - ref_profile))))
    assert jnp.allclose(y_counts, ref_counts, rtol=2e-2, atol=2e-2), (
        float(jnp.max(jnp.abs(y_counts - ref_counts))))

    print("KERNEL_OK")
</pallas_src>

<mosaic_0001>
module attributes {stable_mosaic.version = 11 : i64} {
  func.func @_bpnet_kernel(%arg0: i32, %arg1: memref<1x128x84xbf16, #tpu.memory_space<vmem>>, %arg2: memref<1x2x48xf32, #tpu.memory_space<vmem>>, %arg3: memref<1x1x1xf32, #tpu.memory_space<vmem>>, %arg4: memref<84x32xbf16, #tpu.memory_space<vmem>>, %arg5: memref<1x32xf32, #tpu.memory_space<vmem>>, %arg6: memref<2x3x32x32xbf16, #tpu.memory_space<vmem>>, %arg7: memref<2x1x32xf32, #tpu.memory_space<vmem>>, %arg8: memref<75x2x32xbf16, #tpu.memory_space<vmem>>, %arg9: memref<1x32xf32, #tpu.memory_space<vmem>>, %arg10: memref<1x2x48xf32, #tpu.memory_space<vmem>>, %arg11: memref<1x1x1xf32, #tpu.memory_space<vmem>>, %arg12: memref<128x32xf32, #tpu.memory_space<vmem>>, %arg13: memref<208x32xbf16, #tpu.memory_space<vmem>>) attributes {dimension_semantics = [#tpu.dimension_semantics<parallel>], iteration_bounds = array<i64: 2>, scalar_prefetch = 0 : i64, scratch_operands = 2 : i64, tpu.core_type = #tpu.core_type<tc>, window_params = [{transform_indices = @transform_0, window_bounds = array<i64: 1, 128, 84>}, {transform_indices = @transform_1, window_bounds = array<i64: 1, 2, 48>}, {transform_indices = @transform_2, window_bounds = array<i64: 1, 1, 1>}, {pipeline_mode = #tpu.pipeline_mode<synchronous>, transform_indices = @transform_3, window_bounds = array<i64: 84, 32>}, {pipeline_mode = #tpu.pipeline_mode<synchronous>, transform_indices = @transform_4, window_bounds = array<i64: 1, 32>}, {pipeline_mode = #tpu.pipeline_mode<synchronous>, transform_indices = @transform_5, window_bounds = array<i64: 2, 3, 32, 32>}, {pipeline_mode = #tpu.pipeline_mode<synchronous>, transform_indices = @transform_6, window_bounds = array<i64: 2, 1, 32>}, {pipeline_mode = #tpu.pipeline_mode<synchronous>, transform_indices = @transform_7, window_bounds = array<i64: 75, 2, 32>}, {pipeline_mode = #tpu.pipeline_mode<synchronous>, transform_indices = @transform_8, window_bounds = array<i64: 1, 32>}, {transform_indices = @transform_9, window_bounds = array<i64: 1, 2, 48>}, {transform_indices = @transform_10, window_bounds = array<i64: 1, 1, 1>}]} {
    %cst = arith.constant 0.000000e+00 : bf16
    %0 = vector.broadcast %cst : bf16 to vector<40x32xbf16>
    %c0 = arith.constant 0 : index
    %c0_0 = arith.constant 0 : index
    %1 = vector.load %arg13[%c0, %c0_0] : memref<208x32xbf16, #tpu.memory_space<vmem>>, vector<40x32xbf16>
    tpu.vector_store %arg13[%c0, %c0_0], %0 {strides = array<i32>} : memref<208x32xbf16, #tpu.memory_space<vmem>>, vector<40x32xbf16>,
    %c168 = arith.constant 168 : index
    %c0_1 = arith.constant 0 : index
    %2 = vector.load %arg13[%c168, %c0_1] : memref<208x32xbf16, #tpu.memory_space<vmem>>, vector<40x32xbf16>
    tpu.vector_store %arg13[%c168, %c0_1], %0 {strides = array<i32>} : memref<208x32xbf16, #tpu.memory_space<vmem>>, vector<40x32xbf16>,
    %c0_2 = arith.constant 0 : index
    %c0_3 = arith.constant 0 : index
    %c0_4 = arith.constant 0 : index
    %3 = vector.load %arg1[%c0_2, %c0_3, %c0_4] : memref<1x128x84xbf16, #tpu.memory_space<vmem>>, vector<1x128x84xbf16>
    %4 = vector.shape_cast %3 : vector<1x128x84xbf16> to vector<128x84xbf16>
    %c0_5 = arith.constant 0 : index
    %c0_6 = arith.constant 0 : index
    %5 = vector.load %arg4[%c0_5, %c0_6] : memref<84x32xbf16, #tpu.memory_space<vmem>>, vector<84x32xbf16>
    %cst_7 = arith.constant dense<0.000000e+00> : vector<128x32xf32>
    %6 = tpu.matmul %4, %5, %cst_7 {dimension_numbers = #tpu.dot_dimension_numbers<[1], [0], [0], [1], [0, 0, 1, 1], [], []>} : vector<128x84xbf16>, vector<84x32xbf16>, vector<128x32xf32> -> vector<128x32xf32>
    %c0_8 = arith.constant 0 : index
    %c0_9 = arith.constant 0 : index
    %7 = vector.load %arg5[%c0_8, %c0_9] : memref<1x32xf32, #tpu.memory_space<vmem>>, vector<1x32xf32>
    %8 = vector.broadcast %7 : vector<1x32xf32> to vector<128x32xf32>
    %9 = arith.addf %6, %8 : vector<128x32xf32>
    %cst_10 = arith.constant 0.000000e+00 : f32
    %10 = vector.broadcast %cst_10 : f32 to vector<128x32xf32>
    %11 = arith.maximumf %9, %10 : vector<128x32xf32>
    %c0_11 = arith.constant 0 : index
    %c0_12 = arith.constant 0 : index
    %12 = vector.load %arg12[%c0_11, %c0_12] : memref<128x32xf32, #tpu.memory_space<vmem>>, vector<128x32xf32>
    tpu.vector_store %arg12[%c0_11, %c0_12], %11 {strides = array<i32>} : memref<128x32xf32, #tpu.memory_space<vmem>>, vector<128x32xf32>,
    %13 = arith.truncf %11 : vector<128x32xf32> to vector<128x32xbf16>
    %c40 = arith.constant 40 : index
    %c0_13 = arith.constant 0 : index
    %14 = vector.load %arg13[%c40, %c0_13] : memref<208x32xbf16, #tpu.memory_space<vmem>>, vector<128x32xbf16>
    tpu.vector_store %arg13[%c40, %c0_13], %13 {strides = array<i32>} : memref<208x32xbf16, #tpu.memory_space<vmem>>, vector<128x32xbf16>,
    %c0_14 = arith.constant 0 : index
    %c0_15 = arith.constant 0 : index
    %c0_16 = arith.constant 0 : index
    %15 = vector.load %arg7[%c0_14, %c0_15, %c0_16] : memref<2x1x32xf32, #tpu.memory_space<vmem>>, vector<1x1x32xf32>
    %16 = vector.shape_cast %15 : vector<1x1x32xf32> to vector<1x32xf32>
    %c38 = arith.constant 38 : index
    %c0_17 = arith.constant 0 : index
    %17 = vector.load %arg13[%c38, %c0_17] : memref<208x32xbf16, #tpu.memory_space<vmem>>, vector<128x32xbf16>
    %c0_18 = arith.constant 0 : index
    %c0_19 = arith.constant 0 : index
    %c0_20 = arith.constant 0 : index
    %c0_21 = arith.constant 0 : index
    %18 = vector.load %arg6[%c0_18, %c0_19, %c0_20, %c0_21] : memref<2x3x32x32xbf16, #tpu.memory_space<vmem>>, vector<1x1x32x32xbf16>
    %19 = vector.shape_cast %18 : vector<1x1x32x32xbf16> to vector<32x32xbf16>
    %cst_22 = arith.constant dense<0.000000e+00> : vector<128x32xf32>
    %20 = tpu.matmul %17, %19, %cst_22 {dimension_numbers = #tpu.dot_dimension_numbers<[1], [0], [0], [1], [0, 0, 1, 1], [], []>} : vector<128x32xbf16>, vector<32x32xbf16>, vector<128x32xf32> -> vector<128x32xf32>
    %21 = vector.broadcast %16 : vector<1x32xf32> to vector<128x32xf32>
    %22 = arith.addf %21, %20 : vector<128x32xf32>
    %c40_23 = arith.constant 40 : index
    %c0_24 = arith.constant 0 : index
    %23 = vector.load %arg13[%c40_23, %c0_24] : memref<208x32xbf16, #tpu.memory_space<vmem>>, vector<128x32xbf16>
    %c0_25 = arith.constant 0 : index
    %c1 = arith.constant 1 : index
    %c0_26 = arith.constant 0 : index
    %c0_27 = arith.constant 0 : index
    %24 = vector.load %arg6[%c0_25, %c1, %c0_26, %c0_27] : memref<2x3x32x32xbf16, #tpu.memory_space<vmem>>, vector<1x1x32x32xbf16>
    %25 = vector.shape_cast %24 : vector<1x1x32x32xbf16> to vector<32x32xbf16>
    %cst_28 = arith.constant dense<0.000000e+00> : vector<128x32xf32>
    %26 = tpu.matmul %23, %25, %cst_28 {dimension_numbers = #tpu.dot_dimension_numbers<[1], [0], [0], [1], [0, 0, 1, 1], [], []>} : vector<128x32xbf16>, vector<32x32xbf16>, vector<128x32xf32> -> vector<128x32xf32>
    %27 = arith.addf %22, %26 : vector<128x32xf32>
    %c42 = arith.constant 42 : index
    %c0_29 = arith.constant 0 : index
    %28 = vector.load %arg13[%c42, %c0_29] : memref<208x32xbf16, #tpu.memory_space<vmem>>, vector<128x32xbf16>
    %c0_30 = arith.constant 0 : index
    %c2 = arith.constant 2 : index
    %c0_31 = arith.constant 0 : index
    %c0_32 = arith.constant 0 : index
    %29 = vector.load %arg6[%c0_30, %c2, %c0_31, %c0_32] : memref<2x3x32x32xbf16, #tpu.memory_space<vmem>>, vector<1x1x32x32xbf16>
    %30 = vector.shape_cast %29 : vector<1x1x32x32xbf16> to vector<32x32xbf16>
    %cst_33 = arith.constant dense<0.000000e+00> : vector<128x32xf32>
    %31 = tpu.matmul %28, %30, %cst_33 {dimension_numbers = #tpu.dot_dimension_numbers<[1], [0], [0], [1], [0, 0, 1, 1], [], []>} : vector<128x32xbf16>, vector<32x32xbf16>, vector<128x32xf32> -> vector<128x32xf32>
    %32 = arith.addf %27, %31 : vector<128x32xf32>
    %c0_34 = arith.constant 0 : index
    %c0_35 = arith.constant 0 : index
    %33 = vector.load %arg12[%c0_34, %c0_35] : memref<128x32xf32, #tpu.memory_space<vmem>>, vector<128x32xf32>
    %cst_36 = arith.constant 0.000000e+00 : f32
    %34 = vector.broadcast %cst_36 : f32 to vector<128x32xf32>
    %35 = arith.maximumf %32, %34 : vector<128x32xf32>
    %36 = arith.addf %33, %35 : vector<128x32xf32>
    %c0_37 = arith.constant 0 : index
    %c0_38 = arith.constant 0 : index
    %37 = vector.load %arg12[%c0_37, %c0_38] : memref<128x32xf32, #tpu.memory_space<vmem>>, vector<128x32xf32>
    tpu.vector_store %arg12[%c0_37, %c0_38], %36 {strides = array<i32>} : memref<128x32xf32, #tpu.memory_space<vmem>>, vector<128x32xf32>,
    %38 = arith.truncf %36 : vector<128x32xf32> to vector<128x32xbf16>
    %c40_39 = arith.constant 40 : index
    %c0_40 = arith.constant 0 : index
    %39 = vector.load %arg13[%c40_39, %c0_40] : memref<208x32xbf16, #tpu.memory_space<vmem>>, vector<128x32xbf16>
    tpu.vector_store %arg13[%c40_39, %c0_40], %38 {strides = array<i32>} : memref<208x32xbf16, #tpu.memory_space<vmem>>, vector<128x32xbf16>,
    %c1_41 = arith.constant 1 : index
    %c0_42 = arith.constant 0 : index
    %c0_43 = arith.constant 0 : index
    %40 = vector.load %arg7[%c1_41, %c0_42, %c0_43] : memref<2x1x32xf32, #tpu.memory_space<vmem>>, vector<1x1x32xf32>
    %41 = vector.shape_cast %40 : vector<1x1x32xf32> to vector<1x32xf32>
    %c36 = arith.constant 36 : index
    %c0_44 = arith.constant 0 : index
    %42 = vector.load %arg13[%c36, %c0_44] : memref<208x32xbf16, #tpu.memory_space<vmem>>, vector<128x32xbf16>
    %c1_45 = arith.constant 1 : index
    %c0_46 = arith.constant 0 : index
    %c0_47 = arith.constant 0 : index
    %c0_48 = arith.constant 0 : index
    %43 = vector.load %arg6[%c1_45, %c0_46, %c0_47, %c0_48] : memref<2x3x32x32xbf16, #tpu.memory_space<vmem>>, vector<1x1x32x32xbf16>
    %44 = vector.shape_cast %43 : vector<1x1x32x32xbf16> to vector<32x32xbf16>
    %cst_49 = arith.constant dense<0.000000e+00> : vector<128x32xf32>
    %45 = tpu.matmul %42, %44, %cst_49 {dimension_numbers = #tpu.dot_dimension_numbers<[1], [0], [0], [1], [0, 0, 1, 1], [], []>} : vector<128x32xbf16>, vector<32x32xbf16>, vector<128x32xf32> -> vector<128x32xf32>
    %46 = vector.broadcast %41 : vector<1x32xf32> to vector<128x32xf32>
    %47 = arith.addf %46, %45 : vector<128x32xf32>
    %c40_50 = arith.constant 40 : index
    %c0_51 = arith.constant 0 : index
    %48 = vector.load %arg13[%c40_50, %c0_51] : memref<208x32xbf16, #tpu.memory_space<vmem>>, vector<128x32xbf16>
    %c1_52 = arith.constant 1 : index
    %c1_53 = arith.constant 1 : index
    %c0_54 = arith.constant 0 : index
    %c0_55 = arith.constant 0 : index
    %49 = vector.load %arg6[%c1_52, %c1_53, %c0_54, %c0_55] : memref<2x3x32x32xbf16, #tpu.memory_space<vmem>>, vector<1x1x32x32xbf16>
    %50 = vector.shape_cast %49 : vector<1x1x32x32xbf16> to vector<32x32xbf16>
    %cst_56 = arith.constant dense<0.000000e+00> : vector<128x32xf32>
    %51 = tpu.matmul %48, %50, %cst_56 {dimension_numbers = #tpu.dot_dimension_numbers<[1], [0], [0], [1], [0, 0, 1, 1], [], []>} : vector<128x32xbf16>, vector<32x32xbf16>, vector<128x32xf32> -> vector<128x32xf32>
    %52 = arith.addf %47, %51 : vector<128x32xf32>
    %c44 = arith.constant 44 : index
    %c0_57 = arith.constant 0 : index
    %53 = vector.load %arg13[%c44, %c0_57] : memref<208x32xbf16, #tpu.memory_space<vmem>>, vector<128x32xbf16>
    %c1_58 = arith.constant 1 : index
    %c2_59 = arith.constant 2 : index
    %c0_60 = arith.constant 0 : index
    %c0_61 = arith.constant 0 : index
    %54 = vector.load %arg6[%c1_58, %c2_59, %c0_60, %c0_61] : memref<2x3x32x32xbf16, #tpu.memory_space<vmem>>, vector<1x1x32x32xbf16>
    %55 = vector.shape_cast %54 : vector<1x1x32x32xbf16> to vector<32x32xbf16>
    %cst_62 = arith.constant dense<0.000000e+00> : vector<128x32xf32>
    %56 = tpu.matmul %53, %55, %cst_62 {dimension_numbers = #tpu.dot_dimension_numbers<[1], [0], [0], [1], [0, 0, 1, 1], [], []>} : vector<128x32xbf16>, vector<32x32xbf16>, vector<128x32xf32> -> vector<128x32xf32>
    %57 = arith.addf %52, %56 : vector<128x32xf32>
    %c0_63 = arith.constant 0 : index
    %c0_64 = arith.constant 0 : index
    %58 = vector.load %arg12[%c0_63, %c0_64] : memref<128x32xf32, #tpu.memory_space<vmem>>, vector<128x32xf32>
    %cst_65 = arith.constant 0.000000e+00 : f32
    %59 = vector.broadcast %cst_65 : f32 to vector<128x32xf32>
    %60 = arith.maximumf %57, %59 : vector<128x32xf32>
    %61 = arith.addf %58, %60 : vector<128x32xf32>
    %c0_66 = arith.constant 0 : index
    %c0_67 = arith.constant 0 : index
    %62 = vector.load %arg12[%c0_66, %c0_67] : memref<128x32xf32, #tpu.memory_space<vmem>>, vector<128x32xf32>
    tpu.vector_store %arg12[%c0_66, %c0_67], %61 {strides = array<i32>} : memref<128x32xf32, #tpu.memory_space<vmem>>, vector<128x32xf32>,
    %63 = arith.truncf %61 : vector<128x32xf32> to vector<128x32xbf16>
    %c40_68 = arith.constant 40 : index
    %c0_69 = arith.constant 0 : index
    %64 = vector.load %arg13[%c40_68, %c0_69] : memref<208x32xbf16, #tpu.memory_space<vmem>>, vector<128x32xbf16>
    tpu.vector_store %arg13[%c40_68, %c0_69], %63 {strides = array<i32>} : memref<208x32xbf16, #tpu.memory_space<vmem>>, vector<128x32xbf16>,
    %c0_70 = arith.constant 0 : index
    %c0_71 = arith.constant 0 : index
    %c0_72 = arith.constant 0 : index
    %65 = vector.load %arg2[%c0_70, %c0_71, %c0_72] : memref<1x2x48xf32, #tpu.memory_space<vmem>>, vector<1x2x48xf32>
    %66 = vector.shape_cast %65 : vector<1x2x48xf32> to vector<2x48xf32>
    %c0_73 = arith.constant 0 : index
    %c0_74 = arith.constant 0 : index
    %c0_75 = arith.constant 0 : index
    %67 = vector.load %arg8[%c0_73, %c0_74, %c0_75] : memref<75x2x32xbf16, #tpu.memory_space<vmem>>, vector<1x2x32xbf16>
    %68 = vector.shape_cast %67 : vector<1x2x32xbf16> to vector<2x32xbf16>
    %c43 = arith.constant 43 : index
    %c0_76 = arith.constant 0 : index
    %69 = vector.load %arg13[%c43, %c0_76] : memref<208x32xbf16, #tpu.memory_space<vmem>>, vector<48x32xbf16>
    %cst_77 = arith.constant dense<0.000000e+00> : vector<2x48xf32>
    %70 = tpu.matmul %68, %69, %cst_77 {dimension_numbers = #tpu.dot_dimension_numbers<[1], [1], [0], [0], [0, 0, 1, 0], [], []>} : vector<2x32xbf16>, vector<48x32xbf16>, vector<2x48xf32> -> vector<2x48xf32>
    %71 = arith.addf %66, %70 : vector<2x48xf32>
    %c1_78 = arith.constant 1 : index
    %c0_79 = arith.constant 0 : index
    %c0_80 = arith.constant 0 : index
    %72 = vector.load %arg8[%c1_78, %c0_79, %c0_80] : memref<75x2x32xbf16, #tpu.memory_space<vmem>>, vector<1x2x32xbf16>
    %73 = vector.shape_cast %72 : vector<1x2x32xbf16> to vector<2x32xbf16>
    %c44_81 = arith.constant 44 : index
    %c0_82 = arith.constant 0 : index
    %74 = vector.load %arg13[%c44_81, %c0_82] : memref<208x32xbf16, #tpu.memory_space<vmem>>, vector<48x32xbf16>
    %cst_83 = arith.constant dense<0.000000e+00> : vector<2x48xf32>
    %75 = tpu.matmul %73, %74, %cst_83 {dimension_numbers = #tpu.dot_dimension_numbers<[1], [1], [0], [0], [0, 0, 1, 0], [], []>} : vector<2x32xbf16>, vector<48x32xbf16>, vector<2x48xf32> -> vector<2x48xf32>
    %76 = arith.addf %71, %75 : vector<2x48xf32>
    %c2_84 = arith.constant 2 : index
    %c0_85 = arith.constant 0 : index
    %c0_86 = arith.constant 0 : index
    %77 = vector.load %arg8[%c2_84, %c0_85, %c0_86] : memref<75x2x32xbf16, #tpu.memory_space<vmem>>, vector<1x2x32xbf16>
    %78 = vector.shape_cast %77 : vector<1x2x32xbf16> to vector<2x32xbf16>
    %c45 = arith.constant 45 : index
    %c0_87 = arith.constant 0 : index
    %79 = vector.load %arg13[%c45, %c0_87] : memref<208x32xbf16, #tpu.memory_space<vmem>>, vector<48x32xbf16>
    %cst_88 = arith.constant dense<0.000000e+00> : vector<2x48xf32>
    %80 = tpu.matmul %78, %79, %cst_88 {dimension_numbers = #tpu.dot_dimension_numbers<[1], [1], [0], [0], [0, 0, 1, 0], [], []>} : vector<2x32xbf16>, vector<48x32xbf16>, vector<2x48xf32> -> vector<2x48xf32>
    %81 = arith.addf %76, %80 : vector<2x48xf32>
    %c3 = arith.constant 3 : index
    %c0_89 = arith.constant 0 : index
    %c0_90 = arith.constant 0 : index
    %82 = vector.load %arg8[%c3, %c0_89, %c0_90] : memref<75x2x32xbf16, #tpu.memory_space<vmem>>, vector<1x2x32xbf16>
    %83 = vector.shape_cast %82 : vector<1x2x32xbf16> to vector<2x32xbf16>
    %c46 = arith.constant 46 : index
    %c0_91 = arith.constant 0 : index
    %84 = vector.load %arg13[%c46, %c0_91] : memref<208x32xbf16, #tpu.memory_space<vmem>>, vector<48x32xbf16>
    %cst_92 = arith.constant dense<0.000000e+00> : vector<2x48xf32>
    %85 = tpu.matmul %83, %84, %cst_92 {dimension_numbers = #tpu.dot_dimension_numbers<[1], [1], [0], [0], [0, 0, 1, 0], [], []>} : vector<2x32xbf16>, vector<48x32xbf16>, vector<2x48xf32> -> vector<2x48xf32>
    %86 = arith.addf %81, %85 : vector<2x48xf32>
    %c4 = arith.constant 4 : index
    %c0_93 = arith.constant 0 : index
    %c0_94 = arith.constant 0 : index
    %87 = vector.load %arg8[%c4, %c0_93, %c0_94] : memref<75x2x32xbf16, #tpu.memory_space<vmem>>, vector<1x2x32xbf16>
    %88 = vector.shape_cast %87 : vector<1x2x32xbf16> to vector<2x32xbf16>
    %c47 = arith.constant 47 : index
    %c0_95 = arith.constant 0 : index
    %89 = vector.load %arg13[%c47, %c0_95] : memref<208x32xbf16, #tpu.memory_space<vmem>>, vector<48x32xbf16>
    %cst_96 = arith.constant dense<0.000000e+00> : vector<2x48xf32>
    %90 = tpu.matmul %88, %89, %cst_96 {dimension_numbers = #tpu.dot_dimension_numbers<[1], [1], [0], [0], [0, 0, 1, 0], [], []>} : vector<2x32xbf16>, vector<48x32xbf16>, vector<2x48xf32> -> vector<2x48xf32>
    %91 = arith.addf %86, %90 : vector<2x48xf32>
    %c5 = arith.constant 5 : index
    %c0_97 = arith.constant 0 : index
    %c0_98 = arith.constant 0 : index
    %92 = vector.load %arg8[%c5, %c0_97, %c0_98] : memref<75x2x32xbf16, #tpu.memory_space<vmem>>, vector<1x2x32xbf16>
    %93 = vector.shape_cast %92 : vector<1x2x32xbf16> to vector<2x32xbf16>
    %c48 = arith.constant 48 : index
    %c0_99 = arith.constant 0 : index
    %94 = vector.load %arg13[%c48, %c0_99] : memref<208x32xbf16, #tpu.memory_space<vmem>>, vector<48x32xbf16>
    %cst_100 = arith.constant dense<0.000000e+00> : vector<2x48xf32>
    %95 = tpu.matmul %93, %94, %cst_100 {dimension_numbers = #tpu.dot_dimension_numbers<[1], [1], [0], [0], [0, 0, 1, 0], [], []>} : vector<2x32xbf16>, vector<48x32xbf16>, vector<2x48xf32> -> vector<2x48xf32>
    %96 = arith.addf %91, %95 : vector<2x48xf32>
    %c6 = arith.constant 6 : index
    %c0_101 = arith.constant 0 : index
    %c0_102 = arith.constant 0 : index
    %97 = vector.load %arg8[%c6, %c0_101, %c0_102] : memref<75x2x32xbf16, #tpu.memory_space<vmem>>, vector<1x2x32xbf16>
    %98 = vector.shape_cast %97 : vector<1x2x32xbf16> to vector<2x32xbf16>
    %c49 = arith.constant 49 : index
    %c0_103 = arith.constant 0 : index
    %99 = vector.load %arg13[%c49, %c0_103] : memref<208x32xbf16, #tpu.memory_space<vmem>>, vector<48x32xbf16>
    %cst_104 = arith.constant dense<0.000000e+00> : vector<2x48xf32>
    %100 = tpu.matmul %98, %99, %cst_104 {dimension_numbers = #tpu.dot_dimension_numbers<[1], [1], [0], [0], [0, 0, 1, 0], [], []>} : vector<2x32xbf16>, vector<48x32xbf16>, vector<2x48xf32> -> vector<2x48xf32>
    %101 = arith.addf %96, %100 : vector<2x48xf32>
    %c7 = arith.constant 7 : index
    %c0_105 = arith.constant 0 : index
    %c0_106 = arith.constant 0 : index
    %102 = vector.load %arg8[%c7, %c0_105, %c0_106] : memref<75x2x32xbf16, #tpu.memory_space<vmem>>, vector<1x2x32xbf16>
    %103 = vector.shape_cast %102 : vector<1x2x32xbf16> to vector<2x32xbf16>
    %c50 = arith.constant 50 : index
    %c0_107 = arith.constant 0 : index
    %104 = vector.load %arg13[%c50, %c0_107] : memref<208x32xbf16, #tpu.memory_space<vmem>>, vector<48x32xbf16>
    %cst_108 = arith.constant dense<0.000000e+00> : vector<2x48xf32>
    %105 = tpu.matmul %103, %104, %cst_108 {dimension_numbers = #tpu.dot_dimension_numbers<[1], [1], [0], [0], [0, 0, 1, 0], [], []>} : vector<2x32xbf16>, vector<48x32xbf16>, vector<2x48xf32> -> vector<2x48xf32>
    %106 = arith.addf %101, %105 : vector<2x48xf32>
    %c8 = arith.constant 8 : index
    %c0_109 = arith.constant 0 : index
    %c0_110 = arith.constant 0 : index
    %107 = vector.load %arg8[%c8, %c0_109, %c0_110] : memref<75x2x32xbf16, #tpu.memory_space<vmem>>, vector<1x2x32xbf16>
    %108 = vector.shape_cast %107 : vector<1x2x32xbf16> to vector<2x32xbf16>
    %c51 = arith.constant 51 : index
    %c0_111 = arith.constant 0 : index
    %109 = vector.load %arg13[%c51, %c0_111] : memref<208x32xbf16, #tpu.memory_space<vmem>>, vector<48x32xbf16>
    %cst_112 = arith.constant dense<0.000000e+00> : vector<2x48xf32>
    %110 = tpu.matmul %108, %109, %cst_112 {dimension_numbers = #tpu.dot_dimension_numbers<[1], [1], [0], [0], [0, 0, 1, 0], [], []>} : vector<2x32xbf16>, vector<48x32xbf16>, vector<2x48xf32> -> vector<2x48xf32>
    %111 = arith.addf %106, %110 : vector<2x48xf32>
    %c9 = arith.constant 9 : index
    %c0_113 = arith.constant 0 : index
    %c0_114 = arith.constant 0 : index
    %112 = vector.load %arg8[%c9, %c0_113, %c0_114] : memref<75x2x32xbf16, #tpu.memory_space<vmem>>, vector<1x2x32xbf16>
    %113 = vector.shape_cast %112 : vector<1x2x32xbf16> to vector<2x32xbf16>
    %c52 = arith.constant 52 : index
    %c0_115 = arith.constant 0 : index
    %114 = vector.load %arg13[%c52, %c0_115] : memref<208x32xbf16, #tpu.memory_space<vmem>>, vector<48x32xbf16>
    %cst_116 = arith.constant dense<0.000000e+00> : vector<2x48xf32>
    %115 = tpu.matmul %113, %114, %cst_116 {dimension_numbers = #tpu.dot_dimension_numbers<[1], [1], [0], [0], [0, 0, 1, 0], [], []>} : vector<2x32xbf16>, vector<48x32xbf16>, vector<2x48xf32> -> vector<2x48xf32>
    %116 = arith.addf %111, %115 : vector<2x48xf32>
    %c10 = arith.constant 10 : index
    %c0_117 = arith.constant 0 : index
    %c0_118 = arith.constant 0 : index
    %117 = vector.load %arg8[%c10, %c0_117, %c0_118] : memref<75x2x32xbf16, #tpu.memory_space<vmem>>, vector<1x2x32xbf16>
    %118 = vector.shape_cast %117 : vector<1x2x32xbf16> to vector<2x32xbf16>
    %c53 = arith.constant 53 : index
    %c0_119 = arith.constant 0 : index
    %119 = vector.load %arg13[%c53, %c0_119] : memref<208x32xbf16, #tpu.memory_space<vmem>>, vector<48x32xbf16>
    %cst_120 = arith.constant dense<0.000000e+00> : vector<2x48xf32>
    %120 = tpu.matmul %118, %119, %cst_120 {dimension_numbers = #tpu.dot_dimension_numbers<[1], [1], [0], [0], [0, 0, 1, 0], [], []>} : vector<2x32xbf16>, vector<48x32xbf16>, vector<2x48xf32> -> vector<2x48xf32>
    %121 = arith.addf %116, %120 : vector<2x48xf32>
    %c11 = arith.constant 11 : index
    %c0_121 = arith.constant 0 : index
    %c0_122 = arith.constant 0 : index
    %122 = vector.load %arg8[%c11, %c0_121, %c0_122] : memref<75x2x32xbf16, #tpu.memory_space<vmem>>, vector<1x2x32xbf16>
    %123 = vector.shape_cast %122 : vector<1x2x32xbf16> to vector<2x32xbf16>
    %c54 = arith.constant 54 : index
    %c0_123 = arith.constant 0 : index
    %124 = vector.load %arg13[%c54, %c0_123] : memref<208x32xbf16, #tpu.memory_space<vmem>>, vector<48x32xbf16>
    %cst_124 = arith.constant dense<0.000000e+00> : vector<2x48xf32>
    %125 = tpu.matmul %123, %124, %cst_124 {dimension_numbers = #tpu.dot_dimension_numbers<[1], [1], [0], [0], [0, 0, 1, 0], [], []>} : vector<2x32xbf16>, vector<48x32xbf16>, vector<2x48xf32> -> vector<2x48xf32>
    %126 = arith.addf %121, %125 : vector<2x48xf32>
    %c12 = arith.constant 12 : index
    %c0_125 = arith.constant 0 : index
    %c0_126 = arith.constant 0 : index
    %127 = vector.load %arg8[%c12, %c0_125, %c0_126] : memref<75x2x32xbf16, #tpu.memory_space<vmem>>, vector<1x2x32xbf16>
    %128 = vector.shape_cast %127 : vector<1x2x32xbf16> to vector<2x32xbf16>
    %c55 = arith.constant 55 : index
    %c0_127 = arith.constant 0 : index
    %129 = vector.load %arg13[%c55, %c0_127] : memref<208x32xbf16, #tpu.memory_space<vmem>>, vector<48x32xbf16>
    %cst_128 = arith.constant dense<0.000000e+00> : vector<2x48xf32>
    %130 = tpu.matmul %128, %129, %cst_128 {dimension_numbers = #tpu.dot_dimension_numbers<[1], [1], [0], [0], [0, 0, 1, 0], [], []>} : vector<2x32xbf16>, vector<48x32xbf16>, vector<2x48xf32> -> vector<2x48xf32>
    %131 = arith.addf %126, %130 : vector<2x48xf32>
    %c13 = arith.constant 13 : index
    %c0_129 = arith.constant 0 : index
    %c0_130 = arith.constant 0 : index
    %132 = vector.load %arg8[%c13, %c0_129, %c0_130] : memref<75x2x32xbf16, #tpu.memory_space<vmem>>, vector<1x2x32xbf16>
    %133 = vector.shape_cast %132 : vector<1x2x32xbf16> to vector<2x32xbf16>
    %c56 = arith.constant 56 : index
    %c0_131 = arith.constant 0 : index
    %134 = vector.load %arg13[%c56, %c0_131] : memref<208x32xbf16, #tpu.memory_space<vmem>>, vector<48x32xbf16>
    %cst_132 = arith.constant dense<0.000000e+00> : vector<2x48xf32>
    %135 = tpu.matmul %133, %134, %cst_132 {dimension_numbers = #tpu.dot_dimension_numbers<[1], [1], [0], [0], [0, 0, 1, 0], [], []>} : vector<2x32xbf16>, vector<48x32xbf16>, vector<2x48xf32> -> vector<2x48xf32>
    %136 = arith.addf %131, %135 : vector<2x48xf32>
    %c14 = arith.constant 14 : index
    %c0_133 = arith.constant 0 : index
    %c0_134 = arith.constant 0 : index
    %137 = vector.load %arg8[%c14, %c0_133, %c0_134] : memref<75x2x32xbf16, #tpu.memory_space<vmem>>, vector<1x2x32xbf16>
    %138 = vector.shape_cast %137 : vector<1x2x32xbf16> to vector<2x32xbf16>
    %c57 = arith.constant 57 : index
    %c0_135 = arith.constant 0 : index
    %139 = vector.load %arg13[%c57, %c0_135] : memref<208x32xbf16, #tpu.memory_space<vmem>>, vector<48x32xbf16>
    %cst_136 = arith.constant dense<0.000000e+00> : vector<2x48xf32>
    %140 = tpu.matmul %138, %139, %cst_136 {dimension_numbers = #tpu.dot_dimension_numbers<[1], [1], [0], [0], [0, 0, 1, 0], [], []>} : vector<2x32xbf16>, vector<48x32xbf16>, vector<2x48xf32> -> vector<2x48xf32>
    %141 = arith.addf %136, %140 : vector<2x48xf32>
    %c15 = arith.constant 15 : index
    %c0_137 = arith.constant 0 : index
    %c0_138 = arith.constant 0 : index
    %142 = vector.load %arg8[%c15, %c0_137, %c0_138] : memref<75x2x32xbf16, #tpu.memory_space<vmem>>, vector<1x2x32xbf16>
    %143 = vector.shape_cast %142 : vector<1x2x32xbf16> to vector<2x32xbf16>
    %c58 = arith.constant 58 : index
    %c0_139 = arith.constant 0 : index
    %144 = vector.load %arg13[%c58, %c0_139] : memref<208x32xbf16, #tpu.memory_space<vmem>>, vector<48x32xbf16>
    %cst_140 = arith.constant dense<0.000000e+00> : vector<2x48xf32>
    %145 = tpu.matmul %143, %144, %cst_140 {dimension_numbers = #tpu.dot_dimension_numbers<[1], [1], [0], [0], [0, 0, 1, 0], [], []>} : vector<2x32xbf16>, vector<48x32xbf16>, vector<2x48xf32> -> vector<2x48xf32>
    %146 = arith.addf %141, %145 : vector<2x48xf32>
    %c16 = arith.constant 16 : index
    %c0_141 = arith.constant 0 : index
    %c0_142 = arith.constant 0 : index
    %147 = vector.load %arg8[%c16, %c0_141, %c0_142] : memref<75x2x32xbf16, #tpu.memory_space<vmem>>, vector<1x2x32xbf16>
    %148 = vector.shape_cast %147 : vector<1x2x32xbf16> to vector<2x32xbf16>
    %c59 = arith.constant 59 : index
    %c0_143 = arith.constant 0 : index
    %149 = vector.load %arg13[%c59, %c0_143] : memref<208x32xbf16, #tpu.memory_space<vmem>>, vector<48x32xbf16>
    %cst_144 = arith.constant dense<0.000000e+00> : vector<2x48xf32>
    %150 = tpu.matmul %148, %149, %cst_144 {dimension_numbers = #tpu.dot_dimension_numbers<[1], [1], [0], [0], [0, 0, 1, 0], [], []>} : vector<2x32xbf16>, vector<48x32xbf16>, vector<2x48xf32> -> vector<2x48xf32>
    %151 = arith.addf %146, %150 : vector<2x48xf32>
    %c17 = arith.constant 17 : index
    %c0_145 = arith.constant 0 : index
    %c0_146 = arith.constant 0 : index
    %152 = vector.load %arg8[%c17, %c0_145, %c0_146] : memref<75x2x32xbf16, #tpu.memory_space<vmem>>, vector<1x2x32xbf16>
    %153 = vector.shape_cast %152 : vector<1x2x32xbf16> to vector<2x32xbf16>
    %c60 = arith.constant 60 : index
    %c0_147 = arith.constant 0 : index
    %154 = vector.load %arg13[%c60, %c0_147] : memref<208x32xbf16, #tpu.memory_space<vmem>>, vector<48x32xbf16>
    %cst_148 = arith.constant dense<0.000000e+00> : vector<2x48xf32>
    %155 = tpu.matmul %153, %154, %cst_148 {dimension_numbers = #tpu.dot_dimension_numbers<[1], [1], [0], [0], [0, 0, 1, 0], [], []>} : vector<2x32xbf16>, vector<48x32xbf16>, vector<2x48xf32> -> vector<2x48xf32>
    %156 = arith.addf %151, %155 : vector<2x48xf32>
    %c18 = arith.constant 18 : index
    %c0_149 = arith.constant 0 : index
    %c0_150 = arith.constant 0 : index
    %157 = vector.load %arg8[%c18, %c0_149, %c0_150] : memref<75x2x32xbf16, #tpu.memory_space<vmem>>, vector<1x2x32xbf16>
    %158 = vector.shape_cast %157 : vector<1x2x32xbf16> to vector<2x32xbf16>
    %c61 = arith.constant 61 : index
    %c0_151 = arith.constant 0 : index
    %159 = vector.load %arg13[%c61, %c0_151] : memref<208x32xbf16, #tpu.memory_space<vmem>>, vector<48x32xbf16>
    %cst_152 = arith.constant dense<0.000000e+00> : vector<2x48xf32>
    %160 = tpu.matmul %158, %159, %cst_152 {dimension_numbers = #tpu.dot_dimension_numbers<[1], [1], [0], [0], [0, 0, 1, 0], [], []>} : vector<2x32xbf16>, vector<48x32xbf16>, vector<2x48xf32> -> vector<2x48xf32>
    %161 = arith.addf %156, %160 : vector<2x48xf32>
    %c19 = arith.constant 19 : index
    %c0_153 = arith.constant 0 : index
    %c0_154 = arith.constant 0 : index
    %162 = vector.load %arg8[%c19, %c0_153, %c0_154] : memref<75x2x32xbf16, #tpu.memory_space<vmem>>, vector<1x2x32xbf16>
    %163 = vector.shape_cast %162 : vector<1x2x32xbf16> to vector<2x32xbf16>
    %c62 = arith.constant 62 : index
    %c0_155 = arith.constant 0 : index
    %164 = vector.load %arg13[%c62, %c0_155] : memref<208x32xbf16, #tpu.memory_space<vmem>>, vector<48x32xbf16>
    %cst_156 = arith.constant dense<0.000000e+00> : vector<2x48xf32>
    %165 = tpu.matmul %163, %164, %cst_156 {dimension_numbers = #tpu.dot_dimension_numbers<[1], [1], [0], [0], [0, 0, 1, 0], [], []>} : vector<2x32xbf16>, vector<48x32xbf16>, vector<2x48xf32> -> vector<2x48xf32>
    %166 = arith.addf %161, %165 : vector<2x48xf32>
    %c20 = arith.constant 20 : index
    %c0_157 = arith.constant 0 : index
    %c0_158 = arith.constant 0 : index
    %167 = vector.load %arg8[%c20, %c0_157, %c0_158] : memref<75x2x32xbf16, #tpu.memory_space<vmem>>, vector<1x2x32xbf16>
    %168 = vector.shape_cast %167 : vector<1x2x32xbf16> to vector<2x32xbf16>
    %c63 = arith.constant 63 : index
    %c0_159 = arith.constant 0 : index
    %169 = vector.load %arg13[%c63, %c0_159] : memref<208x32xbf16, #tpu.memory_space<vmem>>, vector<48x32xbf16>
    %cst_160 = arith.constant dense<0.000000e+00> : vector<2x48xf32>
    %170 = tpu.matmul %168, %169, %cst_160 {dimension_numbers = #tpu.dot_dimension_numbers<[1], [1], [0], [0], [0, 0, 1, 0], [], []>} : vector<2x32xbf16>, vector<48x32xbf16>, vector<2x48xf32> -> vector<2x48xf32>
    %171 = arith.addf %166, %170 : vector<2x48xf32>
    %c21 = arith.constant 21 : index
    %c0_161 = arith.constant 0 : index
    %c0_162 = arith.constant 0 : index
    %172 = vector.load %arg8[%c21, %c0_161, %c0_162] : memref<75x2x32xbf16, #tpu.memory_space<vmem>>, vector<1x2x32xbf16>
    %173 = vector.shape_cast %172 : vector<1x2x32xbf16> to vector<2x32xbf16>
    %c64 = arith.constant 64 : index
    %c0_163 = arith.constant 0 : index
    %174 = vector.load %arg13[%c64, %c0_163] : memref<208x32xbf16, #tpu.memory_space<vmem>>, vector<48x32xbf16>
    %cst_164 = arith.constant dense<0.000000e+00> : vector<2x48xf32>
    %175 = tpu.matmul %173, %174, %cst_164 {dimension_numbers = #tpu.dot_dimension_numbers<[1], [1], [0], [0], [0, 0, 1, 0], [], []>} : vector<2x32xbf16>, vector<48x32xbf16>, vector<2x48xf32> -> vector<2x48xf32>
    %176 = arith.addf %171, %175 : vector<2x48xf32>
    %c22 = arith.constant 22 : index
    %c0_165 = arith.constant 0 : index
    %c0_166 = arith.constant 0 : index
    %177 = vector.load %arg8[%c22, %c0_165, %c0_166] : memref<75x2x32xbf16, #tpu.memory_space<vmem>>, vector<1x2x32xbf16>
    %178 = vector.shape_cast %177 : vector<1x2x32xbf16> to vector<2x32xbf16>
    %c65 = arith.constant 65 : index
    %c0_167 = arith.constant 0 : index
    %179 = vector.load %arg13[%c65, %c0_167] : memref<208x32xbf16, #tpu.memory_space<vmem>>, vector<48x32xbf16>
    %cst_168 = arith.constant dense<0.000000e+00> : vector<2x48xf32>
    %180 = tpu.matmul %178, %179, %cst_168 {dimension_numbers = #tpu.dot_dimension_numbers<[1], [1], [0], [0], [0, 0, 1, 0], [], []>} : vector<2x32xbf16>, vector<48x32xbf16>, vector<2x48xf32> -> vector<2x48xf32>
    %181 = arith.addf %176, %180 : vector<2x48xf32>
    %c23 = arith.constant 23 : index
    %c0_169 = arith.constant 0 : index
    %c0_170 = arith.constant 0 : index
    %182 = vector.load %arg8[%c23, %c0_169, %c0_170] : memref<75x2x32xbf16, #tpu.memory_space<vmem>>, vector<1x2x32xbf16>
    %183 = vector.shape_cast %182 : vector<1x2x32xbf16> to vector<2x32xbf16>
    %c66 = arith.constant 66 : index
    %c0_171 = arith.constant 0 : index
    %184 = vector.load %arg13[%c66, %c0_171] : memref<208x32xbf16, #tpu.memory_space<vmem>>, vector<48x32xbf16>
    %cst_172 = arith.constant dense<0.000000e+00> : vector<2x48xf32>
    %185 = tpu.matmul %183, %184, %cst_172 {dimension_numbers = #tpu.dot_dimension_numbers<[1], [1], [0], [0], [0, 0, 1, 0], [], []>} : vector<2x32xbf16>, vector<48x32xbf16>, vector<2x48xf32> -> vector<2x48xf32>
    %186 = arith.addf %181, %185 : vector<2x48xf32>
    %c24 = arith.constant 24 : index
    %c0_173 = arith.constant 0 : index
    %c0_174 = arith.constant 0 : index
    %187 = vector.load %arg8[%c24, %c0_173, %c0_174] : memref<75x2x32xbf16, #tpu.memory_space<vmem>>, vector<1x2x32xbf16>
    %188 = vector.shape_cast %187 : vector<1x2x32xbf16> to vector<2x32xbf16>
    %c67 = arith.constant 67 : index
    %c0_175 = arith.constant 0 : index
    %189 = vector.load %arg13[%c67, %c0_175] : memref<208x32xbf16, #tpu.memory_space<vmem>>, vector<48x32xbf16>
    %cst_176 = arith.constant dense<0.000000e+00> : vector<2x48xf32>
    %190 = tpu.matmul %188, %189, %cst_176 {dimension_numbers = #tpu.dot_dimension_numbers<[1], [1], [0], [0], [0, 0, 1, 0], [], []>} : vector<2x32xbf16>, vector<48x32xbf16>, vector<2x48xf32> -> vector<2x48xf32>
    %191 = arith.addf %186, %190 : vector<2x48xf32>
    %c25 = arith.constant 25 : index
    %c0_177 = arith.constant 0 : index
    %c0_178 = arith.constant 0 : index
    %192 = vector.load %arg8[%c25, %c0_177, %c0_178] : memref<75x2x32xbf16, #tpu.memory_space<vmem>>, vector<1x2x32xbf16>
    %193 = vector.shape_cast %192 : vector<1x2x32xbf16> to vector<2x32xbf16>
    %c68 = arith.constant 68 : index
    %c0_179 = arith.constant 0 : index
    %194 = vector.load %arg13[%c68, %c0_179] : memref<208x32xbf16, #tpu.memory_space<vmem>>, vector<48x32xbf16>
    %cst_180 = arith.constant dense<0.000000e+00> : vector<2x48xf32>
    %195 = tpu.matmul %193, %194, %cst_180 {dimension_numbers = #tpu.dot_dimension_numbers<[1], [1], [0], [0], [0, 0, 1, 0], [], []>} : vector<2x32xbf16>, vector<48x32xbf16>, vector<2x48xf32> -> vector<2x48xf32>
    %196 = arith.addf %191, %195 : vector<2x48xf32>
    %c26 = arith.constant 26 : index
    %c0_181 = arith.constant 0 : index
    %c0_182 = arith.constant 0 : index
    %197 = vector.load %arg8[%c26, %c0_181, %c0_182] : memref<75x2x32xbf16, #tpu.memory_space<vmem>>, vector<1x2x32xbf16>
    %198 = vector.shape_cast %197 : vector<1x2x32xbf16> to vector<2x32xbf16>
    %c69 = arith.constant 69 : index
    %c0_183 = arith.constant 0 : index
    %199 = vector.load %arg13[%c69, %c0_183] : memref<208x32xbf16, #tpu.memory_space<vmem>>, vector<48x32xbf16>
    %cst_184 = arith.constant dense<0.000000e+00> : vector<2x48xf32>
    %200 = tpu.matmul %198, %199, %cst_184 {dimension_numbers = #tpu.dot_dimension_numbers<[1], [1], [0], [0], [0, 0, 1, 0], [], []>} : vector<2x32xbf16>, vector<48x32xbf16>, vector<2x48xf32> -> vector<2x48xf32>
    %201 = arith.addf %196, %200 : vector<2x48xf32>
    %c27 = arith.constant 27 : index
    %c0_185 = arith.constant 0 : index
    %c0_186 = arith.constant 0 : index
    %202 = vector.load %arg8[%c27, %c0_185, %c0_186] : memref<75x2x32xbf16, #tpu.memory_space<vmem>>, vector<1x2x32xbf16>
    %203 = vector.shape_cast %202 : vector<1x2x32xbf16> to vector<2x32xbf16>
    %c70 = arith.constant 70 : index
    %c0_187 = arith.constant 0 : index
    %204 = vector.load %arg13[%c70, %c0_187] : memref<208x32xbf16, #tpu.memory_space<vmem>>, vector<48x32xbf16>
    %cst_188 = arith.constant dense<0.000000e+00> : vector<2x48xf32>
    %205 = tpu.matmul %203, %204, %cst_188 {dimension_numbers = #tpu.dot_dimension_numbers<[1], [1], [0], [0], [0, 0, 1, 0], [], []>} : vector<2x32xbf16>, vector<48x32xbf16>, vector<2x48xf32> -> vector<2x48xf32>
    %206 = arith.addf %201, %205 : vector<2x48xf32>
    %c28 = arith.constant 28 : index
    %c0_189 = arith.constant 0 : index
    %c0_190 = arith.constant 0 : index
    %207 = vector.load %arg8[%c28, %c0_189, %c0_190] : memref<75x2x32xbf16, #tpu.memory_space<vmem>>, vector<1x2x32xbf16>
    %208 = vector.shape_cast %207 : vector<1x2x32xbf16> to vector<2x32xbf16>
    %c71 = arith.constant 71 : index
    %c0_191 = arith.constant 0 : index
    %209 = vector.load %arg13[%c71, %c0_191] : memref<208x32xbf16, #tpu.memory_space<vmem>>, vector<48x32xbf16>
    %cst_192 = arith.constant dense<0.000000e+00> : vector<2x48xf32>
    %210 = tpu.matmul %208, %209, %cst_192 {dimension_numbers = #tpu.dot_dimension_numbers<[1], [1], [0], [0], [0, 0, 1, 0], [], []>} : vector<2x32xbf16>, vector<48x32xbf16>, vector<2x48xf32> -> vector<2x48xf32>
    %211 = arith.addf %206, %210 : vector<2x48xf32>
    %c29 = arith.constant 29 : index
    %c0_193 = arith.constant 0 : index
    %c0_194 = arith.constant 0 : index
    %212 = vector.load %arg8[%c29, %c0_193, %c0_194] : memref<75x2x32xbf16, #tpu.memory_space<vmem>>, vector<1x2x32xbf16>
    %213 = vector.shape_cast %212 : vector<1x2x32xbf16> to vector<2x32xbf16>
    %c72 = arith.constant 72 : index
    %c0_195 = arith.constant 0 : index
    %214 = vector.load %arg13[%c72, %c0_195] : memref<208x32xbf16, #tpu.memory_space<vmem>>, vector<48x32xbf16>
    %cst_196 = arith.constant dense<0.000000e+00> : vector<2x48xf32>
    %215 = tpu.matmul %213, %214, %cst_196 {dimension_numbers = #tpu.dot_dimension_numbers<[1], [1], [0], [0], [0, 0, 1, 0], [], []>} : vector<2x32xbf16>, vector<48x32xbf16>, vector<2x48xf32> -> vector<2x48xf32>
    %216 = arith.addf %211, %215 : vector<2x48xf32>
    %c30 = arith.constant 30 : index
    %c0_197 = arith.constant 0 : index
    %c0_198 = arith.constant 0 : index
    %217 = vector.load %arg8[%c30, %c0_197, %c0_198] : memref<75x2x32xbf16, #tpu.memory_space<vmem>>, vector<1x2x32xbf16>
    %218 = vector.shape_cast %217 : vector<1x2x32xbf16> to vector<2x32xbf16>
    %c73 = arith.constant 73 : index
    %c0_199 = arith.constant 0 : index
    %219 = vector.load %arg13[%c73, %c0_199] : memref<208x32xbf16, #tpu.memory_space<vmem>>, vector<48x32xbf16>
    %cst_200 = arith.constant dense<0.000000e+00> : vector<2x48xf32>
    %220 = tpu.matmul %218, %219, %cst_200 {dimension_numbers = #tpu.dot_dimension_numbers<[1], [1], [0], [0], [0, 0, 1, 0], [], []>} : vector<2x32xbf16>, vector<48x32xbf16>, vector<2x48xf32> -> vector<2x48xf32>
    %221 = arith.addf %216, %220 : vector<2x48xf32>
    %c31 = arith.constant 31 : index
    %c0_201 = arith.constant 0 : index
    %c0_202 = arith.constant 0 : index
    %222 = vector.load %arg8[%c31, %c0_201, %c0_202] : memref<75x2x32xbf16, #tpu.memory_space<vmem>>, vector<1x2x32xbf16>
    %223 = vector.shape_cast %222 : vector<1x2x32xbf16> to vector<2x32xbf16>
    %c74 = arith.constant 74 : index
    %c0_203 = arith.constant 0 : index
    %224 = vector.load %arg13[%c74, %c0_203] : memref<208x32xbf16, #tpu.memory_space<vmem>>, vector<48x32xbf16>
    %cst_204 = arith.constant dense<0.000000e+00> : vector<2x48xf32>
    %225 = tpu.matmul %223, %224, %cst_204 {dimension_numbers = #tpu.dot_dimension_numbers<[1], [1], [0], [0], [0, 0, 1, 0], [], []>} : vector<2x32xbf16>, vector<48x32xbf16>, vector<2x48xf32> -> vector<2x48xf32>
    %226 = arith.addf %221, %225 : vector<2x48xf32>
    %c32 = arith.constant 32 : index
    %c0_205 = arith.constant 0 : index
    %c0_206 = arith.constant 0 : index
    %227 = vector.load %arg8[%c32, %c0_205, %c0_206] : memref<75x2x32xbf16, #tpu.memory_space<vmem>>, vector<1x2x32xbf16>
    %228 = vector.shape_cast %227 : vector<1x2x32xbf16> to vector<2x32xbf16>
    %c75 = arith.constant 75 : index
    %c0_207 = arith.constant 0 : index
    %229 = vector.load %arg13[%c75, %c0_207] : memref<208x32xbf16, #tpu.memory_space<vmem>>, vector<48x32xbf16>
    %cst_208 = arith.constant dense<0.000000e+00> : vector<2x48xf32>
    %230 = tpu.matmul %228, %229, %cst_208 {dimension_numbers = #tpu.dot_dimension_numbers<[1], [1], [0], [0], [0, 0, 1, 0], [], []>} : vector<2x32xbf16>, vector<48x32xbf16>, vector<2x48xf32> -> vector<2x48xf32>
    %231 = arith.addf %226, %230 : vector<2x48xf32>
    %c33 = arith.constant 33 : index
    %c0_209 = arith.constant 0 : index
    %c0_210 = arith.constant 0 : index
    %232 = vector.load %arg8[%c33, %c0_209, %c0_210] : memref<75x2x32xbf16, #tpu.memory_space<vmem>>, vector<1x2x32xbf16>
    %233 = vector.shape_cast %232 : vector<1x2x32xbf16> to vector<2x32xbf16>
    %c76 = arith.constant 76 : index
    %c0_211 = arith.constant 0 : index
    %234 = vector.load %arg13[%c76, %c0_211] : memref<208x32xbf16, #tpu.memory_space<vmem>>, vector<48x32xbf16>
    %cst_212 = arith.constant dense<0.000000e+00> : vector<2x48xf32>
    %235 = tpu.matmul %233, %234, %cst_212 {dimension_numbers = #tpu.dot_dimension_numbers<[1], [1], [0], [0], [0, 0, 1, 0], [], []>} : vector<2x32xbf16>, vector<48x32xbf16>, vector<2x48xf32> -> vector<2x48xf32>
    %236 = arith.addf %231, %235 : vector<2x48xf32>
    %c34 = arith.constant 34 : index
    %c0_213 = arith.constant 0 : index
    %c0_214 = arith.constant 0 : index
    %237 = vector.load %arg8[%c34, %c0_213, %c0_214] : memref<75x2x32xbf16, #tpu.memory_space<vmem>>, vector<1x2x32xbf16>
    %238 = vector.shape_cast %237 : vector<1x2x32xbf16> to vector<2x32xbf16>
    %c77 = arith.constant 77 : index
    %c0_215 = arith.constant 0 : index
    %239 = vector.load %arg13[%c77, %c0_215] : memref<208x32xbf16, #tpu.memory_space<vmem>>, vector<48x32xbf16>
    %cst_216 = arith.constant dense<0.000000e+00> : vector<2x48xf32>
    %240 = tpu.matmul %238, %239, %cst_216 {dimension_numbers = #tpu.dot_dimension_numbers<[1], [1], [0], [0], [0, 0, 1, 0], [], []>} : vector<2x32xbf16>, vector<48x32xbf16>, vector<2x48xf32> -> vector<2x48xf32>
    %241 = arith.addf %236, %240 : vector<2x48xf32>
    %c35 = arith.constant 35 : index
    %c0_217 = arith.constant 0 : index
    %c0_218 = arith.constant 0 : index
    %242 = vector.load %arg8[%c35, %c0_217, %c0_218] : memref<75x2x32xbf16, #tpu.memory_space<vmem>>, vector<1x2x32xbf16>
    %243 = vector.shape_cast %242 : vector<1x2x32xbf16> to vector<2x32xbf16>
    %c78 = arith.constant 78 : index
    %c0_219 = arith.constant 0 : index
    %244 = vector.load %arg13[%c78, %c0_219] : memref<208x32xbf16, #tpu.memory_space<vmem>>, vector<48x32xbf16>
    %cst_220 = arith.constant dense<0.000000e+00> : vector<2x48xf32>
    %245 = tpu.matmul %243, %244, %cst_220 {dimension_numbers = #tpu.dot_dimension_numbers<[1], [1], [0], [0], [0, 0, 1, 0], [], []>} : vector<2x32xbf16>, vector<48x32xbf16>, vector<2x48xf32> -> vector<2x48xf32>
    %246 = arith.addf %241, %245 : vector<2x48xf32>
    %c36_221 = arith.constant 36 : index
    %c0_222 = arith.constant 0 : index
    %c0_223 = arith.constant 0 : index
    %247 = vector.load %arg8[%c36_221, %c0_222, %c0_223] : memref<75x2x32xbf16, #tpu.memory_space<vmem>>, vector<1x2x32xbf16>
    %248 = vector.shape_cast %247 : vector<1x2x32xbf16> to vector<2x32xbf16>
    %c79 = arith.constant 79 : index
    %c0_224 = arith.constant 0 : index
    %249 = vector.load %arg13[%c79, %c0_224] : memref<208x32xbf16, #tpu.memory_space<vmem>>, vector<48x32xbf16>
    %cst_225 = arith.constant dense<0.000000e+00> : vector<2x48xf32>
    %250 = tpu.matmul %248, %249, %cst_225 {dimension_numbers = #tpu.dot_dimension_numbers<[1], [1], [0], [0], [0, 0, 1, 0], [], []>} : vector<2x32xbf16>, vector<48x32xbf16>, vector<2x48xf32> -> vector<2x48xf32>
    %251 = arith.addf %246, %250 : vector<2x48xf32>
    %c37 = arith.constant 37 : index
    %c0_226 = arith.constant 0 : index
    %c0_227 = arith.constant 0 : index
    %252 = vector.load %arg8[%c37, %c0_226, %c0_227] : memref<75x2x32xbf16, #tpu.memory_space<vmem>>, vector<1x2x32xbf16>
    %253 = vector.shape_cast %252 : vector<1x2x32xbf16> to vector<2x32xbf16>
    %c80 = arith.constant 80 : index
    %c0_228 = arith.constant 0 : index
    %254 = vector.load %arg13[%c80, %c0_228] : memref<208x32xbf16, #tpu.memory_space<vmem>>, vector<48x32xbf16>
    %cst_229 = arith.constant dense<0.000000e+00> : vector<2x48xf32>
    %255 = tpu.matmul %253, %254, %cst_229 {dimension_numbers = #tpu.dot_dimension_numbers<[1], [1], [0], [0], [0, 0, 1, 0], [], []>} : vector<2x32xbf16>, vector<48x32xbf16>, vector<2x48xf32> -> vector<2x48xf32>
    %256 = arith.addf %251, %255 : vector<2x48xf32>
    %c38_230 = arith.constant 38 : index
    %c0_231 = arith.constant 0 : index
    %c0_232 = arith.constant 0 : index
    %257 = vector.load %arg8[%c38_230, %c0_231, %c0_232] : memref<75x2x32xbf16, #tpu.memory_space<vmem>>, vector<1x2x32xbf16>
    %258 = vector.shape_cast %257 : vector<1x2x32xbf16> to vector<2x32xbf16>
    %c81 = arith.constant 81 : index
    %c0_233 = arith.constant 0 : index
    %259 = vector.load %arg13[%c81, %c0_233] : memref<208x32xbf16, #tpu.memory_space<vmem>>, vector<48x32xbf16>
    %cst_234 = arith.constant dense<0.000000e+00> : vector<2x48xf32>
    %260 = tpu.matmul %258, %259, %cst_234 {dimension_numbers = #tpu.dot_dimension_numbers<[1], [1], [0], [0], [0, 0, 1, 0], [], []>} : vector<2x32xbf16>, vector<48x32xbf16>, vector<2x48xf32> -> vector<2x48xf32>
    %261 = arith.addf %256, %260 : vector<2x48xf32>
    %c39 = arith.constant 39 : index
    %c0_235 = arith.constant 0 : index
    %c0_236 = arith.constant 0 : index
    %262 = vector.load %arg8[%c39, %c0_235, %c0_236] : memref<75x2x32xbf16, #tpu.memory_space<vmem>>, vector<1x2x32xbf16>
    %263 = vector.shape_cast %262 : vector<1x2x32xbf16> to vector<2x32xbf16>
    %c82 = arith.constant 82 : index
    %c0_237 = arith.constant 0 : index
    %264 = vector.load %arg13[%c82, %c0_237] : memref<208x32xbf16, #tpu.memory_space<vmem>>, vector<48x32xbf16>
    %cst_238 = arith.constant dense<0.000000e+00> : vector<2x48xf32>
    %265 = tpu.matmul %263, %264, %cst_238 {dimension_numbers = #tpu.dot_dimension_numbers<[1], [1], [0], [0], [0, 0, 1, 0], [], []>} : vector<2x32xbf16>, vector<48x32xbf16>, vector<2x48xf32> -> vector<2x48xf32>
    %266 = arith.addf %261, %265 : vector<2x48xf32>
    %c40_239 = arith.constant 40 : index
    %c0_240 = arith.constant 0 : index
    %c0_241 = arith.constant 0 : index
    %267 = vector.load %arg8[%c40_239, %c0_240, %c0_241] : memref<75x2x32xbf16, #tpu.memory_space<vmem>>, vector<1x2x32xbf16>
    %268 = vector.shape_cast %267 : vector<1x2x32xbf16> to vector<2x32xbf16>
    %c83 = arith.constant 83 : index
    %c0_242 = arith.constant 0 : index
    %269 = vector.load %arg13[%c83, %c0_242] : memref<208x32xbf16, #tpu.memory_space<vmem>>, vector<48x32xbf16>
    %cst_243 = arith.constant dense<0.000000e+00> : vector<2x48xf32>
    %270 = tpu.matmul %268, %269, %cst_243 {dimension_numbers = #tpu.dot_dimension_numbers<[1], [1], [0], [0], [0, 0, 1, 0], [], []>} : vector<2x32xbf16>, vector<48x32xbf16>, vector<2x48xf32> -> vector<2x48xf32>
    %271 = arith.addf %266, %270 : vector<2x48xf32>
    %c41 = arith.constant 41 : index
    %c0_244 = arith.constant 0 : index
    %c0_245 = arith.constant 0 : index
    %272 = vector.load %arg8[%c41, %c0_244, %c0_245] : memref<75x2x32xbf16, #tpu.memory_space<vmem>>, vector<1x2x32xbf16>
    %273 = vector.shape_cast %272 : vector<1x2x32xbf16> to vector<2x32xbf16>
    %c84 = arith.constant 84 : index
    %c0_246 = arith.constant 0 : index
    %274 = vector.load %arg13[%c84, %c0_246] : memref<208x32xbf16, #tpu.memory_space<vmem>>, vector<48x32xbf16>
    %cst_247 = arith.constant dense<0.000000e+00> : vector<2x48xf32>
    %275 = tpu.matmul %273, %274, %cst_247 {dimension_numbers = #tpu.dot_dimension_numbers<[1], [1], [0], [0], [0, 0, 1, 0], [], []>} : vector<2x32xbf16>, vector<48x32xbf16>, vector<2x48xf32> -> vector<2x48xf32>
    %276 = arith.addf %271, %275 : vector<2x48xf32>
    %c42_248 = arith.constant 42 : index
    %c0_249 = arith.constant 0 : index
    %c0_250 = arith.constant 0 : index
    %277 = vector.load %arg8[%c42_248, %c0_249, %c0_250] : memref<75x2x32xbf16, #tpu.memory_space<vmem>>, vector<1x2x32xbf16>
    %278 = vector.shape_cast %277 : vector<1x2x32xbf16> to vector<2x32xbf16>
    %c85 = arith.constant 85 : index
    %c0_251 = arith.constant 0 : index
    %279 = vector.load %arg13[%c85, %c0_251] : memref<208x32xbf16, #tpu.memory_space<vmem>>, vector<48x32xbf16>
    %cst_252 = arith.constant dense<0.000000e+00> : vector<2x48xf32>
    %280 = tpu.matmul %278, %279, %cst_252 {dimension_numbers = #tpu.dot_dimension_numbers<[1], [1], [0], [0], [0, 0, 1, 0], [], []>} : vector<2x32xbf16>, vector<48x32xbf16>, vector<2x48xf32> -> vector<2x48xf32>
    %281 = arith.addf %276, %280 : vector<2x48xf32>
    %c43_253 = arith.constant 43 : index
    %c0_254 = arith.constant 0 : index
    %c0_255 = arith.constant 0 : index
    %282 = vector.load %arg8[%c43_253, %c0_254, %c0_255] : memref<75x2x32xbf16, #tpu.memory_space<vmem>>, vector<1x2x32xbf16>
    %283 = vector.shape_cast %282 : vector<1x2x32xbf16> to vector<2x32xbf16>
    %c86 = arith.constant 86 : index
    %c0_256 = arith.constant 0 : index
    %284 = vector.load %arg13[%c86, %c0_256] : memref<208x32xbf16, #tpu.memory_space<vmem>>, vector<48x32xbf16>
    %cst_257 = arith.constant dense<0.000000e+00> : vector<2x48xf32>
    %285 = tpu.matmul %283, %284, %cst_257 {dimension_numbers = #tpu.dot_dimension_numbers<[1], [1], [0], [0], [0, 0, 1, 0], [], []>} : vector<2x32xbf16>, vector<48x32xbf16>, vector<2x48xf32> -> vector<2x48xf32>
    %286 = arith.addf %281, %285 : vector<2x48xf32>
    %c44_258 = arith.constant 44 : index
    %c0_259 = arith.constant 0 : index
    %c0_260 = arith.constant 0 : index
    %287 = vector.load %arg8[%c44_258, %c0_259, %c0_260] : memref<75x2x32xbf16, #tpu.memory_space<vmem>>, vector<1x2x32xbf16>
    %288 = vector.shape_cast %287 : vector<1x2x32xbf16> to vector<2x32xbf16>
    %c87 = arith.constant 87 : index
    %c0_261 = arith.constant 0 : index
    %289 = vector.load %arg13[%c87, %c0_261] : memref<208x32xbf16, #tpu.memory_space<vmem>>, vector<48x32xbf16>
    %cst_262 = arith.constant dense<0.000000e+00> : vector<2x48xf32>
    %290 = tpu.matmul %288, %289, %cst_262 {dimension_numbers = #tpu.dot_dimension_numbers<[1], [1], [0], [0], [0, 0, 1, 0], [], []>} : vector<2x32xbf16>, vector<48x32xbf16>, vector<2x48xf32> -> vector<2x48xf32>
    %291 = arith.addf %286, %290 : vector<2x48xf32>
    %c45_263 = arith.constant 45 : index
    %c0_264 = arith.constant 0 : index
    %c0_265 = arith.constant 0 : index
    %292 = vector.load %arg8[%c45_263, %c0_264, %c0_265] : memref<75x2x32xbf16, #tpu.memory_space<vmem>>, vector<1x2x32xbf16>
    %293 = vector.shape_cast %292 : vector<1x2x32xbf16> to vector<2x32xbf16>
    %c88 = arith.constant 88 : index
    %c0_266 = arith.constant 0 : index
    %294 = vector.load %arg13[%c88, %c0_266] : memref<208x32xbf16, #tpu.memory_space<vmem>>, vector<48x32xbf16>
    %cst_267 = arith.constant dense<0.000000e+00> : vector<2x48xf32>
    %295 = tpu.matmul %293, %294, %cst_267 {dimension_numbers = #tpu.dot_dimension_numbers<[1], [1], [0], [0], [0, 0, 1, 0], [], []>} : vector<2x32xbf16>, vector<48x32xbf16>, vector<2x48xf32> -> vector<2x48xf32>
    %296 = arith.addf %291, %295 : vector<2x48xf32>
    %c46_268 = arith.constant 46 : index
    %c0_269 = arith.constant 0 : index
    %c0_270 = arith.constant 0 : index
    %297 = vector.load %arg8[%c46_268, %c0_269, %c0_270] : memref<75x2x32xbf16, #tpu.memory_space<vmem>>, vector<1x2x32xbf16>
    %298 = vector.shape_cast %297 : vector<1x2x32xbf16> to vector<2x32xbf16>
    %c89 = arith.constant 89 : index
    %c0_271 = arith.constant 0 : index
    %299 = vector.load %arg13[%c89, %c0_271] : memref<208x32xbf16, #tpu.memory_space<vmem>>, vector<48x32xbf16>
    %cst_272 = arith.constant dense<0.000000e+00> : vector<2x48xf32>
    %300 = tpu.matmul %298, %299, %cst_272 {dimension_numbers = #tpu.dot_dimension_numbers<[1], [1], [0], [0], [0, 0, 1, 0], [], []>} : vector<2x32xbf16>, vector<48x32xbf16>, vector<2x48xf32> -> vector<2x48xf32>
    %301 = arith.addf %296, %300 : vector<2x48xf32>
    %c47_273 = arith.constant 47 : index
    %c0_274 = arith.constant 0 : index
    %c0_275 = arith.constant 0 : index
    %302 = vector.load %arg8[%c47_273, %c0_274, %c0_275] : memref<75x2x32xbf16, #tpu.memory_space<vmem>>, vector<1x2x32xbf16>
    %303 = vector.shape_cast %302 : vector<1x2x32xbf16> to vector<2x32xbf16>
    %c90 = arith.constant 90 : index
    %c0_276 = arith.constant 0 : index
    %304 = vector.load %arg13[%c90, %c0_276] : memref<208x32xbf16, #tpu.memory_space<vmem>>, vector<48x32xbf16>
    %cst_277 = arith.constant dense<0.000000e+00> : vector<2x48xf32>
    %305 = tpu.matmul %303, %304, %cst_277 {dimension_numbers = #tpu.dot_dimension_numbers<[1], [1], [0], [0], [0, 0, 1, 0], [], []>} : vector<2x32xbf16>, vector<48x32xbf16>, vector<2x48xf32> -> vector<2x48xf32>
    %306 = arith.addf %301, %305 : vector<2x48xf32>
    %c48_278 = arith.constant 48 : index
    %c0_279 = arith.constant 0 : index
    %c0_280 = arith.constant 0 : index
    %307 = vector.load %arg8[%c48_278, %c0_279, %c0_280] : memref<75x2x32xbf16, #tpu.memory_space<vmem>>, vector<1x2x32xbf16>
    %308 = vector.shape_cast %307 : vector<1x2x32xbf16> to vector<2x32xbf16>
    %c91 = arith.constant 91 : index
    %c0_281 = arith.constant 0 : index
    %309 = vector.load %arg13[%c91, %c0_281] : memref<208x32xbf16, #tpu.memory_space<vmem>>, vector<48x32xbf16>
    %cst_282 = arith.constant dense<0.000000e+00> : vector<2x48xf32>
    %310 = tpu.matmul %308, %309, %cst_282 {dimension_numbers = #tpu.dot_dimension_numbers<[1], [1], [0], [0], [0, 0, 1, 0], [], []>} : vector<2x32xbf16>, vector<48x32xbf16>, vector<2x48xf32> -> vector<2x48xf32>
    %311 = arith.addf %306, %310 : vector<2x48xf32>
    %c49_283 = arith.constant 49 : index
    %c0_284 = arith.constant 0 : index
    %c0_285 = arith.constant 0 : index
    %312 = vector.load %arg8[%c49_283, %c0_284, %c0_285] : memref<75x2x32xbf16, #tpu.memory_space<vmem>>, vector<1x2x32xbf16>
    %313 = vector.shape_cast %312 : vector<1x2x32xbf16> to vector<2x32xbf16>
    %c92 = arith.constant 92 : index
    %c0_286 = arith.constant 0 : index
    %314 = vector.load %arg13[%c92, %c0_286] : memref<208x32xbf16, #tpu.memory_space<vmem>>, vector<48x32xbf16>
    %cst_287 = arith.constant dense<0.000000e+00> : vector<2x48xf32>
    %315 = tpu.matmul %313, %314, %cst_287 {dimension_numbers = #tpu.dot_dimension_numbers<[1], [1], [0], [0], [0, 0, 1, 0], [], []>} : vector<2x32xbf16>, vector<48x32xbf16>, vector<2x48xf32> -> vector<2x48xf32>
    %316 = arith.addf %311, %315 : vector<2x48xf32>
    %c50_288 = arith.constant 50 : index
    %c0_289 = arith.constant 0 : index
    %c0_290 = arith.constant 0 : index
    %317 = vector.load %arg8[%c50_288, %c0_289, %c0_290] : memref<75x2x32xbf16, #tpu.memory_space<vmem>>, vector<1x2x32xbf16>
    %318 = vector.shape_cast %317 : vector<1x2x32xbf16> to vector<2x32xbf16>
    %c93 = arith.constant 93 : index
    %c0_291 = arith.constant 0 : index
    %319 = vector.load %arg13[%c93, %c0_291] : memref<208x32xbf16, #tpu.memory_space<vmem>>, vector<48x32xbf16>
    %cst_292 = arith.constant dense<0.000000e+00> : vector<2x48xf32>
    %320 = tpu.matmul %318, %319, %cst_292 {dimension_numbers = #tpu.dot_dimension_numbers<[1], [1], [0], [0], [0, 0, 1, 0], [], []>} : vector<2x32xbf16>, vector<48x32xbf16>, vector<2x48xf32> -> vector<2x48xf32>
    %321 = arith.addf %316, %320 : vector<2x48xf32>
    %c51_293 = arith.constant 51 : index
    %c0_294 = arith.constant 0 : index
    %c0_295 = arith.constant 0 : index
    %322 = vector.load %arg8[%c51_293, %c0_294, %c0_295] : memref<75x2x32xbf16, #tpu.memory_space<vmem>>, vector<1x2x32xbf16>
    %323 = vector.shape_cast %322 : vector<1x2x32xbf16> to vector<2x32xbf16>
    %c94 = arith.constant 94 : index
    %c0_296 = arith.constant 0 : index
    %324 = vector.load %arg13[%c94, %c0_296] : memref<208x32xbf16, #tpu.memory_space<vmem>>, vector<48x32xbf16>
    %cst_297 = arith.constant dense<0.000000e+00> : vector<2x48xf32>
    %325 = tpu.matmul %323, %324, %cst_297 {dimension_numbers = #tpu.dot_dimension_numbers<[1], [1], [0], [0], [0, 0, 1, 0], [], []>} : vector<2x32xbf16>, vector<48x32xbf16>, vector<2x48xf32> -> vector<2x48xf32>
    %326 = arith.addf %321, %325 : vector<2x48xf32>
    %c52_298 = arith.constant 52 : index
    %c0_299 = arith.constant 0 : index
    %c0_300 = arith.constant 0 : index
    %327 = vector.load %arg8[%c52_298, %c0_299, %c0_300] : memref<75x2x32xbf16, #tpu.memory_space<vmem>>, vector<1x2x32xbf16>
    %328 = vector.shape_cast %327 : vector<1x2x32xbf16> to vector<2x32xbf16>
    %c95 = arith.constant 95 : index
    %c0_301 = arith.constant 0 : index
    %329 = vector.load %arg13[%c95, %c0_301] : memref<208x32xbf16, #tpu.memory_space<vmem>>, vector<48x32xbf16>
    %cst_302 = arith.constant dense<0.000000e+00> : vector<2x48xf32>
    %330 = tpu.matmul %328, %329, %cst_302 {dimension_numbers = #tpu.dot_dimension_numbers<[1], [1], [0], [0], [0, 0, 1, 0], [], []>} : vector<2x32xbf16>, vector<48x32xbf16>, vector<2x48xf32> -> vector<2x48xf32>
    %331 = arith.addf %326, %330 : vector<2x48xf32>
    %c53_303 = arith.constant 53 : index
    %c0_304 = arith.constant 0 : index
    %c0_305 = arith.constant 0 : index
    %332 = vector.load %arg8[%c53_303, %c0_304, %c0_305] : memref<75x2x32xbf16, #tpu.memory_space<vmem>>, vector<1x2x32xbf16>
    %333 = vector.shape_cast %332 : vector<1x2x32xbf16> to vector<2x32xbf16>
    %c96 = arith.constant 96 : index
    %c0_306 = arith.constant 0 : index
    %334 = vector.load %arg13[%c96, %c0_306] : memref<208x32xbf16, #tpu.memory_space<vmem>>, vector<48x32xbf16>
    %cst_307 = arith.constant dense<0.000000e+00> : vector<2x48xf32>
    %335 = tpu.matmul %333, %334, %cst_307 {dimension_numbers = #tpu.dot_dimension_numbers<[1], [1], [0], [0], [0, 0, 1, 0], [], []>} : vector<2x32xbf16>, vector<48x32xbf16>, vector<2x48xf32> -> vector<2x48xf32>
    %336 = arith.addf %331, %335 : vector<2x48xf32>
    %c54_308 = arith.constant 54 : index
    %c0_309 = arith.constant 0 : index
    %c0_310 = arith.constant 0 : index
    %337 = vector.load %arg8[%c54_308, %c0_309, %c0_310] : memref<75x2x32xbf16, #tpu.memory_space<vmem>>, vector<1x2x32xbf16>
    %338 = vector.shape_cast %337 : vector<1x2x32xbf16> to vector<2x32xbf16>
    %c97 = arith.constant 97 : index
    %c0_311 = arith.constant 0 : index
    %339 = vector.load %arg13[%c97, %c0_311] : memref<208x32xbf16, #tpu.memory_space<vmem>>, vector<48x32xbf16>
    %cst_312 = arith.constant dense<0.000000e+00> : vector<2x48xf32>
    %340 = tpu.matmul %338, %339, %cst_312 {dimension_numbers = #tpu.dot_dimension_numbers<[1], [1], [0], [0], [0, 0, 1, 0], [], []>} : vector<2x32xbf16>, vector<48x32xbf16>, vector<2x48xf32> -> vector<2x48xf32>
    %341 = arith.addf %336, %340 : vector<2x48xf32>
    %c55_313 = arith.constant 55 : index
    %c0_314 = arith.constant 0 : index
    %c0_315 = arith.constant 0 : index
    %342 = vector.load %arg8[%c55_313, %c0_314, %c0_315] : memref<75x2x32xbf16, #tpu.memory_space<vmem>>, vector<1x2x32xbf16>
    %343 = vector.shape_cast %342 : vector<1x2x32xbf16> to vector<2x32xbf16>
    %c98 = arith.constant 98 : index
    %c0_316 = arith.constant 0 : index
    %344 = vector.load %arg13[%c98, %c0_316] : memref<208x32xbf16, #tpu.memory_space<vmem>>, vector<48x32xbf16>
    %cst_317 = arith.constant dense<0.000000e+00> : vector<2x48xf32>
    %345 = tpu.matmul %343, %344, %cst_317 {dimension_numbers = #tpu.dot_dimension_numbers<[1], [1], [0], [0], [0, 0, 1, 0], [], []>} : vector<2x32xbf16>, vector<48x32xbf16>, vector<2x48xf32> -> vector<2x48xf32>
    %346 = arith.addf %341, %345 : vector<2x48xf32>
    %c56_318 = arith.constant 56 : index
    %c0_319 = arith.constant 0 : index
    %c0_320 = arith.constant 0 : index
    %347 = vector.load %arg8[%c56_318, %c0_319, %c0_320] : memref<75x2x32xbf16, #tpu.memory_space<vmem>>, vector<1x2x32xbf16>
    %348 = vector.shape_cast %347 : vector<1x2x32xbf16> to vector<2x32xbf16>
    %c99 = arith.constant 99 : index
    %c0_321 = arith.constant 0 : index
    %349 = vector.load %arg13[%c99, %c0_321] : memref<208x32xbf16, #tpu.memory_space<vmem>>, vector<48x32xbf16>
    %cst_322 = arith.constant dense<0.000000e+00> : vector<2x48xf32>
    %350 = tpu.matmul %348, %349, %cst_322 {dimension_numbers = #tpu.dot_dimension_numbers<[1], [1], [0], [0], [0, 0, 1, 0], [], []>} : vector<2x32xbf16>, vector<48x32xbf16>, vector<2x48xf32> -> vector<2x48xf32>
    %351 = arith.addf %346, %350 : vector<2x48xf32>
    %c57_323 = arith.constant 57 : index
    %c0_324 = arith.constant 0 : index
    %c0_325 = arith.constant 0 : index
    %352 = vector.load %arg8[%c57_323, %c0_324, %c0_325] : memref<75x2x32xbf16, #tpu.memory_space<vmem>>, vector<1x2x32xbf16>
    %353 = vector.shape_cast %352 : vector<1x2x32xbf16> to vector<2x32xbf16>
    %c100 = arith.constant 100 : index
    %c0_326 = arith.constant 0 : index
    %354 = vector.load %arg13[%c100, %c0_326] : memref<208x32xbf16, #tpu.memory_space<vmem>>, vector<48x32xbf16>
    %cst_327 = arith.constant dense<0.000000e+00> : vector<2x48xf32>
    %355 = tpu.matmul %353, %354, %cst_327 {dimension_numbers = #tpu.dot_dimension_numbers<[1], [1], [0], [0], [0, 0, 1, 0], [], []>} : vector<2x32xbf16>, vector<48x32xbf16>, vector<2x48xf32> -> vector<2x48xf32>
    %356 = arith.addf %351, %355 : vector<2x48xf32>
    %c58_328 = arith.constant 58 : index
    %c0_329 = arith.constant 0 : index
    %c0_330 = arith.constant 0 : index
    %357 = vector.load %arg8[%c58_328, %c0_329, %c0_330] : memref<75x2x32xbf16, #tpu.memory_space<vmem>>, vector<1x2x32xbf16>
    %358 = vector.shape_cast %357 : vector<1x2x32xbf16> to vector<2x32xbf16>
    %c101 = arith.constant 101 : index
    %c0_331 = arith.constant 0 : index
    %359 = vector.load %arg13[%c101, %c0_331] : memref<208x32xbf16, #tpu.memory_space<vmem>>, vector<48x32xbf16>
    %cst_332 = arith.constant dense<0.000000e+00> : vector<2x48xf32>
    %360 = tpu.matmul %358, %359, %cst_332 {dimension_numbers = #tpu.dot_dimension_numbers<[1], [1], [0], [0], [0, 0, 1, 0], [], []>} : vector<2x32xbf16>, vector<48x32xbf16>, vector<2x48xf32> -> vector<2x48xf32>
    %361 = arith.addf %356, %360 : vector<2x48xf32>
    %c59_333 = arith.constant 59 : index
    %c0_334 = arith.constant 0 : index
    %c0_335 = arith.constant 0 : index
    %362 = vector.load %arg8[%c59_333, %c0_334, %c0_335] : memref<75x2x32xbf16, #tpu.memory_space<vmem>>, vector<1x2x32xbf16>
    %363 = vector.shape_cast %362 : vector<1x2x32xbf16> to vector<2x32xbf16>
    %c102 = arith.constant 102 : index
    %c0_336 = arith.constant 0 : index
    %364 = vector.load %arg13[%c102, %c0_336] : memref<208x32xbf16, #tpu.memory_space<vmem>>, vector<48x32xbf16>
    %cst_337 = arith.constant dense<0.000000e+00> : vector<2x48xf32>
    %365 = tpu.matmul %363, %364, %cst_337 {dimension_numbers = #tpu.dot_dimension_numbers<[1], [1], [0], [0], [0, 0, 1, 0], [], []>} : vector<2x32xbf16>, vector<48x32xbf16>, vector<2x48xf32> -> vector<2x48xf32>
    %366 = arith.addf %361, %365 : vector<2x48xf32>
    %c60_338 = arith.constant 60 : index
    %c0_339 = arith.constant 0 : index
    %c0_340 = arith.constant 0 : index
    %367 = vector.load %arg8[%c60_338, %c0_339, %c0_340] : memref<75x2x32xbf16, #tpu.memory_space<vmem>>, vector<1x2x32xbf16>
    %368 = vector.shape_cast %367 : vector<1x2x32xbf16> to vector<2x32xbf16>
    %c103 = arith.constant 103 : index
    %c0_341 = arith.constant 0 : index
    %369 = vector.load %arg13[%c103, %c0_341] : memref<208x32xbf16, #tpu.memory_space<vmem>>, vector<48x32xbf16>
    %cst_342 = arith.constant dense<0.000000e+00> : vector<2x48xf32>
    %370 = tpu.matmul %368, %369, %cst_342 {dimension_numbers = #tpu.dot_dimension_numbers<[1], [1], [0], [0], [0, 0, 1, 0], [], []>} : vector<2x32xbf16>, vector<48x32xbf16>, vector<2x48xf32> -> vector<2x48xf32>
    %371 = arith.addf %366, %370 : vector<2x48xf32>
    %c61_343 = arith.constant 61 : index
    %c0_344 = arith.constant 0 : index
    %c0_345 = arith.constant 0 : index
    %372 = vector.load %arg8[%c61_343, %c0_344, %c0_345] : memref<75x2x32xbf16, #tpu.memory_space<vmem>>, vector<1x2x32xbf16>
    %373 = vector.shape_cast %372 : vector<1x2x32xbf16> to vector<2x32xbf16>
    %c104 = arith.constant 104 : index
    %c0_346 = arith.constant 0 : index
    %374 = vector.load %arg13[%c104, %c0_346] : memref<208x32xbf16, #tpu.memory_space<vmem>>, vector<48x32xbf16>
    %cst_347 = arith.constant dense<0.000000e+00> : vector<2x48xf32>
    %375 = tpu.matmul %373, %374, %cst_347 {dimension_numbers = #tpu.dot_dimension_numbers<[1], [1], [0], [0], [0, 0, 1, 0], [], []>} : vector<2x32xbf16>, vector<48x32xbf16>, vector<2x48xf32> -> vector<2x48xf32>
    %376 = arith.addf %371, %375 : vector<2x48xf32>
    %c62_348 = arith.constant 62 : index
    %c0_349 = arith.constant 0 : index
    %c0_350 = arith.constant 0 : index
    %377 = vector.load %arg8[%c62_348, %c0_349, %c0_350] : memref<75x2x32xbf16, #tpu.memory_space<vmem>>, vector<1x2x32xbf16>
    %378 = vector.shape_cast %377 : vector<1x2x32xbf16> to vector<2x32xbf16>
    %c105 = arith.constant 105 : index
    %c0_351 = arith.constant 0 : index
    %379 = vector.load %arg13[%c105, %c0_351] : memref<208x32xbf16, #tpu.memory_space<vmem>>, vector<48x32xbf16>
    %cst_352 = arith.constant dense<0.000000e+00> : vector<2x48xf32>
    %380 = tpu.matmul %378, %379, %cst_352 {dimension_numbers = #tpu.dot_dimension_numbers<[1], [1], [0], [0], [0, 0, 1, 0], [], []>} : vector<2x32xbf16>, vector<48x32xbf16>, vector<2x48xf32> -> vector<2x48xf32>
    %381 = arith.addf %376, %380 : vector<2x48xf32>
    %c63_353 = arith.constant 63 : index
    %c0_354 = arith.constant 0 : index
    %c0_355 = arith.constant 0 : index
    %382 = vector.load %arg8[%c63_353, %c0_354, %c0_355] : memref<75x2x32xbf16, #tpu.memory_space<vmem>>, vector<1x2x32xbf16>
    %383 = vector.shape_cast %382 : vector<1x2x32xbf16> to vector<2x32xbf16>
    %c106 = arith.constant 106 : index
    %c0_356 = arith.constant 0 : index
    %384 = vector.load %arg13[%c106, %c0_356] : memref<208x32xbf16, #tpu.memory_space<vmem>>, vector<48x32xbf16>
    %cst_357 = arith.constant dense<0.000000e+00> : vector<2x48xf32>
    %385 = tpu.matmul %383, %384, %cst_357 {dimension_numbers = #tpu.dot_dimension_numbers<[1], [1], [0], [0], [0, 0, 1, 0], [], []>} : vector<2x32xbf16>, vector<48x32xbf16>, vector<2x48xf32> -> vector<2x48xf32>
    %386 = arith.addf %381, %385 : vector<2x48xf32>
    %c64_358 = arith.constant 64 : index
    %c0_359 = arith.constant 0 : index
    %c0_360 = arith.constant 0 : index
    %387 = vector.load %arg8[%c64_358, %c0_359, %c0_360] : memref<75x2x32xbf16, #tpu.memory_space<vmem>>, vector<1x2x32xbf16>
    %388 = vector.shape_cast %387 : vector<1x2x32xbf16> to vector<2x32xbf16>
    %c107 = arith.constant 107 : index
    %c0_361 = arith.constant 0 : index
    %389 = vector.load %arg13[%c107, %c0_361] : memref<208x32xbf16, #tpu.memory_space<vmem>>, vector<48x32xbf16>
    %cst_362 = arith.constant dense<0.000000e+00> : vector<2x48xf32>
    %390 = tpu.matmul %388, %389, %cst_362 {dimension_numbers = #tpu.dot_dimension_numbers<[1], [1], [0], [0], [0, 0, 1, 0], [], []>} : vector<2x32xbf16>, vector<48x32xbf16>, vector<2x48xf32> -> vector<2x48xf32>
    %391 = arith.addf %386, %390 : vector<2x48xf32>
    %c65_363 = arith.constant 65 : index
    %c0_364 = arith.constant 0 : index
    %c0_365 = arith.constant 0 : index
    %392 = vector.load %arg8[%c65_363, %c0_364, %c0_365] : memref<75x2x32xbf16, #tpu.memory_space<vmem>>, vector<1x2x32xbf16>
    %393 = vector.shape_cast %392 : vector<1x2x32xbf16> to vector<2x32xbf16>
    %c108 = arith.constant 108 : index
    %c0_366 = arith.constant 0 : index
    %394 = vector.load %arg13[%c108, %c0_366] : memref<208x32xbf16, #tpu.memory_space<vmem>>, vector<48x32xbf16>
    %cst_367 = arith.constant dense<0.000000e+00> : vector<2x48xf32>
    %395 = tpu.matmul %393, %394, %cst_367 {dimension_numbers = #tpu.dot_dimension_numbers<[1], [1], [0], [0], [0, 0, 1, 0], [], []>} : vector<2x32xbf16>, vector<48x32xbf16>, vector<2x48xf32> -> vector<2x48xf32>
    %396 = arith.addf %391, %395 : vector<2x48xf32>
    %c66_368 = arith.constant 66 : index
    %c0_369 = arith.constant 0 : index
    %c0_370 = arith.constant 0 : index
    %397 = vector.load %arg8[%c66_368, %c0_369, %c0_370] : memref<75x2x32xbf16, #tpu.memory_space<vmem>>, vector<1x2x32xbf16>
    %398 = vector.shape_cast %397 : vector<1x2x32xbf16> to vector<2x32xbf16>
    %c109 = arith.constant 109 : index
    %c0_371 = arith.constant 0 : index
    %399 = vector.load %arg13[%c109, %c0_371] : memref<208x32xbf16, #tpu.memory_space<vmem>>, vector<48x32xbf16>
    %cst_372 = arith.constant dense<0.000000e+00> : vector<2x48xf32>
    %400 = tpu.matmul %398, %399, %cst_372 {dimension_numbers = #tpu.dot_dimension_numbers<[1], [1], [0], [0], [0, 0, 1, 0], [], []>} : vector<2x32xbf16>, vector<48x32xbf16>, vector<2x48xf32> -> vector<2x48xf32>
    %401 = arith.addf %396, %400 : vector<2x48xf32>
    %c67_373 = arith.constant 67 : index
    %c0_374 = arith.constant 0 : index
    %c0_375 = arith.constant 0 : index
    %402 = vector.load %arg8[%c67_373, %c0_374, %c0_375] : memref<75x2x32xbf16, #tpu.memory_space<vmem>>, vector<1x2x32xbf16>
    %403 = vector.shape_cast %402 : vector<1x2x32xbf16> to vector<2x32xbf16>
    %c110 = arith.constant 110 : index
    %c0_376 = arith.constant 0 : index
    %404 = vector.load %arg13[%c110, %c0_376] : memref<208x32xbf16, #tpu.memory_space<vmem>>, vector<48x32xbf16>
    %cst_377 = arith.constant dense<0.000000e+00> : vector<2x48xf32>
    %405 = tpu.matmul %403, %404, %cst_377 {dimension_numbers = #tpu.dot_dimension_numbers<[1], [1], [0], [0], [0, 0, 1, 0], [], []>} : vector<2x32xbf16>, vector<48x32xbf16>, vector<2x48xf32> -> vector<2x48xf32>
    %406 = arith.addf %401, %405 : vector<2x48xf32>
    %c68_378 = arith.constant 68 : index
    %c0_379 = arith.constant 0 : index
    %c0_380 = arith.constant 0 : index
    %407 = vector.load %arg8[%c68_378, %c0_379, %c0_380] : memref<75x2x32xbf16, #tpu.memory_space<vmem>>, vector<1x2x32xbf16>
    %408 = vector.shape_cast %407 : vector<1x2x32xbf16> to vector<2x32xbf16>
    %c111 = arith.constant 111 : index
    %c0_381 = arith.constant 0 : index
    %409 = vector.load %arg13[%c111, %c0_381] : memref<208x32xbf16, #tpu.memory_space<vmem>>, vector<48x32xbf16>
    %cst_382 = arith.constant dense<0.000000e+00> : vector<2x48xf32>
    %410 = tpu.matmul %408, %409, %cst_382 {dimension_numbers = #tpu.dot_dimension_numbers<[1], [1], [0], [0], [0, 0, 1, 0], [], []>} : vector<2x32xbf16>, vector<48x32xbf16>, vector<2x48xf32> -> vector<2x48xf32>
    %411 = arith.addf %406, %410 : vector<2x48xf32>
    %c69_383 = arith.constant 69 : index
    %c0_384 = arith.constant 0 : index
    %c0_385 = arith.constant 0 : index
    %412 = vector.load %arg8[%c69_383, %c0_384, %c0_385] : memref<75x2x32xbf16, #tpu.memory_space<vmem>>, vector<1x2x32xbf16>
    %413 = vector.shape_cast %412 : vector<1x2x32xbf16> to vector<2x32xbf16>
    %c112 = arith.constant 112 : index
    %c0_386 = arith.constant 0 : index
    %414 = vector.load %arg13[%c112, %c0_386] : memref<208x32xbf16, #tpu.memory_space<vmem>>, vector<48x32xbf16>
    %cst_387 = arith.constant dense<0.000000e+00> : vector<2x48xf32>
    %415 = tpu.matmul %413, %414, %cst_387 {dimension_numbers = #tpu.dot_dimension_numbers<[1], [1], [0], [0], [0, 0, 1, 0], [], []>} : vector<2x32xbf16>, vector<48x32xbf16>, vector<2x48xf32> -> vector<2x48xf32>
    %416 = arith.addf %411, %415 : vector<2x48xf32>
    %c70_388 = arith.constant 70 : index
    %c0_389 = arith.constant 0 : index
    %c0_390 = arith.constant 0 : index
    %417 = vector.load %arg8[%c70_388, %c0_389, %c0_390] : memref<75x2x32xbf16, #tpu.memory_space<vmem>>, vector<1x2x32xbf16>
    %418 = vector.shape_cast %417 : vector<1x2x32xbf16> to vector<2x32xbf16>
    %c113 = arith.constant 113 : index
    %c0_391 = arith.constant 0 : index
    %419 = vector.load %arg13[%c113, %c0_391] : memref<208x32xbf16, #tpu.memory_space<vmem>>, vector<48x32xbf16>
    %cst_392 = arith.constant dense<0.000000e+00> : vector<2x48xf32>
    %420 = tpu.matmul %418, %419, %cst_392 {dimension_numbers = #tpu.dot_dimension_numbers<[1], [1], [0], [0], [0, 0, 1, 0], [], []>} : vector<2x32xbf16>, vector<48x32xbf16>, vector<2x48xf32> -> vector<2x48xf32>
    %421 = arith.addf %416, %420 : vector<2x48xf32>
    %c71_393 = arith.constant 71 : index
    %c0_394 = arith.constant 0 : index
    %c0_395 = arith.constant 0 : index
    %422 = vector.load %arg8[%c71_393, %c0_394, %c0_395] : memref<75x2x32xbf16, #tpu.memory_space<vmem>>, vector<1x2x32xbf16>
    %423 = vector.shape_cast %422 : vector<1x2x32xbf16> to vector<2x32xbf16>
    %c114 = arith.constant 114 : index
    %c0_396 = arith.constant 0 : index
    %424 = vector.load %arg13[%c114, %c0_396] : memref<208x32xbf16, #tpu.memory_space<vmem>>, vector<48x32xbf16>
    %cst_397 = arith.constant dense<0.000000e+00> : vector<2x48xf32>
    %425 = tpu.matmul %423, %424, %cst_397 {dimension_numbers = #tpu.dot_dimension_numbers<[1], [1], [0], [0], [0, 0, 1, 0], [], []>} : vector<2x32xbf16>, vector<48x32xbf16>, vector<2x48xf32> -> vector<2x48xf32>
    %426 = arith.addf %421, %425 : vector<2x48xf32>
    %c72_398 = arith.constant 72 : index
    %c0_399 = arith.constant 0 : index
    %c0_400 = arith.constant 0 : index
    %427 = vector.load %arg8[%c72_398, %c0_399, %c0_400] : memref<75x2x32xbf16, #tpu.memory_space<vmem>>, vector<1x2x32xbf16>
    %428 = vector.shape_cast %427 : vector<1x2x32xbf16> to vector<2x32xbf16>
    %c115 = arith.constant 115 : index
    %c0_401 = arith.constant 0 : index
    %429 = vector.load %arg13[%c115, %c0_401] : memref<208x32xbf16, #tpu.memory_space<vmem>>, vector<48x32xbf16>
    %cst_402 = arith.constant dense<0.000000e+00> : vector<2x48xf32>
    %430 = tpu.matmul %428, %429, %cst_402 {dimension_numbers = #tpu.dot_dimension_numbers<[1], [1], [0], [0], [0, 0, 1, 0], [], []>} : vector<2x32xbf16>, vector<48x32xbf16>, vector<2x48xf32> -> vector<2x48xf32>
    %431 = arith.addf %426, %430 : vector<2x48xf32>
    %c73_403 = arith.constant 73 : index
    %c0_404 = arith.constant 0 : index
    %c0_405 = arith.constant 0 : index
    %432 = vector.load %arg8[%c73_403, %c0_404, %c0_405] : memref<75x2x32xbf16, #tpu.memory_space<vmem>>, vector<1x2x32xbf16>
    %433 = vector.shape_cast %432 : vector<1x2x32xbf16> to vector<2x32xbf16>
    %c116 = arith.constant 116 : index
    %c0_406 = arith.constant 0 : index
    %434 = vector.load %arg13[%c116, %c0_406] : memref<208x32xbf16, #tpu.memory_space<vmem>>, vector<48x32xbf16>
    %cst_407 = arith.constant dense<0.000000e+00> : vector<2x48xf32>
    %435 = tpu.matmul %433, %434, %cst_407 {dimension_numbers = #tpu.dot_dimension_numbers<[1], [1], [0], [0], [0, 0, 1, 0], [], []>} : vector<2x32xbf16>, vector<48x32xbf16>, vector<2x48xf32> -> vector<2x48xf32>
    %436 = arith.addf %431, %435 : vector<2x48xf32>
    %c74_408 = arith.constant 74 : index
    %c0_409 = arith.constant 0 : index
    %c0_410 = arith.constant 0 : index
    %437 = vector.load %arg8[%c74_408, %c0_409, %c0_410] : memref<75x2x32xbf16, #tpu.memory_space<vmem>>, vector<1x2x32xbf16>
    %438 = vector.shape_cast %437 : vector<1x2x32xbf16> to vector<2x32xbf16>
    %c117 = arith.constant 117 : index
    %c0_411 = arith.constant 0 : index
    %439 = vector.load %arg13[%c117, %c0_411] : memref<208x32xbf16, #tpu.memory_space<vmem>>, vector<48x32xbf16>
    %cst_412 = arith.constant dense<0.000000e+00> : vector<2x48xf32>
    %440 = tpu.matmul %438, %439, %cst_412 {dimension_numbers = #tpu.dot_dimension_numbers<[1], [1], [0], [0], [0, 0, 1, 0], [], []>} : vector<2x32xbf16>, vector<48x32xbf16>, vector<2x48xf32> -> vector<2x48xf32>
    %441 = arith.addf %436, %440 : vector<2x48xf32>
    %c0_413 = arith.constant 0 : index
    %c0_414 = arith.constant 0 : index
    %c0_415 = arith.constant 0 : index
    %442 = vector.load %arg10[%c0_413, %c0_414, %c0_415] : memref<1x2x48xf32, #tpu.memory_space<vmem>>, vector<1x2x48xf32>
    %443 = vector.shape_cast %442 : vector<1x2x48xf32> to vector<2x48xf32>
    %444 = vector.shape_cast %441 : vector<2x48xf32> to vector<1x2x48xf32>
    tpu.vector_store %arg10[%c0_413, %c0_414, %c0_415], %444 {strides = array<i32>} : memref<1x2x48xf32, #tpu.memory_space<vmem>>, vector<1x2x48xf32>,
    %c3_416 = arith.constant 3 : index
    %c0_417 = arith.constant 0 : index
    %445 = vector.load %arg12[%c3_416, %c0_417] : memref<128x32xf32, #tpu.memory_space<vmem>>, vector<122x32xf32>
    %cst_418 = arith.constant dense<0.000000e+00> : vector<32xf32>
    %446 = vector.multi_reduction <add>, %445, %cst_418 [0] : vector<122x32xf32> to vector<32xf32>
    %447 = vector.shape_cast %446 : vector<32xf32> to vector<1x32xf32>
    %cst_419 = arith.constant 0.00819672085 : f32
    %448 = vector.broadcast %cst_419 : f32 to vector<1x32xf32>
    %449 = arith.mulf %447, %448 : vector<1x32xf32>
    %c0_420 = arith.constant 0 : index
    %c0_421 = arith.constant 0 : index
    %450 = vector.load %arg9[%c0_420, %c0_421] : memref<1x32xf32, #tpu.memory_space<vmem>>, vector<1x32xf32>
    %451 = arith.mulf %449, %450 : vector<1x32xf32>
    %cst_422 = arith.constant dense<0.000000e+00> : vector<1xf32>
    %452 = vector.multi_reduction <add>, %451, %cst_422 [1] : vector<1x32xf32> to vector<1xf32>
    %453 = vector.shape_cast %452 : vector<1xf32> to vector<1x1xf32>
    %c0_423 = arith.constant 0 : index
    %c0_424 = arith.constant 0 : index
    %c0_425 = arith.constant 0 : index
    %454 = vector.load %arg3[%c0_423, %c0_424, %c0_425] : memref<1x1x1xf32, #tpu.memory_space<vmem>>, vector<1x1x1xf32>
    %455 = vector.shape_cast %454 : vector<1x1x1xf32> to vector<1x1xf32>
    %456 = arith.addf %453, %455 : vector<1x1xf32>
    %c0_426 = arith.constant 0 : index
    %c0_427 = arith.constant 0 : index
    %c0_428 = arith.constant 0 : index
    %457 = vector.load %arg11[%c0_426, %c0_427, %c0_428] : memref<1x1x1xf32, #tpu.memory_space<vmem>>, vector<1x1x1xf32>
    %458 = vector.shape_cast %457 : vector<1x1x1xf32> to vector<1x1xf32>
    %459 = vector.shape_cast %456 : vector<1x1xf32> to vector<1x1x1xf32>
    tpu.vector_store %arg11[%c0_426, %c0_427, %c0_428], %459 {strides = array<i32>} : memref<1x1x1xf32, #tpu.memory_space<vmem>>, vector<1x1x1xf32>,
    return
  }
  func.func @transform_0(%arg0: i32) -> (i32, i32, i32) {
    %c0_i32 = arith.constant 0 : i32
    %c0_i32_0 = arith.constant 0 : i32
    %c0_i32_1 = arith.constant 0 : i32
    return %arg0, %c0_i32, %c0_i32_0 : i32, i32, i32
  }
  func.func @transform_1(%arg0: i32) -> (i32, i32, i32) {
    %c0_i32 = arith.constant 0 : i32
    %c0_i32_0 = arith.constant 0 : i32
    %c0_i32_1 = arith.constant 0 : i32
    return %arg0, %c0_i32, %c0_i32_0 : i32, i32, i32
  }
  func.func @transform_2(%arg0: i32) -> (i32, i32, i32) {
    %c0_i32 = arith.constant 0 : i32
    %c0_i32_0 = arith.constant 0 : i32
    %c0_i32_1 = arith.constant 0 : i32
    return %arg0, %c0_i32, %c0_i32_0 : i32, i32, i32
  }
  func.func @transform_3(%arg0: i32) -> (i32, i32) {
    %c0_i32 = arith.constant 0 : i32
    %c0_i32_0 = arith.constant 0 : i32
    %c0_i32_1 = arith.constant 0 : i32
    return %c0_i32, %c0_i32_0 : i32, i32
  }
  func.func @transform_4(%arg0: i32) -> (i32, i32) {
    %c0_i32 = arith.constant 0 : i32
    %c0_i32_0 = arith.constant 0 : i32
    %c0_i32_1 = arith.constant 0 : i32
    return %c0_i32, %c0_i32_0 : i32, i32
  }
  func.func @transform_5(%arg0: i32) -> (i32, i32, i32, i32) {
    %c0_i32 = arith.constant 0 : i32
    %c0_i32_0 = arith.constant 0 : i32
    %c0_i32_1 = arith.constant 0 : i32
    %c0_i32_2 = arith.constant 0 : i32
    %c0_i32_3 = arith.constant 0 : i32
    return %c0_i32, %c0_i32_0, %c0_i32_1, %c0_i32_2 : i32, i32, i32, i32
  }
  func.func @transform_6(%arg0: i32) -> (i32, i32, i32) {
    %c0_i32 = arith.constant 0 : i32
    %c0_i32_0 = arith.constant 0 : i32
    %c0_i32_1 = arith.constant 0 : i32
    %c0_i32_2 = arith.constant 0 : i32
    return %c0_i32, %c0_i32_0, %c0_i32_1 : i32, i32, i32
  }
  func.func @transform_7(%arg0: i32) -> (i32, i32, i32) {
    %c0_i32 = arith.constant 0 : i32
    %c0_i32_0 = arith.constant 0 : i32
    %c0_i32_1 = arith.constant 0 : i32
    %c0_i32_2 = arith.constant 0 : i32
    return %c0_i32, %c0_i32_0, %c0_i32_1 : i32, i32, i32
  }
  func.func @transform_8(%arg0: i32) -> (i32, i32) {
    %c0_i32 = arith.constant 0 : i32
    %c0_i32_0 = arith.constant 0 : i32
    %c0_i32_1 = arith.constant 0 : i32
    return %c0_i32, %c0_i32_0 : i32, i32
  }
  func.func @transform_9(%arg0: i32) -> (i32, i32, i32) {
    %c0_i32 = arith.constant 0 : i32
    %c0_i32_0 = arith.constant 0 : i32
    %c0_i32_1 = arith.constant 0 : i32
    return %arg0, %c0_i32, %c0_i32_0 : i32, i32, i32
  }
  func.func @transform_10(%arg0: i32) -> (i32, i32, i32) {
    %c0_i32 = arith.constant 0 : i32
    %c0_i32_0 = arith.constant 0 : i32
    %c0_i32_1 = arith.constant 0 : i32
    return %arg0, %c0_i32, %c0_i32_0 : i32, i32, i32
  }
}

</mosaic_0001>

<bundles_post_ra>
// kernel: tpu_custom_call.1
= control target key start
LH: loop header
LB: loop body
LE: loop exit
PB: predicated region body
PF: predicated region fallthrough
CT: control target
= control target key end

     0   :  { %s12071_s0 = inlined_call_operand.vmem [shape: bf16[2,128,84], index: 0, kind: input, shape index: {}]   ;;  %s12072_s1 = inlined_call_operand.vmem [shape: f32[2,2,48], index: 1, kind: input, shape index: {}]   ;;  %s12073_s2 = inlined_call_operand.vmem [shape: f32[2,1,1], index: 2, kind: input, shape index: {}]   ;;  %s12074_s3 = inlined_call_operand.vmem [shape: bf16[84,32], index: 3, kind: input, shape index: {}]   ;;  %s12075_s4 = inlined_call_operand.vmem [shape: f32[1,32], index: 4, kind: input, shape index: {}]   ;;  %s12076_s5 = inlined_call_operand.vmem [shape: bf16[2,3,32,32], index: 5, kind: input, shape index: {}]   ;;  %s12077_s6 = inlined_call_operand.vmem [shape: f32[2,1,32], index: 6, kind: input, shape index: {}]   ;;  %s12078_s7 = inlined_call_operand.vmem [shape: bf16[75,2,32], index: 7, kind: input, shape index: {}]   ;;  %s12079_s8 = inlined_call_operand.vmem [shape: f32[1,32], index: 8, kind: input, shape index: {}]   ;;  %s12080_s9 = inlined_call_operand.hbm [shape: f32[2,2,48], index: 9, kind: output, shape index: {0}]   ;;  %s12081_s10 = inlined_call_operand.vmem [shape: f32[2,1,1], index: 10, kind: output, shape index: {1}]  }
   0x1   :  { %12084 = sst [smem:[#allocation7_spill]] %s12071_s0 }
   0x2   :  { %12085 = sst [smem:[#allocation8_spill]] %s12073_s2 }
   0x3   :  { %16 = vsyncpa [#allocation5], 0 }
   0x4   :  { %18 = vsyncpa [#allocation5 + $0x1], 0  ;;  %s9815_s13 = smov 0   ;;  %s9817_s14 = smov 0  }
   0x5   :  { %s9819_s15 = smov 0   ;;  %s9821_s16 = smov 0  }
   0x6 LB: > { %s9836_s17 = sadd.s32 4294967295, %s9754_s16   ;;  %s7679_s18 = sadd.s32 4294967294, %s9754_s16   ;;  %s9754_s16 = sphi %s9821_s16, %s12097_s16   ;;  %s9750_s15 = sphi %s9819_s15, %s12096_s15   ;;  %s9746_s14 = sphi %s9817_s14, %s12095_s14   ;;  %s9742_s13 = sphi %s9815_s13, %s12094_s13  }
   0x7   : > { %s9840_s19 = sadd.s32 1, %s9754_s16   ;;  %s235_s20 = sadd.s32 1, %s9750_s15 }
   0x8   : > { %s232_s21 = ssub.s32 %s9754_s16, %s9840_s19  ;;  %p245_p0 = scmp.ne.s32.totalorder %s9750_s15, %s9746_s14 }
   0x9   : > { %p233_p1 = scmp.eq.s32.totalorder %s232_s21, 0  ;;  %p246_p2 = scmp.eq.s32.totalorder %s9836_s17, 1 }
   0xa   : > { %p251_p3 = scmp.ne.s32.totalorder %s9746_s14, %s9742_s13  ;;  %p252_p4 = scmp.eq.s32.totalorder %s7679_s18, 1 }
   0xb   : > { %s9851_s22 = scalar_select %p233_p1, %s9750_s15, %s235_s20  }
   0xc   : > { %p9853_p5 = por %p246_p2, %p245_p0  ;;  %p9857_p6 = por %p252_p4, %p251_p3 }
   0xd   : > { %p7682_p7 = scmp.ge.s32.totalorder %s9754_s16, 1  ;;  %p335_p8 = scmp.lt.s32.totalorder %s9754_s16, 3 }
   0xf   : > { %p336_p9 = pnand %p7682_p7, %p335_p8 }
  0x10   : > { %v9652_v0 = vld [vmem:[%s12074_s3] sm:$0xff] (!%p336_p9)   ;;  %v9653_v1 = vld [vmem:[%s12074_s3 + $0x8] sm:$0xff] (!%p336_p9)   ;;  %p383_p10 = scmp.lt.s32.totalorder (!%p336_p9), %s9836_s17, 1  ;;  %v9654_v2 = vld [vmem:[%s12074_s3 + $0x10] sm:$0xff] (!%p336_p9)   ;;  %vm515_vm0 = vcmask (!%p336_p9), 687104   ;;  %s12088_s0 = sld [smem:[#allocation7_spill]] (!%p336_p9) }
  0x11   : > { %339 = sbr.rel (%p336_p9) target bundleno = 2091 (0x82b), region = 56  ;;  %8321 = vmatprep.subr.bf16.mxu0 (!%p336_p9), %v9652_v0  ;;  %v9655_v4 = vld [vmem:[%s12074_s3 + $0x18] sm:$0xff] (!%p336_p9)   ;;  %v9657_v5 = vld [vmem:[%s12074_s3 + $0x28] ss:$0 sps:$4 sm:$0x33] (!%p336_p9)   ;;  %vm540_vm1 = vcmask (!%p336_p9), 1041408  }
  0x12   : > { %8322 = vmatpush3.bf16.msra.mxu0 (!%p336_p9), %v9652_v0  ;;  %v9656_v6 = vld [vmem:[%s12074_s3 + $0x20] sm:$0xff] (!%p336_p9)   ;;  %v542_v7 = vsel (!%p336_p9), %vm540_vm1, %v9657_v5, 0  ;;  %vm399_vm2 = vcmask (!%p336_p9), 261120   ;;  %vm402_vm3 = vcmask (!%p336_p9), 257024   ;;  %vm404_vm4 = vcmask (!%p336_p9), 261124   ;;  %v9667_v18 = vld [vmem:[%s12076_s5 + $0x8] sm:$0xff] (!%p336_p9)  }
  0x13   : > { %8323 = vmatprep.subr.bf16.mxu0 (!%p336_p9), %v9653_v1  ;;  %v9756_v15 = vmov (!%p336_p9), 0   ;;  %v9666_v16 = vld [vmem:[%s12076_s5] sm:$0xff] (!%p336_p9)   ;;  %v9669_v19 = vld [vmem:[%s12076_s5 + $0x28] sm:$0xff] (!%p336_p9)   ;;  %v9916_v20 = vld [vmem:[%s12076_s5 + $0x10] sm:$0xff] (!%p336_p9)   ;;  %vm689_vm5 = vcmask (!%p336_p9), 1043456   ;;  %vm12082_vm6 = vcmask (!%p336_p9), 1044480  }
  0x14   : > { %403 = vst.msk [vmem:[#allocation3 + $0x10] sm:$0xf] (!%p336_p9), %vm402_vm3, %v9756_v15  ;;  %v9668_v17 = vld [vmem:[%s12076_s5 + $0x20] sm:$0xff] (!%p336_p9)   ;;  %vm1103_vm7 = vcmask (!%p336_p9), 1042432   ;;  %vm1408_vm8 = vcmask (!%p336_p9), 1045504   ;;  %vm9758_vm9 = vmmov (!%p336_p9), 0  }
  0x15   : > { %405 = vst.msk [vmem:[#allocation3 + $0x50] sm:$0xf0] (!%p336_p9), %vm404_vm4, %v9756_v15  ;;  %8389 = vmatprep.subr.bf16.mxu1 (!%p336_p9), %v9668_v17  ;;  %v9922_v21 = vld [vmem:[%s12075_s4] ss:$0 sm:$0xff] (!%p336_p9)  ;;  %vm2051_vm10 = vsmask.f32 (!%p336_p9), 2304 }
  0x16   : > { %8324 = vmatpush3.bf16.msra.mxu0 (!%p336_p9), %v9653_v1  ;;  %8390 = vmatpush3.bf16.msra.mxu1 (!%p336_p9), %v9668_v17  ;;  %vm2210_vm11 = vsmask.f32 (!%p336_p9), 1280  ;;  %vm2294_vm12 = vcmask (!%p336_p9), 1040384   ;;  %vm7540_vm13 = vcmask (!%p336_p9), 254976   ;;  %vm7552_vm14 = vcmask (!%p336_p9), 253952   ;;  %s12089_s2 = sld [smem:[#allocation8_spill]] (!%p336_p9) }
  0x17   : > { %8325 = vmatprep.subr.bf16.mxu0 (!%p336_p9), %v9654_v2  ;;  %8391 = vmatprep.subr.bf16.mxu1 (!%p336_p9), %v9669_v19  ;;  %vm2358_vm15 = vsmask.f32 (!%p336_p9), 256  ;;  %s375_s30 = sand.u32 (!%p336_p9), 1, %s9746_s14  }
  0x18   : > { %s9871_s29 = scalar_select %p383_p10, %s9836_s17, 1 }
  0x1a   : > { %s7946_s12 = sshll.u32 %s9871_s29, 6  ;;  %8326 = vmatpush3.bf16.msra.mxu0 %v9654_v2  ;;  %8392 = vmatpush3.bf16.msra.mxu1 %v9669_v19  ;;  %s397_s28 = scalar_lea.vmem %s12081_s10, %s9871_s29 }
  0x1b   : > { %s387_s21 = scalar_lea.vmem %s12088_s0, %s7946_s12  ;;  %8327 = vmatprep.subr.bf16.mxu0 %v9655_v4  ;;  %s7686_s11 = sshll.u32 %s9871_s29, 1 }
  0x1c   : > { %v9658_v3 = vld [vmem:[%s387_s21] sm:$0xff]   ;;  %v9659_v8 = vld [vmem:[%s387_s21 + $0x8] sm:$0xff]   ;;  %v9660_v9 = vld [vmem:[%s387_s21 + $0x10] sm:$0xff]   ;;  %s7683_s12 = sshll.u32 %s375_s30, 1  ;;  %s391_s25 = scalar_lea.vmem %s12072_s1, %s7686_s11 }
  0x1d   : > { %8333 = vmatprep.mubr.msk.bf16.mxu0 %vm515_vm0, %v9658_v3  ;;  %v9661_v10 = vld [vmem:[%s387_s21 + $0x18] sm:$0xff]   ;;  %v9662_v11 = vld [vmem:[%s387_s21 + $0x20] sm:$0xff]   ;;  %v9663_v12 = vld [vmem:[%s387_s21 + $0x28] sm:$0xff]   ;;  %s377_s26 = scalar_lea.vmem [#allocation4], %s7683_s12  ;;  %s9759_s11 = smov [#allocation4]  }
  0x1e   : > { %8328 = vmatpush3.bf16.msra.mxu0 %v9655_v4  ;;  %v9664_v13 = vld [vmem:[%s387_s21 + $0x30] sm:$0xff]   ;;  %v9665_v14 = vld [vmem:[%s387_s21 + $0x38] sm:$0xff]   ;;  %s394_s21 = scalar_lea.vmem %s12089_s2, %s9871_s29  ;;  %s7577_s0 = sshll.u32 %s377_s26, 4  ;;  %s12031_s0 = int_to_ptr.vmem [resolvable:$true] %s7577_s0 }
  0x1f   : > { %8329 = vmatprep.subr.bf16.mxu0 %v9656_v6  ;;  %s9692_s29 = scalar_lea.vmem %s12031_s0, 32  ;;  %s9696_s12 = sshll.u32 %s9759_s11, 4  ;;  %s9697_s12 = int_to_ptr.vmem [resolvable:$false] %s9696_s12 }
  0x20   : > { %p9693_p11 = scmp.ne.s32.totalorder %s12031_s0, %s9692_s29  ;;  %s9698_s18 = scalar_lea.vmem %s9697_s12, 64 }
  0x21   : > { %p9699_p0 = scmp.lt.s32.totalorder %s12031_s0, %s9697_s12  ;;  %p9700_p1 = scmp.lt.s32.totalorder %s9698_s18, %s9692_s29 }
  0x22   : > { %8330 = vmatpush3.bf16.msra.mxu0 %v9656_v6  ;;  %p9694_p12 = pnand %p9693_p11, %p9853_p5 }
  0x23   : > { %9609 = vmatprep.subr.msk.bf16.mxu0 %vm540_vm1, %v9657_v5  ;;  %p9701_p2 = por %p9700_p1, %p9699_p0 }
  0x24   : > { %p9695_p13 = pneg %p9694_p12 }
  0x26   : > { %8332 = vmatpush3.bf16.msra.mxu0 %v542_v7  ;;  %p9702_p3 = pnand %p9701_p2, %p9695_p13 }
  0x27   : > { %8349 = vmatprep.subr.bf16.mxu0 %v9666_v16 }
  0x29   : > { %8334 = vmatmul.mubr.msk.bf16.vlgmr.msra.gmra.mrb[0].mxu0 %vm515_vm0, %v9659_v8 }
  0x2a   : > { %8337 = vmatprep.mubr.msk.bf16.mxu0 %vm515_vm0, %v9660_v9  ;;  %8350 = vmatpush3.bf16.msra.mxu0 %v9666_v16 }
  0x2b   : > { %8351 = vmatprep.subr.bf16.mxu0 %v9667_v18 }
  0x2e   : > { %8352 = vmatpush3.bf16.msra.mxu0 %v9667_v18 }
  0x2f   : > { %8369 = vmatprep.subr.bf16.mxu0 %v9916_v20 }
  0x31   : > { %8338 = vmatmul.mubr.msk.bf16.gmra.mrb[4].mxu0 %vm515_vm0, %v9661_v10 }
  0x32   : > { %8341 = vmatprep.mubr.msk.bf16.mxu0 %vm515_vm0, %v9662_v11 }
  0x39   : > { %8342 = vmatmul.mubr.msk.bf16.gmra.mrb[8].mxu0 %vm515_vm0, %v9663_v12 }
  0x3a   : > { %8345 = vmatprep.mubr.msk.bf16.mxu0 %vm515_vm0, %v9664_v13 }
  0x41   : > { %8346 = vmatmul.mubr.msk.bf16.gmra.mrb[12].mxu0 %vm515_vm0, %v9665_v14  ;;  %vm2488_vm0 = vsmask.f32 7424 }
  0xfc   : > { %v8335_v22 = vpop.f32.mrb[0].mxu0 }
  0xfd   : > { %v587_v23 = vadd.f32 %v8335_v22, %v9922_v21  ;;  %v578_v24 = vpop.f32.mrb[1].mxu0 }
  0xfe   : > { %v579_v25 = vadd.f32 %v9922_v21, %v578_v24  ;;  %v8336_v26 = vpop.f32.mrb[2].mxu0 }
  0xff   : > { %v643_v27 = vmax.f32 %v587_v23, 0.0  ;;  %v590_v28 = vadd.f32 %v8336_v26, %v9922_v21  ;;  %v581_v29 = vpop.f32.mrb[3].mxu0 }
 0x100   : > { %v641_v30 = vmax.f32 %v579_v25, 0.0  ;;  %v582_v31 = vadd.f32 %v9922_v21, %v581_v29 }
 0x101   : > { %659 = vst.msk [vmem:[#allocation2 + $0x10] sm:$0xff] %vm399_vm2, %v643_v27  ;;  %v644_v32 = vmax.f32 %v590_v28, 0.0 }
 0x102   : > { %657 = vst.msk [vmem:[#allocation2] sm:$0xff] %vm399_vm2, %v641_v30  ;;  %v642_v33 = vmax.f32 %v582_v31, 0.0 }
 0x103   : > { %660 = vst.msk [vmem:[#allocation2 + $0x18] sm:$0xff] %vm399_vm2, %v644_v32  ;;  %v674_v34 = vpack.c.bf16 %v644_v32, %v643_v27 }
 0x104   : > { %658 = vst.msk [vmem:[#allocation2 + $0x8] sm:$0xff] %vm399_vm2, %v642_v33  ;;  %v673_v35 = vpack.c.bf16 %v642_v33, %v641_v30  ;;  %v8339_v36 = vpop.f32.mrb[4].mxu0 }
 0x105   : > { %v691_v37 = vrot.slane %v674_v34, 4  ;;  %v603_v38 = vadd.f32 %v8339_v36, %v9922_v21  ;;  %v594_v39 = vpop.f32.mrb[5].mxu0 }
 0x106   : > { %v690_v40 = vrot.slane %v673_v35, 4  ;;  %v595_v41 = vadd.f32 %v9922_v21, %v594_v39  ;;  %v8340_v42 = vpop.f32.mrb[6].mxu0 }
 0x107   : > { %v647_v43 = vmax.f32 %v603_v38, 0.0  ;;  %v606_v44 = vadd.f32 %v8340_v42, %v9922_v21  ;;  %v597_v45 = vpop.f32.mrb[7].mxu0 }
 0x108   : > { %v692_v46 = vsel %vm689_vm5, %v690_v40, %v691_v37  ;;  %714 = vst.msk [vmem:[#allocation3 + $0x10] sm:$0xf0] %vm404_vm4, %v690_v40  ;;  %v645_v47 = vmax.f32 %v595_v41, 0.0  ;;  %v598_v48 = vadd.f32 %v9922_v21, %v597_v45 }
 0x109   : > { %715 = vst.msk [vmem:[#allocation3 + $0x18] sm:$0xff] %vm399_vm2, %v692_v46  ;;  %663 = vst.msk [vmem:[#allocation2 + $0x30] sm:$0xff] %vm399_vm2, %v647_v43  ;;  %v648_v49 = vmax.f32 %v606_v44, 0.0 }
 0x10a   : > { %661 = vst.msk [vmem:[#allocation2 + $0x20] sm:$0xff] %vm399_vm2, %v645_v47  ;;  %v646_v50 = vmax.f32 %v598_v48, 0.0 }
 0x10b   : > { %664 = vst.msk [vmem:[#allocation2 + $0x38] sm:$0xff] %vm399_vm2, %v648_v49  ;;  %v676_v51 = vpack.c.bf16 %v648_v49, %v647_v43  ;;  %v9671_v43 = vld [vmem:[%s12076_s5 + $0x18] sm:$0xff]  }
 0x10c   : > { %662 = vst.msk [vmem:[#allocation2 + $0x28] sm:$0xff] %vm399_vm2, %v646_v50  ;;  %v675_v52 = vpack.c.bf16 %v646_v50, %v645_v47  ;;  %v8343_v53 = vpop.f32.mrb[8].mxu0 }
 0x10d   : > { %v695_v54 = vrot.slane %v676_v51, 4  ;;  %v619_v55 = vadd.f32 %v8343_v53, %v9922_v21  ;;  %v610_v56 = vpop.f32.mrb[9].mxu0 }
 0x10e   : > { %v693_v57 = vrot.slane %v675_v52, 4  ;;  %v611_v58 = vadd.f32 %v9922_v21, %v610_v56  ;;  %v8344_v59 = vpop.f32.mrb[10].mxu0 }
 0x10f   : > { %v651_v60 = vmax.f32 %v619_v55, 0.0  ;;  %v622_v61 = vadd.f32 %v8344_v59, %v9922_v21  ;;  %v613_v62 = vpop.f32.mrb[11].mxu0  ;;  %v724_v63 = vld [vmem:[#allocation3 + $0x10] sm:$0xf8] }
 0x110   : > { %v1094_v0 = vld [vmem:[#allocation3 + $0x10] sm:$0xe0]  ;;  %v694_v1 = vsel %vm689_vm5, %v691_v37, %v693_v57  ;;  %v696_v2 = vsel %vm689_vm5, %v693_v57, %v695_v54  ;;  %v649_v3 = vmax.f32 %v611_v58, 0.0  ;;  %v614_v4 = vadd.f32 %v9922_v21, %v613_v62  ;;  %v9949_v5 = vld [vmem:[#allocation3 + $0x18] sm:$0xff] }
 0x111   : > { %716 = vst.msk [vmem:[#allocation3 + $0x20] sm:$0xff] %vm399_vm2, %v694_v1  ;;  %717 = vst.msk [vmem:[#allocation3 + $0x28] sm:$0xff] %vm399_vm2, %v696_v2  ;;  %v652_v6 = vmax.f32 %v622_v61, 0.0  ;;  %v747_v7 = vrot.slane %v724_v63, 3  ;;  %v748_v8 = vrot.slane %v9949_v5, 3  ;;  %v1104_v9 = vrot.slane %v1094_v0, 5 }
 0x112   : > { %667 = vst.msk [vmem:[#allocation2 + $0x50] sm:$0xff] %vm399_vm2, %v651_v60  ;;  %665 = vst.msk [vmem:[#allocation2 + $0x40] sm:$0xff] %vm399_vm2, %v649_v3  ;;  %v650_v10 = vmax.f32 %v614_v4, 0.0  ;;  %v1105_v11 = vrot.slane %v9949_v5, 5 }
 0x113   : > { %668 = vst.msk [vmem:[#allocation2 + $0x58] sm:$0xff] %vm399_vm2, %v652_v6  ;;  %v678_v12 = vpack.c.bf16 %v652_v6, %v651_v60  ;;  %v749_v13 = vsel %vm12082_vm6, %v747_v7, %v748_v8  ;;  %v919_v6 = vld [vmem:[#allocation3 + $0x10] sm:$0xf0] }
 0x114   : > { %666 = vst.msk [vmem:[#allocation2 + $0x48] sm:$0xff] %vm399_vm2, %v650_v10  ;;  %v677_v14 = vpack.c.bf16 %v650_v10, %v649_v3  ;;  %v8347_v15 = vpop.f32.mrb[12].mxu0  ;;  %8353 = vmatprep.mubr.msk.bf16.mxu0 %vm399_vm2, %v749_v13  ;;  %v1106_v16 = vsel %vm1103_vm7, %v1104_v9, %v1105_v11  ;;  %v928_v9 = vrot.slane %v919_v6, 4  ;;  %v929_v10 = vrot.slane %v9949_v5, 4  ;;  %v1273_v6 = vld [vmem:[#allocation2 + $0x18] sm:$0xff] }
 0x115   : > { %v699_v17 = vrot.slane %v678_v12, 4  ;;  %v635_v18 = vadd.f32 %v8347_v15, %v9922_v21  ;;  %8393 = vmatprep.mubr.msk.bf16.mxu1 %vm399_vm2, %v1106_v16  ;;  %v626_v19 = vpop.f32.mrb[13].mxu0 }
 0x116   : > { %v697_v22 = vrot.slane %v677_v14, 4  ;;  %v627_v23 = vadd.f32 %v9922_v21, %v626_v19  ;;  %v8348_v24 = vpop.f32.mrb[14].mxu0  ;;  %v930_v15 = vsel %vm689_vm5, %v928_v9, %v929_v10 }
 0x117   : > { %v655_v25 = vmax.f32 %v635_v18, 0.0  ;;  %v638_v26 = vadd.f32 %v8348_v24, %v9922_v21  ;;  %v629_v27 = vpop.f32.mrb[15].mxu0 }
 0x118   : > { %v698_v28 = vsel %vm689_vm5, %v695_v54, %v697_v22  ;;  %v700_v29 = vsel %vm689_vm5, %v697_v22, %v699_v17  ;;  %v653_v30 = vmax.f32 %v627_v23, 0.0  ;;  %v630_v31 = vadd.f32 %v9922_v21, %v629_v27  ;;  %v9969_v32 = vld [vmem:[#allocation3 + $0x20] sm:$0xff]  ;;  %v9971_v33 = vld [vmem:[#allocation3 + $0x28] sm:$0xff] }
 0x119   : > { %718 = vst.msk [vmem:[#allocation3 + $0x30] sm:$0xff] %vm399_vm2, %v698_v28  ;;  %719 = vst.msk [vmem:[#allocation3 + $0x38] sm:$0xff] %vm399_vm2, %v700_v29  ;;  %v656_v34 = vmax.f32 %v638_v26, 0.0  ;;  %v750_v35 = vrot.slane %v9969_v32, 3  ;;  %v1107_v36 = vrot.slane %v9969_v32, 5  ;;  %v752_v37 = vrot.slane %v9971_v33, 3 }
 0x11a   : > { %671 = vst.msk [vmem:[#allocation2 + $0x70] sm:$0xff] %vm399_vm2, %v655_v25  ;;  %669 = vst.msk [vmem:[#allocation2 + $0x60] sm:$0xff] %vm399_vm2, %v653_v30  ;;  %v654_v21 = vmax.f32 %v630_v31, 0.0  ;;  %v1109_v38 = vrot.slane %v9971_v33, 5  ;;  %v931_v16 = vrot.slane %v9969_v32, 4  ;;  %v9672_v32 = vld [vmem:[%s12076_s5 + $0x30] sm:$0xff]  }
 0x11b   : > { %672 = vst.msk [vmem:[#allocation2 + $0x78] sm:$0xff] %vm399_vm2, %v656_v34  ;;  %v680_v39 = vpack.c.bf16 %v656_v34, %v655_v25  ;;  %v751_v40 = vsel %vm12082_vm6, %v748_v8, %v750_v35  ;;  %v1108_v41 = vsel %vm1103_vm7, %v1105_v11, %v1107_v36  ;;  %v753_v42 = vsel %vm12082_vm6, %v750_v35, %v752_v37  ;;  %v10048_v34 = vld [vmem:[%s12076_s5 + $0x40] sm:$0xff]  }
 0x11c   : > { %670 = vst.msk [vmem:[#allocation2 + $0x68] sm:$0xff] %vm399_vm2, %v654_v21  ;;  %v679_v44 = vpack.c.bf16 %v654_v21, %v653_v30  ;;  %8354 = vmatmul.mubr.msk.bf16.vlgmr.msra.gmra.mrb[16].mxu0 %vm399_vm2, %v751_v40  ;;  %8394 = vmatmul.mubr.msk.bf16.vlgmr.msra.gmra.mrb[0].mxu1 %vm399_vm2, %v1108_v41  ;;  %v1110_v45 = vsel %vm1103_vm7, %v1107_v36, %v1109_v38 }
 0x11d   : > { %v703_v46 = vrot.slane %v680_v39, 4  ;;  %8357 = vmatprep.mubr.msk.bf16.mxu0 %vm399_vm2, %v753_v42  ;;  %8397 = vmatprep.mubr.msk.bf16.mxu1 %vm399_vm2, %v1110_v45  ;;  %v932_v5 = vsel %vm689_vm5, %v929_v10, %v931_v16  ;;  %v1271_v10 = vld [vmem:[#allocation2 + $0x8] sm:$0xff] }
 0x11e   : > { %v701_v47 = vrot.slane %v679_v44, 4  ;;  %8370 = vmatpush3.bf16.msra.mxu0 %v9916_v20 }
 0x11f   : > { %722 = vst.msk [vmem:[#allocation3 + $0x50] sm:$0xf] %vm402_vm3, %v703_v46  ;;  %8371 = vmatprep.subr.bf16.mxu0 %v9671_v43 }
 0x120   : > { %v702_v48 = vsel %vm689_vm5, %v699_v17, %v701_v47  ;;  %v704_v49 = vsel %vm689_vm5, %v701_v47, %v703_v46  ;;  %v728_v50 = vld [vmem:[#allocation3 + $0x30] sm:$0xff]  ;;  %v729_v51 = vld [vmem:[#allocation3 + $0x38] sm:$0xff]  ;;  %v933_v17 = vrot.slane %v9971_v33, 4 }
 0x121   : > { %720 = vst.msk [vmem:[#allocation3 + $0x40] sm:$0xff] %vm399_vm2, %v702_v48  ;;  %721 = vst.msk [vmem:[#allocation3 + $0x48] sm:$0xff] %vm399_vm2, %v704_v49  ;;  %v754_v52 = vrot.slane %v728_v50, 3  ;;  %v1111_v53 = vrot.slane %v728_v50, 5  ;;  %v756_v54 = vrot.slane %v729_v51, 3  ;;  %v1113_v55 = vrot.slane %v729_v51, 5 }
 0x122   : > { %8372 = vmatpush3.bf16.msra.mxu0 %v9671_v43  ;;  %v934_v18 = vsel %vm689_vm5, %v931_v16, %v933_v17  ;;  %v935_v19 = vrot.slane %v728_v50, 4  ;;  %v937_v22 = vrot.slane %v729_v51, 4  ;;  %v9673_v33 = vld [vmem:[%s12076_s5 + $0x38] sm:$0xff]   ;;  %v10070_v50 = vld [vmem:[%s12077_s6] ss:$0 sm:$0xff] }
 0x123   : > { %v755_v20 = vsel %vm12082_vm6, %v752_v37, %v754_v52  ;;  %v1112_v56 = vsel %vm1103_vm7, %v1109_v38, %v1111_v53  ;;  %v757_v57 = vsel %vm12082_vm6, %v754_v52, %v756_v54  ;;  %v1114_v58 = vsel %vm1103_vm7, %v1111_v53, %v1113_v55  ;;  %8409 = vmatprep.subr.bf16.mxu0 %v9672_v32 }
 0x124   : > { %8358 = vmatmul.mubr.msk.bf16.gmra.mrb[20].mxu0 %vm399_vm2, %v755_v20  ;;  %8398 = vmatmul.mubr.msk.bf16.gmra.mrb[4].mxu1 %vm399_vm2, %v1112_v56  ;;  %v936_v23 = vsel %vm689_vm5, %v933_v17, %v935_v19  ;;  %v938_v24 = vsel %vm689_vm5, %v935_v19, %v937_v22 }
 0x125   : > { %8361 = vmatprep.mubr.msk.bf16.mxu0 %vm399_vm2, %v757_v57  ;;  %8401 = vmatprep.mubr.msk.bf16.mxu1 %vm399_vm2, %v1114_v58 }
 0x126   : > { %v732_v7 = vld [vmem:[#allocation3 + $0x50] sm:$0x7] }
 0x127   : > { %v1095_v8 = vld [vmem:[#allocation3 + $0x50] sm:$0x1f]  ;;  %v762_v11 = vrot.slane %v732_v7, 3 }
 0x128   : > { %v730_v59 = vld [vmem:[#allocation3 + $0x40] sm:$0xff]  ;;  %v731_v60 = vld [vmem:[#allocation3 + $0x48] sm:$0xff]  ;;  %v1119_v12 = vrot.slane %v1095_v8, 5  ;;  %v920_v29 = vld [vmem:[#allocation3 + $0x50] sm:$0xf] }
 0x129   : > { %v758_v61 = vrot.slane %v730_v59, 3  ;;  %v1115_v62 = vrot.slane %v730_v59, 5  ;;  %v760_v63 = vrot.slane %v731_v60, 3  ;;  %v1117_v0 = vrot.slane %v731_v60, 5 }
 0x12a   : > { %v939_v25 = vrot.slane %v730_v59, 4  ;;  %v941_v26 = vrot.slane %v731_v60, 4  ;;  %v943_v30 = vrot.slane %v920_v29, 4 }
 0x12b   : > { %v759_v1 = vsel %vm12082_vm6, %v756_v54, %v758_v61  ;;  %v1116_v2 = vsel %vm1103_vm7, %v1113_v55, %v1115_v62  ;;  %v761_v3 = vsel %vm12082_vm6, %v758_v61, %v760_v63  ;;  %v1118_v4 = vsel %vm1103_vm7, %v1115_v62, %v1117_v0  ;;  %v1272_v62 = vld [vmem:[#allocation2 + $0x10] sm:$0xff] }
 0x12c   : > { %8362 = vmatmul.mubr.msk.bf16.gmra.mrb[24].mxu0 %vm399_vm2, %v759_v1  ;;  %8402 = vmatmul.mubr.msk.bf16.gmra.mrb[8].mxu1 %vm399_vm2, %v1116_v2  ;;  %v763_v13 = vsel %vm12082_vm6, %v760_v63, %v762_v11  ;;  %v1120_v14 = vsel %vm1103_vm7, %v1117_v0, %v1119_v12  ;;  %v940_v27 = vsel %vm689_vm5, %v937_v22, %v939_v25  ;;  %v1270_v2 = vld [vmem:[#allocation2] sm:$0xff] }
 0x12d   : > { %8365 = vmatprep.mubr.msk.bf16.mxu0 %vm399_vm2, %v761_v3  ;;  %8405 = vmatprep.mubr.msk.bf16.mxu1 %vm399_vm2, %v1118_v4  ;;  %v942_v28 = vsel %vm689_vm5, %v939_v25, %v941_v26  ;;  %v944_v31 = vsel %vm689_vm5, %v941_v26, %v943_v30 }
 0x134   : > { %8366 = vmatmul.mubr.msk.bf16.gmra.mrb[28].mxu0 %vm399_vm2, %v763_v13  ;;  %8406 = vmatmul.mubr.msk.bf16.gmra.mrb[12].mxu1 %vm399_vm2, %v1120_v14 }
 0x135   : > { %8373 = vmatprep.mubr.msk.bf16.mxu0 %vm399_vm2, %v930_v15 }
 0x13c   : > { %8374 = vmatmul.mubr.msk.bf16.vlgmr.msra.gmra.mrb[16].mxu0 %vm399_vm2, %v932_v5 }
 0x13d   : > { %8377 = vmatprep.mubr.msk.bf16.mxu0 %vm399_vm2, %v934_v18  ;;  %8410 = vmatpush3.bf16.msra.mxu0 %v9672_v32  ;;  %v1274_v32 = vld [vmem:[#allocation2 + $0x20] sm:$0xff] }
 0x13e   : > { %8411 = vmatprep.subr.bf16.mxu0 %v9673_v33 }
 0x141   : > { %8412 = vmatpush3.bf16.msra.mxu0 %v9673_v33 }
 0x142   : > { %8429 = vmatprep.subr.bf16.mxu0 %v10048_v34 }
 0x144   : > { %8378 = vmatmul.mubr.msk.bf16.gmra.mrb[20].mxu0 %vm399_vm2, %v936_v23 }
 0x145   : > { %8381 = vmatprep.mubr.msk.bf16.mxu0 %vm399_vm2, %v938_v24 }
 0x14c   : > { %8382 = vmatmul.mubr.msk.bf16.gmra.mrb[24].mxu0 %vm399_vm2, %v940_v27 }
 0x14d   : > { %8385 = vmatprep.mubr.msk.bf16.mxu0 %vm399_vm2, %v942_v28  ;;  %v1276_v28 = vld [vmem:[#allocation2 + $0x30] sm:$0xff] }
 0x154   : > { %8386 = vmatmul.mubr.msk.bf16.gmra.mrb[28].mxu0 %vm399_vm2, %v944_v31 }
 0x1ef   : > { %v8395_v35 = vpop.f32.mrb[0].mxu1 }
 0x1f0   : > { %v1191_v36 = vpop.f32.mrb[1].mxu1 }
 0x1f1   : > { %v8396_v37 = vpop.f32.mrb[2].mxu1 }
 0x1f2   : > { %v1194_v21 = vpop.f32.mrb[3].mxu1 }
 0x1f7   : > { %v8399_v38 = vpop.f32.mrb[4].mxu1 }
 0x1f8   : > { %v1207_v39 = vpop.f32.mrb[5].mxu1 }
 0x1f9   : > { %v8400_v40 = vpop.f32.mrb[6].mxu1 }
 0x1fa   : > { %v1210_v41 = vpop.f32.mrb[7].mxu1 }
 0x1ff   : > { %v10051_v42 = vpop.f32.mrb[8].mxu1 }
 0x200   : > { %v10053_v43 = vpop.f32.mrb[9].mxu1 }
 0x201   : > { %v10055_v44 = vpop.f32.mrb[10].mxu1 }
 0x202   : > { %v10057_v45 = vpop.f32.mrb[11].mxu1 }
 0x207   : > { %v10059_v46 = vpop.f32.mrb[12].mxu1 }
 0x208   : > { %v10061_v47 = vpop.f32.mrb[13].mxu1 }
 0x209   : > { %v10063_v48 = vpop.f32.mrb[14].mxu1 }
 0x20a   : > { %v10065_v49 = vpop.f32.mrb[15].mxu1 }
 0x20f   : > { %v8375_v51 = vpop.f32.mrb[16].mxu0 }
 0x210   : > { %v9219_v52 = vadd.f32 %v8375_v51, %v10070_v50  ;;  %v1015_v53 = vpop.f32.mrb[17].mxu0 }
 0x211   : > { %v9221_v54 = vadd.f32 %v10070_v50, %v1015_v53  ;;  %v8376_v55 = vpop.f32.mrb[18].mxu0 }
 0x212   : > { %v9220_v20 = vadd.f32 %v9219_v52, %v8395_v35  ;;  %v9223_v56 = vadd.f32 %v8376_v55, %v10070_v50  ;;  %v1018_v57 = vpop.f32.mrb[19].mxu0 }
 0x213   : > { %v9222_v58 = vadd.f32 %v9221_v54, %v1191_v36  ;;  %v9225_v59 = vadd.f32 %v10070_v50, %v1018_v57 }
 0x214   : > { %v1288_v60 = vmax.f32 %v9220_v20, 0.0  ;;  %v9224_v61 = vadd.f32 %v9223_v56, %v8396_v37  ;;  %v1277_v37 = vld [vmem:[#allocation2 + $0x38] sm:$0xff] }
 0x215   : > { %v1286_v63 = vmax.f32 %v9222_v58, 0.0  ;;  %v9226_v0 = vadd.f32 %v9225_v59, %v1194_v21 }
 0x216   : > { %v1304_v1 = vadd.f32 %v1288_v60, %v1272_v62  ;;  %v1289_v3 = vmax.f32 %v9224_v61, 0.0 }
 0x217   : > { %v1302_v4 = vadd.f32 %v1286_v63, %v1270_v2  ;;  %v1287_v7 = vmax.f32 %v9226_v0, 0.0  ;;  %v8379_v8 = vpop.f32.mrb[20].mxu0 }
 0x218   : > { %1320 = vst.msk [vmem:[#allocation2 + $0x10] sm:$0xff] %vm399_vm2, %v1304_v1  ;;  %v1305_v9 = vadd.f32 %v1289_v3, %v1273_v6  ;;  %v9227_v11 = vadd.f32 %v8379_v8, %v10070_v50  ;;  %v1031_v12 = vpop.f32.mrb[21].mxu0 }
 0x219   : > { %1318 = vst.msk [vmem:[#allocation2] sm:$0xff] %vm399_vm2, %v1302_v4  ;;  %v1303_v13 = vadd.f32 %v1287_v7, %v1271_v10  ;;  %v9229_v14 = vadd.f32 %v10070_v50, %v1031_v12  ;;  %v8380_v15 = vpop.f32.mrb[22].mxu0  ;;  %v1281_v10 = vld [vmem:[#allocation2 + $0x58] sm:$0xff] }
 0x21a   : > { %1321 = vst.msk [vmem:[#allocation2 + $0x18] sm:$0xff] %vm399_vm2, %v1305_v9  ;;  %v1335_v16 = vpack.c.bf16 %v1305_v9, %v1304_v1  ;;  %v9228_v17 = vadd.f32 %v9227_v11, %v8399_v38  ;;  %v9231_v5 = vadd.f32 %v8380_v15, %v10070_v50  ;;  %v1034_v18 = vpop.f32.mrb[23].mxu0  ;;  %v1280_v1 = vld [vmem:[#allocation2 + $0x50] sm:$0xff] }
 0x21b   : > { %1319 = vst.msk [vmem:[#allocation2 + $0x8] sm:$0xff] %vm399_vm2, %v1303_v13  ;;  %v1334_v19 = vpack.c.bf16 %v1303_v13, %v1302_v4  ;;  %v9230_v22 = vadd.f32 %v9229_v14, %v1207_v39  ;;  %v9233_v23 = vadd.f32 %v10070_v50, %v1034_v18  ;;  %v1278_v4 = vld [vmem:[#allocation2 + $0x40] sm:$0xff] }
 0x21c   : > { %v1351_v24 = vrot.slane %v1335_v16, 4  ;;  %v1292_v25 = vmax.f32 %v9228_v17, 0.0  ;;  %v9232_v26 = vadd.f32 %v9231_v5, %v8400_v40  ;;  %v1275_v40 = vld [vmem:[#allocation2 + $0x28] sm:$0xff] }
 0x21d   : > { %v1350_v27 = vrot.slane %v1334_v19, 4  ;;  %v1290_v29 = vmax.f32 %v9230_v22, 0.0  ;;  %v9234_v30 = vadd.f32 %v9233_v23, %v1210_v41 }
 0x21e   : > { %v1308_v31 = vadd.f32 %v1292_v25, %v1276_v28  ;;  %v1293_v33 = vmax.f32 %v9232_v26, 0.0 }
 0x21f   : > { %v1352_v35 = vsel %vm689_vm5, %v1350_v27, %v1351_v24  ;;  %1374 = vst.msk [vmem:[#allocation3 + $0x10] sm:$0xf0] %vm404_vm4, %v1350_v27  ;;  %v1306_v36 = vadd.f32 %v1290_v29, %v1274_v32  ;;  %v1291_v21 = vmax.f32 %v9234_v30, 0.0  ;;  %v8383_v38 = vpop.f32.mrb[24].mxu0 }
 0x220   : > { %1375 = vst.msk [vmem:[#allocation3 + $0x18] sm:$0xff] %vm399_vm2, %v1352_v35  ;;  %1324 = vst.msk [vmem:[#allocation2 + $0x30] sm:$0xff] %vm399_vm2, %v1308_v31  ;;  %v1309_v39 = vadd.f32 %v1293_v33, %v1277_v37  ;;  %v9235_v51 = vadd.f32 %v8383_v38, %v10070_v50  ;;  %v1047_v41 = vpop.f32.mrb[25].mxu0 }
 0x221   : > { %1322 = vst.msk [vmem:[#allocation2 + $0x20] sm:$0xff] %vm399_vm2, %v1306_v36  ;;  %v1307_v52 = vadd.f32 %v1291_v21, %v1275_v40  ;;  %v9237_v53 = vadd.f32 %v10070_v50, %v1047_v41  ;;  %v8384_v54 = vpop.f32.mrb[26].mxu0  ;;  %v1282_v21 = vld [vmem:[#allocation2 + $0x60] sm:$0xff] }
 0x222   : > { %1325 = vst.msk [vmem:[#allocation2 + $0x38] sm:$0xff] %vm399_vm2, %v1309_v39  ;;  %v1337_v55 = vpack.c.bf16 %v1309_v39, %v1308_v31  ;;  %v9236_v20 = vadd.f32 %v9235_v51, %v10051_v42  ;;  %v9239_v56 = vadd.f32 %v8384_v54, %v10070_v50  ;;  %v1050_v57 = vpop.f32.mrb[27].mxu0 }
 0x223   : > { %1323 = vst.msk [vmem:[#allocation2 + $0x28] sm:$0xff] %vm399_vm2, %v1307_v52  ;;  %v1336_v58 = vpack.c.bf16 %v1307_v52, %v1306_v36  ;;  %v9238_v59 = vadd.f32 %v9237_v53, %v10053_v43  ;;  %v9241_v60 = vadd.f32 %v10070_v50, %v1050_v57 }
 0x224   : > { %v1355_v61 = vrot.slane %v1337_v55, 4  ;;  %v1296_v62 = vmax.f32 %v9236_v20, 0.0  ;;  %v9240_v63 = vadd.f32 %v9239_v56, %v10055_v44  ;;  %v9675_v20 = vld [vmem:[%s12076_s5 + $0x48] sm:$0xff]  }
 0x225   : > { %v1353_v0 = vrot.slane %v1336_v58, 4  ;;  %v1294_v2 = vmax.f32 %v9238_v59, 0.0  ;;  %v9242_v3 = vadd.f32 %v9241_v60, %v10057_v45  ;;  %v1279_v45 = vld [vmem:[#allocation2 + $0x48] sm:$0xff] }
 0x226   : > { %v1312_v42 = vadd.f32 %v1296_v62, %v1280_v1  ;;  %v1297_v6 = vmax.f32 %v9240_v63, 0.0  ;;  %v1385_v7 = vld [vmem:[#allocation3 + $0x10] sm:$0xfc] }
 0x227   : > { %v1354_v8 = vsel %vm689_vm5, %v1351_v24, %v1353_v0  ;;  %v1356_v43 = vsel %vm689_vm5, %v1353_v0, %v1355_v61  ;;  %v1310_v9 = vadd.f32 %v1294_v2, %v1278_v4  ;;  %v1295_v11 = vmax.f32 %v9242_v3, 0.0  ;;  %v8387_v12 = vpop.f32.mrb[28].mxu0  ;;  %v10101_v13 = vld [vmem:[#allocation3 + $0x18] sm:$0xff]  ;;  %v9676_v62 = vld [vmem:[%s12076_s5 + $0x50] sm:$0xff]  }
 0x228   : > { %1376 = vst.msk [vmem:[#allocation3 + $0x20] sm:$0xff] %vm399_vm2, %v1354_v8  ;;  %1377 = vst.msk [vmem:[#allocation3 + $0x28] sm:$0xff] %vm399_vm2, %v1356_v43  ;;  %v1313_v44 = vadd.f32 %v1297_v6, %v1281_v10  ;;  %v9243_v14 = vadd.f32 %v8387_v12, %v10070_v50  ;;  %v1063_v15 = vpop.f32.mrb[29].mxu0  ;;  %v1409_v16 = vrot.slane %v1385_v7, 2  ;;  %v1410_v17 = vrot.slane %v10101_v13, 2 }
 0x229   : > { %1328 = vst.msk [vmem:[#allocation2 + $0x50] sm:$0xff] %vm399_vm2, %v1312_v42  ;;  %1326 = vst.msk [vmem:[#allocation2 + $0x40] sm:$0xff] %vm399_vm2, %v1310_v9  ;;  %v1311_v5 = vadd.f32 %v1295_v11, %v1279_v45  ;;  %v9245_v18 = vadd.f32 %v10070_v50, %v1063_v15  ;;  %v8388_v19 = vpop.f32.mrb[30].mxu0  ;;  %v1581_v11 = vld [vmem:[#allocation3 + $0x10] sm:$0xf0]  ;;  %v1591_v45 = vrot.slane %v10101_v13, 4 }
 0x22a   : > { %1329 = vst.msk [vmem:[#allocation2 + $0x58] sm:$0xff] %vm399_vm2, %v1313_v44  ;;  %v1339_v22 = vpack.c.bf16 %v1313_v44, %v1312_v42  ;;  %v9244_v23 = vadd.f32 %v9243_v14, %v10059_v46  ;;  %v9247_v24 = vadd.f32 %v8388_v19, %v10070_v50  ;;  %v1066_v25 = vpop.f32.mrb[31].mxu0  ;;  %v1411_v26 = vsel %vm1408_vm8, %v1409_v16, %v1410_v17  ;;  %v1284_v46 = vld [vmem:[#allocation2 + $0x70] sm:$0xff] }
 0x22b   : > { %1327 = vst.msk [vmem:[#allocation2 + $0x48] sm:$0xff] %vm399_vm2, %v1311_v5  ;;  %v1338_v27 = vpack.c.bf16 %v1311_v5, %v1310_v9  ;;  %v9246_v28 = vadd.f32 %v9245_v18, %v10061_v47  ;;  %v9249_v29 = vadd.f32 %v10070_v50, %v1066_v25  ;;  %8413 = vmatprep.mubr.msk.bf16.mxu0 %vm399_vm2, %v1411_v26  ;;  %v1285_v50 = vld [vmem:[#allocation2 + $0x78] sm:$0xff]  ;;  %v1590_v44 = vrot.slane %v1581_v11, 4 }
 0x22c   : > { %v1359_v30 = vrot.slane %v1339_v22, 4  ;;  %v1300_v31 = vmax.f32 %v9244_v23, 0.0  ;;  %v9248_v32 = vadd.f32 %v9247_v24, %v10063_v48  ;;  %v9677_v18 = vld [vmem:[%s12076_s5 + $0x58] sm:$0xff]  }
 0x22d   : > { %v1357_v33 = vrot.slane %v1338_v27, 4  ;;  %v1298_v35 = vmax.f32 %v9246_v28, 0.0  ;;  %v9250_v36 = vadd.f32 %v9249_v29, %v10065_v49  ;;  %v1283_v49 = vld [vmem:[#allocation2 + $0x68] sm:$0xff]  ;;  %v1592_v16 = vsel %vm689_vm5, %v1590_v44, %v1591_v45 }
 0x22e   : > { %v1316_v37 = vadd.f32 %v1300_v31, %v1284_v46  ;;  %v1301_v38 = vmax.f32 %v9248_v32, 0.0  ;;  %v1756_v31 = vld [vmem:[#allocation3 + $0x10] sm:$0xc0]  ;;  %v1767_v46 = vrot.slane %v10101_v13, 6 }
 0x22f   : > { %v1358_v39 = vsel %vm689_vm5, %v1355_v61, %v1357_v33  ;;  %v1360_v47 = vsel %vm689_vm5, %v1357_v33, %v1359_v30  ;;  %v1314_v40 = vadd.f32 %v1298_v35, %v1282_v21  ;;  %v1299_v51 = vmax.f32 %v9250_v36, 0.0  ;;  %v10122_v41 = vld [vmem:[#allocation3 + $0x20] sm:$0xff]  ;;  %v10124_v52 = vld [vmem:[#allocation3 + $0x28] sm:$0xff] }
 0x230   : > { %1378 = vst.msk [vmem:[#allocation3 + $0x30] sm:$0xff] %vm399_vm2, %v1358_v39  ;;  %1379 = vst.msk [vmem:[#allocation3 + $0x38] sm:$0xff] %vm399_vm2, %v1360_v47  ;;  %v1317_v48 = vadd.f32 %v1301_v38, %v1285_v50  ;;  %v1412_v53 = vrot.slane %v10122_v41, 2  ;;  %v1414_v54 = vrot.slane %v10124_v52, 2  ;;  %v1595_v5 = vrot.slane %v10124_v52, 4 }
 0x231   : > { %1332 = vst.msk [vmem:[#allocation2 + $0x70] sm:$0xff] %vm399_vm2, %v1316_v37  ;;  %1330 = vst.msk [vmem:[#allocation2 + $0x60] sm:$0xff] %vm399_vm2, %v1314_v40  ;;  %v1315_v55 = vadd.f32 %v1299_v51, %v1283_v49  ;;  %v1766_v33 = vrot.slane %v1756_v31, 6  ;;  %v1769_v21 = vrot.slane %v10122_v41, 6  ;;  %v1771_v38 = vrot.slane %v10124_v52, 6  ;;  %v1939_v31 = vld [vmem:[#allocation2 + $0x38] sm:$0xff] }
 0x232   : > { %1333 = vst.msk [vmem:[#allocation2 + $0x78] sm:$0xff] %vm399_vm2, %v1317_v48  ;;  %v1341_v56 = vpack.c.bf16 %v1317_v48, %v1316_v37  ;;  %v1413_v57 = vsel %vm1408_vm8, %v1410_v17, %v1412_v53  ;;  %v1415_v58 = vsel %vm1408_vm8, %v1412_v53, %v1414_v54  ;;  %v1593_v17 = vrot.slane %v10122_v41, 4 }
 0x233   : > { %1331 = vst.msk [vmem:[#allocation2 + $0x68] sm:$0xff] %vm399_vm2, %v1315_v55  ;;  %v1340_v59 = vpack.c.bf16 %v1315_v55, %v1314_v40  ;;  %8414 = vmatmul.mubr.msk.bf16.vlgmr.msra.gmra.mrb[32].mxu0 %vm399_vm2, %v1413_v57  ;;  %v1768_v37 = vsel %vm540_vm1, %v1766_v33, %v1767_v46  ;;  %v1770_v39 = vsel %vm540_vm1, %v1767_v46, %v1769_v21  ;;  %v1937_v46 = vld [vmem:[#allocation2 + $0x28] sm:$0xff] }
 0x234   : > { %v1363_v60 = vrot.slane %v1341_v56, 4  ;;  %8417 = vmatprep.mubr.msk.bf16.mxu0 %vm399_vm2, %v1415_v58  ;;  %8430 = vmatpush3.bf16.msra.mxu0 %v10048_v34  ;;  %v1594_v19 = vsel %vm689_vm5, %v1591_v45, %v1593_v17  ;;  %v1596_v22 = vsel %vm689_vm5, %v1593_v17, %v1595_v5  ;;  %v1772_v47 = vsel %vm540_vm1, %v1769_v21, %v1771_v38  ;;  %v10230_v56 = vld [vmem:[%s12077_s6 + $0x1] ss:$0 sm:$0xff] }
 0x235   : > { %v1361_v61 = vrot.slane %v1340_v59, 4  ;;  %8431 = vmatprep.subr.bf16.mxu0 %v9675_v20 }
 0x236   : > { %1382 = vst.msk [vmem:[#allocation3 + $0x50] sm:$0xf] %vm402_vm3, %v1363_v60 }
 0x237   : > { %v1362_v63 = vsel %vm689_vm5, %v1359_v30, %v1361_v61  ;;  %v1364_v0 = vsel %vm689_vm5, %v1361_v61, %v1363_v60  ;;  %v10148_v1 = vld [vmem:[#allocation3 + $0x30] sm:$0xff]  ;;  %v10150_v2 = vld [vmem:[#allocation3 + $0x38] sm:$0xff] }
 0x238   : > { %1380 = vst.msk [vmem:[#allocation3 + $0x40] sm:$0xff] %vm399_vm2, %v1362_v63  ;;  %1381 = vst.msk [vmem:[#allocation3 + $0x48] sm:$0xff] %vm399_vm2, %v1364_v0  ;;  %v1416_v34 = vrot.slane %v10148_v1, 2  ;;  %v1418_v3 = vrot.slane %v10150_v2, 2  ;;  %8432 = vmatpush3.bf16.msra.mxu0 %v9675_v20  ;;  %v1597_v23 = vrot.slane %v10148_v1, 4  ;;  %v1599_v24 = vrot.slane %v10150_v2, 4 }
 0x239   : > { %8449 = vmatprep.subr.bf16.mxu0 %v9676_v62  ;;  %v1773_v13 = vrot.slane %v10148_v1, 6  ;;  %v1775_v40 = vrot.slane %v10150_v2, 6  ;;  %v9757_v20 = vmov 0.0   ;;  %v1934_v1 = vld [vmem:[#allocation2 + $0x10] sm:$0xff] }
 0x23a   : > { %v1417_v42 = vsel %vm1408_vm8, %v1414_v54, %v1416_v34  ;;  %v1419_v4 = vsel %vm1408_vm8, %v1416_v34, %v1418_v3  ;;  %v1598_v25 = vsel %vm689_vm5, %v1595_v5, %v1597_v23  ;;  %v1600_v26 = vsel %vm689_vm5, %v1597_v23, %v1599_v24  ;;  %8809 = vmatprep.subr.bf16.mxu1 %v9757_v20  ;;  %v1938_v23 = vld [vmem:[#allocation2 + $0x30] sm:$0xff] }
 0x23b   : > { %8418 = vmatmul.mubr.msk.bf16.gmra.mrb[36].mxu0 %vm399_vm2, %v1417_v42  ;;  %v1774_v50 = vsel %vm540_vm1, %v1771_v38, %v1773_v13  ;;  %v1776_v51 = vsel %vm540_vm1, %v1773_v13, %v1775_v40  ;;  %8815 = vmatprep.mubr.msk.bf16.mxu1 %vm9758_vm9, %v9757_v20  ;;  %v1932_v42 = vld [vmem:[#allocation2] sm:$0xff] }
 0x23c   : > { %8421 = vmatprep.mubr.msk.bf16.mxu0 %vm399_vm2, %v1419_v4 }
 0x23d   : > { %v1393_v12 = vld [vmem:[#allocation3 + $0x50] sm:$0x3] }
 0x23e   : > { %v1424_v14 = vrot.slane %v1393_v12, 2  ;;  %v1582_v32 = vld [vmem:[#allocation3 + $0x50] sm:$0xf] }
 0x23f   : > { %v10160_v6 = vld [vmem:[#allocation3 + $0x40] sm:$0xff]  ;;  %v10162_v7 = vld [vmem:[#allocation3 + $0x48] sm:$0xff]  ;;  %v1605_v35 = vrot.slane %v1582_v32, 4  ;;  %v1757_v53 = vld [vmem:[#allocation3 + $0x50] sm:$0x3f] }
 0x240   : > { %v1420_v8 = vrot.slane %v10160_v6, 2  ;;  %v1422_v43 = vrot.slane %v10162_v7, 2  ;;  %v1601_v27 = vrot.slane %v10160_v6, 4  ;;  %v1603_v28 = vrot.slane %v10162_v7, 4 }
 0x241   : > { %v1777_v41 = vrot.slane %v10160_v6, 6  ;;  %v1779_v52 = vrot.slane %v10162_v7, 6  ;;  %v1781_v54 = vrot.slane %v1757_v53, 6  ;;  %v1935_v7 = vld [vmem:[#allocation2 + $0x18] sm:$0xff] }
 0x242   : > { %v1421_v9 = vsel %vm1408_vm8, %v1418_v3, %v1420_v8  ;;  %v1423_v10 = vsel %vm1408_vm8, %v1420_v8, %v1422_v43  ;;  %v1425_v15 = vsel %vm1408_vm8, %v1422_v43, %v1424_v14  ;;  %v1602_v29 = vsel %vm689_vm5, %v1599_v24, %v1601_v27 }
 0x243   : > { %8422 = vmatmul.mubr.msk.bf16.gmra.mrb[40].mxu0 %vm399_vm2, %v1421_v9  ;;  %v1604_v30 = vsel %vm689_vm5, %v1601_v27, %v1603_v28  ;;  %v1606_v36 = vsel %vm689_vm5, %v1603_v28, %v1605_v35  ;;  %v1778_v48 = vsel %vm540_vm1, %v1775_v40, %v1777_v41  ;;  %v1780_v49 = vsel %vm540_vm1, %v1777_v41, %v1779_v52  ;;  %v1933_v9 = vld [vmem:[#allocation2 + $0x8] sm:$0xff]  ;;  %v1936_v27 = vld [vmem:[#allocation2 + $0x20] sm:$0xff] }
 0x244   : > { %8425 = vmatprep.mubr.msk.bf16.mxu0 %vm399_vm2, %v1423_v10  ;;  %v1782_v55 = vsel %vm540_vm1, %v1779_v52, %v1781_v54 }
 0x24b   : > { %8426 = vmatmul.mubr.msk.bf16.gmra.mrb[44].mxu0 %vm399_vm2, %v1425_v15 }
 0x24c   : > { %8433 = vmatprep.mubr.msk.bf16.mxu0 %vm399_vm2, %v1592_v16 }
 0x253   : > { %8434 = vmatmul.mubr.msk.bf16.vlgmr.msra.gmra.mrb[32].mxu0 %vm399_vm2, %v1594_v19 }
 0x254   : > { %8437 = vmatprep.mubr.msk.bf16.mxu0 %vm399_vm2, %v1596_v22  ;;  %8450 = vmatpush3.bf16.msra.mxu0 %v9676_v62 }
 0x255   : > { %8451 = vmatprep.subr.bf16.mxu0 %v9677_v18 }
 0x258   : > { %8452 = vmatpush3.bf16.msra.mxu0 %v9677_v18 }
 0x259   : > { %8469 = vmatprep.subr.bf16.mxu0 %v9757_v20 }
 0x25b   : > { %8438 = vmatmul.mubr.msk.bf16.gmra.mrb[36].mxu0 %vm399_vm2, %v1598_v25 }
 0x25c   : > { %8441 = vmatprep.mubr.msk.bf16.mxu0 %vm399_vm2, %v1600_v26 }
 0x263   : > { %8442 = vmatmul.mubr.msk.bf16.gmra.mrb[40].mxu0 %vm399_vm2, %v1602_v29 }
 0x264   : > { %8445 = vmatprep.mubr.msk.bf16.mxu0 %vm399_vm2, %v1604_v30 }
 0x26b   : > { %8446 = vmatmul.mubr.msk.bf16.gmra.mrb[44].mxu0 %vm399_vm2, %v1606_v36 }
 0x26c   : > { %8453 = vmatprep.mubr.msk.bf16.mxu0 %vm399_vm2, %v1768_v37 }
 0x273   : > { %8454 = vmatmul.mubr.msk.bf16.vlgmr.msra.gmra.mrb[32].mxu0 %vm399_vm2, %v1770_v39 }
 0x274   : > { %8457 = vmatprep.mubr.msk.bf16.mxu0 %vm399_vm2, %v1772_v47 }
 0x27b   : > { %8458 = vmatmul.mubr.msk.bf16.gmra.mrb[36].mxu0 %vm399_vm2, %v1774_v50 }
 0x27c   : > { %8461 = vmatprep.mubr.msk.bf16.mxu0 %vm399_vm2, %v1776_v51 }
 0x283   : > { %8462 = vmatmul.mubr.msk.bf16.gmra.mrb[40].mxu0 %vm399_vm2, %v1778_v48  ;;  %v1942_v48 = vld [vmem:[#allocation2 + $0x50] sm:$0xff] }
 0x284   : > { %8465 = vmatprep.mubr.msk.bf16.mxu0 %vm399_vm2, %v1780_v49  ;;  %v1940_v49 = vld [vmem:[#allocation2 + $0x40] sm:$0xff] }
 0x28b   : > { %8466 = vmatmul.mubr.msk.bf16.gmra.mrb[44].mxu0 %vm399_vm2, %v1782_v55 }
 0x28c   : > { %8475 = vmatprep.mubr.msk.bf16.mxu0 %vm9758_vm9, %v9757_v20 }
 0x346   : > { %v8455_v57 = vpop.f32.mrb[32].mxu0 }
 0x347   : > { %v9251_v58 = vadd.f32 %v8455_v57, %v10230_v56  ;;  %v1853_v59 = vpop.f32.mrb[33].mxu0 }
 0x348   : > { %v9252_v60 = vadd.f32 %v10230_v56, %v1853_v59  ;;  %v8456_v61 = vpop.f32.mrb[34].mxu0 }
 0x349   : > { %v1950_v62 = vmax.f32 %v9251_v58, 0.0  ;;  %v9253_v63 = vadd.f32 %v8456_v61, %v10230_v56  ;;  %v1856_v0 = vpop.f32.mrb[35].mxu0 }
 0x34a   : > { %v1948_v2 = vmax.f32 %v9252_v60, 0.0  ;;  %v9254_v34 = vadd.f32 %v10230_v56, %v1856_v0  ;;  %v1943_v0 = vld [vmem:[#allocation2 + $0x58] sm:$0xff] }
 0x34b   : > { %v1966_v3 = vadd.f32 %v1950_v62, %v1934_v1  ;;  %v1951_v4 = vmax.f32 %v9253_v63, 0.0 }
 0x34c   : > { %v1964_v6 = vadd.f32 %v1948_v2, %v1932_v42  ;;  %v1949_v8 = vmax.f32 %v9254_v34, 0.0 }
 0x34d   : > { %1982 = vst.msk [vmem:[#allocation2 + $0x10] sm:$0xff] %vm399_vm2, %v1966_v3  ;;  %v1967_v43 = vadd.f32 %v1951_v4, %v1935_v7 }
 0x34e   : > { %1980 = vst.msk [vmem:[#allocation2] sm:$0xff] %vm399_vm2, %v1964_v6  ;;  %v1965_v10 = vadd.f32 %v1949_v8, %v1933_v9  ;;  %v8459_v11 = vpop.f32.mrb[36].mxu0 }
 0x34f   : > { %1983 = vst.msk [vmem:[#allocation2 + $0x18] sm:$0xff] %vm399_vm2, %v1967_v43  ;;  %v1997_v12 = vpack.c.bf16 %v1967_v43, %v1966_v3  ;;  %v9255_v44 = vadd.f32 %v8459_v11, %v10230_v56  ;;  %v1869_v45 = vpop.f32.mrb[37].mxu0  ;;  %v1941_v3 = vld [vmem:[#allocation2 + $0x48] sm:$0xff] }
 0x350   : > { %1981 = vst.msk [vmem:[#allocation2 + $0x8] sm:$0xff] %vm399_vm2, %v1965_v10  ;;  %v1996_v14 = vpack.c.bf16 %v1965_v10, %v1964_v6  ;;  %v9256_v15 = vadd.f32 %v10230_v56, %v1869_v45  ;;  %v8460_v16 = vpop.f32.mrb[38].mxu0 }
 0x351   : > { %v2013_v17 = vrot.slane %v1997_v12, 4  ;;  %v1954_v5 = vmax.f32 %v9255_v44, 0.0  ;;  %v9257_v18 = vadd.f32 %v8460_v16, %v10230_v56  ;;  %v1872_v19 = vpop.f32.mrb[39].mxu0 }
 0x352   : > { %v2012_v22 = vrot.slane %v1996_v14, 4  ;;  %v1952_v24 = vmax.f32 %v9256_v15, 0.0  ;;  %v9258_v25 = vadd.f32 %v10230_v56, %v1872_v19 }
 0x353   : > { %v1970_v26 = vadd.f32 %v1954_v5, %v1938_v23  ;;  %v1955_v28 = vmax.f32 %v9257_v18, 0.0 }
 0x354   : > { %v2014_v29 = vsel %vm689_vm5, %v2012_v22, %v2013_v17  ;;  %2036 = vst.msk [vmem:[#allocation3 + $0x10] sm:$0xf0] %vm404_vm4, %v2012_v22  ;;  %v1968_v30 = vadd.f32 %v1952_v24, %v1936_v27  ;;  %v1953_v32 = vmax.f32 %v9258_v25, 0.0  ;;  %v1946_v27 = vld [vmem:[#allocation2 + $0x70] sm:$0xff]  ;;  %vm12083_vm4 = vsmask.f32 6400 }
 0x355   : > { %2037 = vst.msk [vmem:[#allocation3 + $0x18] sm:$0xff] %vm399_vm2, %v2014_v29  ;;  %1986 = vst.msk [vmem:[#allocation2 + $0x30] sm:$0xff] %vm399_vm2, %v1970_v26  ;;  %v1971_v33 = vadd.f32 %v1955_v28, %v1939_v31 }
 0x356   : > { %1984 = vst.msk [vmem:[#allocation2 + $0x20] sm:$0xff] %vm399_vm2, %v1968_v30  ;;  %v1969_v35 = vadd.f32 %v1953_v32, %v1937_v46  ;;  %v8463_v36 = vpop.f32.mrb[40].mxu0  ;;  %v1944_v32 = vld [vmem:[#allocation2 + $0x60] sm:$0xff] }
 0x357   : > { %1987 = vst.msk [vmem:[#allocation2 + $0x38] sm:$0xff] %vm399_vm2, %v1971_v33  ;;  %v1999_v37 = vpack.c.bf16 %v1971_v33, %v1970_v26  ;;  %v9259_v21 = vadd.f32 %v8463_v36, %v10230_v56  ;;  %v1885_v38 = vpop.f32.mrb[41].mxu0  ;;  %v7495_v55 = vld [vmem:[#allocation2 + $0x3] sm:$0xff]  ;;  %v7496_v57 = vld [vmem:[#allocation2 + $0xb] sm:$0xff]  ;;  %v1947_v33 = vld [vmem:[#allocation2 + $0x78] sm:$0xff] }
 0x358   : > { %1985 = vst.msk [vmem:[#allocation2 + $0x28] sm:$0xff] %vm399_vm2, %v1969_v35  ;;  %v1998_v39 = vpack.c.bf16 %v1969_v35, %v1968_v30  ;;  %v9260_v47 = vadd.f32 %v10230_v56, %v1885_v38  ;;  %v8464_v13 = vpop.f32.mrb[42].mxu0  ;;  %v7511_v9 = vsel %vm399_vm2, %v7495_v55, 0.0  ;;  %v7512_v10 = vsel %vm399_vm2, %v7496_v57, 0.0 }
 0x359   : > { %v10253_v40 = vrot.slane %v1999_v37, 4  ;;  %v1958_v50 = vmax.f32 %v9259_v21, 0.0  ;;  %v9261_v51 = vadd.f32 %v8464_v13, %v10230_v56  ;;  %v1888_v41 = vpop.f32.mrb[43].mxu0  ;;  %v7513_v35 = vadd.f32 %v7512_v10, %v7511_v9  ;;  %v7497_v9 = vld [vmem:[#allocation2 + $0x13] sm:$0xff] }
 0x35a   : > { %v2015_v52 = vrot.slane %v1998_v39, 4  ;;  %v1956_v53 = vmax.f32 %v9260_v47, 0.0  ;;  %v9262_v54 = vadd.f32 %v10230_v56, %v1888_v41 }
 0x35b   : > { %v1974_v58 = vadd.f32 %v1958_v50, %v1942_v48  ;;  %v1959_v59 = vmax.f32 %v9261_v51, 0.0  ;;  %v2047_v60 = vld [vmem:[#allocation3 + $0x10] sm:$0xe0]  ;;  %v1945_v50 = vld [vmem:[#allocation2 + $0x68] sm:$0xff] }
 0x35c   : > { %v2016_v61 = vsel %vm689_vm5, %v2013_v17, %v2015_v52  ;;  %v2018_v62 = vsel %vm689_vm5, %v2015_v52, %v10253_v40  ;;  %v1972_v63 = vadd.f32 %v1956_v53, %v1940_v49  ;;  %v1957_v1 = vmax.f32 %v9262_v54, 0.0  ;;  %v10260_v2 = vld [vmem:[#allocation3 + $0x18] sm:$0xff] }
 0x35d   : > { %2038 = vst.msk [vmem:[#allocation3 + $0x20] sm:$0xff] %vm399_vm2, %v2016_v61  ;;  %2039 = vst.msk [vmem:[#allocation3 + $0x28] sm:$0xff] %vm399_vm2, %v2018_v62  ;;  %v1975_v34 = vadd.f32 %v1959_v59, %v1943_v0  ;;  %v2053_v42 = vshrl.u32 %v2047_v60, 16  ;;  %v2056_v4 = vshll.u32 %v2047_v60, 16  ;;  %v10266_v6 = vshrl.u32 %v10260_v2, 16 }
 0x35e   : > { %1990 = vst.msk [vmem:[#allocation2 + $0x50] sm:$0xff] %vm399_vm2, %v1974_v58  ;;  %1988 = vst.msk [vmem:[#allocation2 + $0x40] sm:$0xff] %vm399_vm2, %v1972_v63  ;;  %v1973_v7 = vadd.f32 %v1957_v1, %v1941_v3  ;;  %v8467_v8 = vpop.f32.mrb[44].mxu0  ;;  %v10270_v43 = vshll.u32 %v10260_v2, 16 }
 0x35f   : > { %1991 = vst.msk [vmem:[#allocation2 + $0x58] sm:$0xff] %vm399_vm2, %v1975_v34  ;;  %v2001_v11 = vpack.c.bf16 %v1975_v34, %v1974_v58  ;;  %v9263_v12 = vadd.f32 %v8467_v8, %v10230_v56  ;;  %v1901_v44 = vpop.f32.mrb[45].mxu0  ;;  %v2055_v45 = vrot.slane %v2053_v42, 5  ;;  %v2058_v14 = vrot.slane %v2056_v4, 6 }
 0x360   : > { %1989 = vst.msk [vmem:[#allocation2 + $0x48] sm:$0xff] %vm399_vm2, %v1973_v7  ;;  %v2000_v15 = vpack.c.bf16 %v1973_v7, %v1972_v63  ;;  %v9264_v16 = vadd.f32 %v10230_v56, %v1901_v44  ;;  %v8468_v17 = vpop.f32.mrb[46].mxu0  ;;  %v2063_v5 = vrot.slane %v10266_v6, 5  ;;  %v2066_v18 = vrot.slane %v10270_v43, 6 }
 0x361   : > { %v10280_v19 = vrot.slane %v2001_v11, 4  ;;  %v1962_v22 = vmax.f32 %v9263_v12, 0.0  ;;  %v9265_v23 = vadd.f32 %v8468_v17, %v10230_v56  ;;  %v1904_v24 = vpop.f32.mrb[47].mxu0  ;;  %v2059_v25 = vor.u32 %v2058_v14, %v2055_v45  ;;  %v7498_v12 = vld [vmem:[#allocation2 + $0x1b] sm:$0xff] }
 0x362   : > { %v2019_v26 = vrot.slane %v2000_v15, 4  ;;  %v1960_v28 = vmax.f32 %v9264_v16, 0.0  ;;  %v9266_v29 = vadd.f32 %v10230_v56, %v1904_v24  ;;  %v2067_v30 = vor.u32 %v2066_v18, %v2063_v5  ;;  %v7499_v24 = vld [vmem:[#allocation2 + $0x23] sm:$0xff] }
 0x363   : > { %v1978_v31 = vadd.f32 %v1962_v22, %v1946_v27  ;;  %v1963_v46 = vmax.f32 %v9265_v23, 0.0 }
 0x364   : > { %v10284_v36 = vld [vmem:[#allocation3 + $0x20] sm:$0xff]  ;;  %v10286_v37 = vld [vmem:[#allocation3 + $0x28] sm:$0xff]  ;;  %v2020_v21 = vsel %vm689_vm5, %v10253_v40, %v2019_v26  ;;  %v2022_v38 = vsel %vm689_vm5, %v2019_v26, %v10280_v19  ;;  %v1976_v39 = vadd.f32 %v1960_v28, %v1944_v32  ;;  %v1961_v47 = vmax.f32 %v9266_v29, 0.0 }
 0x365   : > { %v4465_v13 = vld [vmem:[#allocation3 + $0x20] sm:$0xc0]  ;;  %2040 = vst.msk [vmem:[#allocation3 + $0x30] sm:$0xff] %vm399_vm2, %v2020_v21  ;;  %2041 = vst.msk [vmem:[#allocation3 + $0x38] sm:$0xff] %vm399_vm2, %v2022_v38  ;;  %v1979_v56 = vadd.f32 %v1963_v46, %v1947_v33  ;;  %v2068_v51 = vsel %vm2051_vm10, %v2059_v25, %v2067_v30  ;;  %v10297_v41 = vshrl.u32 %v10284_v36, 16  ;;  %v10300_v40 = vshll.u32 %v10284_v36, 16 }
 0x366   : > { %1994 = vst.msk [vmem:[#allocation2 + $0x70] sm:$0xff] %vm399_vm2, %v1978_v31  ;;  %1992 = vst.msk [vmem:[#allocation2 + $0x60] sm:$0xff] %vm399_vm2, %v1976_v39  ;;  %v1977_v52 = vadd.f32 %v1961_v47, %v1945_v50  ;;  %v2091_v48 = vsel %vm399_vm2, %v2068_v51, 0  ;;  %v10305_v49 = vshll.u32 %v10286_v37, 16  ;;  %v10308_v53 = vshrl.u32 %v10286_v37, 16  ;;  %v7500_v46 = vld [vmem:[#allocation2 + $0x2b] sm:$0xff] }
 0x367   : > { %v10310_v54 = vld [vmem:[#allocation3 + $0x28] sm:$0x3f]  ;;  %1995 = vst.msk [vmem:[#allocation2 + $0x78] sm:$0xff] %vm399_vm2, %v1979_v56  ;;  %v2003_v55 = vpack.c.bf16 %v1979_v56, %v1978_v31  ;;  %8470 = vmatpush3.bf16.xpose.msra.mxu0 %v2091_v48  ;;  %v2072_v57 = vrot.slane %v10297_v41, 5  ;;  %v2075_v58 = vrot.slane %v10300_v40, 6  ;;  %v4532_v59 = vshrl.u32 %v4465_v13, 16 }
 0x368   : > { %1993 = vst.msk [vmem:[#allocation2 + $0x68] sm:$0xff] %vm399_vm2, %v1977_v52  ;;  %v2002_v60 = vpack.c.bf16 %v1977_v52, %v1976_v39  ;;  %8471 = vmatprep.subr.bf16.mxu0 %v9757_v20  ;;  %v4535_v61 = vshll.u32 %v4465_v13, 16  ;;  %v4539_v62 = vrot.slane %v10308_v53, 6  ;;  %v4540_v63 = vrot.slane %v10305_v49, 7  ;;  %v7501_v47 = vld [vmem:[#allocation2 + $0x33] sm:$0xff]  ;;  %v7502_v13 = vld [vmem:[#allocation2 + $0x3b] sm:$0xff] }
 0x369   : > { %v2025_v0 = vrot.slane %v2003_v55, 4  ;;  %v10319_v1 = vor.u32 %v2075_v58, %v2072_v57  ;;  %v4534_v34 = vrot.slane %v4532_v59, 6  ;;  %v2079_v3 = vshrl.u32 %v10310_v54, 16  ;;  %v10363_v50 = vld [vmem:[#allocation3 + $0x10] sm:$0xc0]  ;;  %v7503_v57 = vld [vmem:[#allocation2 + $0x43] sm:$0xff] }
 0x36a   : > { %v2023_v42 = vrot.slane %v2002_v60, 4  ;;  %v4537_v4 = vrot.slane %v4535_v61, 7  ;;  %v10322_v7 = vor.u32 %v4540_v63, %v4539_v62  ;;  %v2082_v8 = vshll.u32 %v10310_v54, 16 }
 0x36b   : > { %2044 = vst.msk [vmem:[#allocation3 + $0x50] sm:$0xf] %vm402_vm3, %v2025_v0  ;;  %v2077_v10 = vsel %vm2051_vm10, %v2067_v30, %v10319_v1  ;;  %v2081_v11 = vrot.slane %v2079_v3, 5  ;;  %v7516_v26 = vsel %vm399_vm2, %v7498_v12, 0.0  ;;  %v7518_v21 = vsel %vm399_vm2, %v7499_v24, 0.0 }
 0x36c   : > { %v10328_v44 = vld [vmem:[#allocation3 + $0x30] sm:$0xff]  ;;  %v2024_v45 = vsel %vm689_vm5, %v10280_v19, %v2023_v42  ;;  %v2026_v14 = vsel %vm689_vm5, %v2023_v42, %v2025_v0  ;;  %v2094_v15 = vsel %vm399_vm2, %v2077_v10, 0  ;;  %v4538_v16 = vor.u32 %v4537_v4, %v4534_v34  ;;  %v10342_v22 = vld [vmem:[#allocation3 + $0x38] sm:$0x7f] }
 0x36d   : > { %2042 = vst.msk [vmem:[#allocation3 + $0x40] sm:$0xff] %vm399_vm2, %v2024_v45  ;;  %2043 = vst.msk [vmem:[#allocation3 + $0x48] sm:$0xff] %vm399_vm2, %v2026_v14  ;;  %v2084_v17 = vrot.slane %v2082_v8, 6  ;;  %v10337_v5 = vshll.u32 %v10328_v44, 16  ;;  %v10340_v18 = vshrl.u32 %v10328_v44, 16  ;;  %v7514_v19 = vsel %vm399_vm2, %v7497_v9, 0.0 }
 0x36e   : > { %v4542_v23 = vsel %vm2210_vm11, %v4538_v16, %v10322_v7  ;;  %v7515_v25 = vadd.f32 %v7514_v19, %v7513_v35  ;;  %v4548_v31 = vshrl.u32 %v10342_v22, 16  ;;  %v4551_v32 = vshll.u32 %v10342_v22, 16  ;;  %v7504_v42 = vld [vmem:[#allocation2 + $0x4b] sm:$0xff]  ;;  %v2046_v8 = vld [vmem:[%s12078_s7] sm:$0x1]  ;;  %v7505_v10 = vld [vmem:[#allocation2 + $0x53] sm:$0xff] }
 0x36f   : > { %8472 = vmatpush3.bf16.xpose.msra.mxu0 %v2094_v15  ;;  %v4560_v27 = vsel %vm399_vm2, %v4542_v23, 0  ;;  %v2085_v28 = vor.u32 %v2084_v17, %v2081_v11  ;;  %v4543_v29 = vrot.slane %v10340_v18, 6  ;;  %v4544_v30 = vrot.slane %v10337_v5, 7  ;;  %v7506_v11 = vld [vmem:[#allocation2 + $0x5b] sm:$0xff]  ;;  %v10381_v14 = vld [vmem:[#allocation3 + $0x20] sm:$0x80] }
 0x370   : > { %8810 = vmatpush3.bf16.xpose.msra.mxu1 %v4560_v27  ;;  %8473 = vmatprep.subr.bf16.mxu0 %v9757_v20  ;;  %v7517_v35 = vadd.f32 %v7516_v26, %v7515_v25  ;;  %v4550_v51 = vrot.slane %v4548_v31, 6  ;;  %v4553_v52 = vrot.slane %v4551_v32, 7  ;;  %v7520_v48 = vsel %vm399_vm2, %v7500_v46, 0.0  ;;  %v7507_v16 = vld [vmem:[#allocation2 + $0x63] sm:$0xff]  ;;  %v7508_v31 = vld [vmem:[#allocation2 + $0x6b] sm:$0xff] }
 0x371   : > { %8811 = vmatprep.subr.bf16.mxu1 %v9757_v20  ;;  %v10355_v33 = vor.u32 %v4544_v30, %v4543_v29  ;;  %v2086_v38 = vsel %vm2051_vm10, %v10319_v1, %v2085_v28  ;;  %v7522_v60 = vsel %vm399_vm2, %v7501_v47, 0.0  ;;  %v7524_v61 = vsel %vm399_vm2, %v7502_v13, 0.0  ;;  %v7510_v13 = vld [vmem:[#allocation2 + $0x7b] sm:$0x3] }
 0x372   : > { %v7519_v56 = vadd.f32 %v7518_v21, %v7517_v35  ;;  %v2097_v59 = vsel %vm399_vm2, %v2086_v38, 0  ;;  %v2147_v62 = vrot.slane %v10363_v50, 6  ;;  %v2148_v63 = vrot.slane %v10260_v2, 6  ;;  %v7509_v21 = vld [vmem:[#allocation2 + $0x73] sm:$0xff] }
 0x373   : > { %v4546_v39 = vsel %vm2210_vm11, %v10322_v7, %v10355_v33  ;;  %v4554_v34 = vor.u32 %v4553_v52, %v4550_v51  ;;  %v7526_v3 = vsel %vm399_vm2, %v7503_v57, 0.0  ;;  %v7528_v15 = vsel %vm399_vm2, %v7504_v42, 0.0 }
 0x374   : > { %v4563_v55 = vsel %vm399_vm2, %v4546_v39, 0  ;;  %v7521_v58 = vadd.f32 %v7520_v48, %v7519_v56  ;;  %v2149_v9 = vsel %vm540_vm1, %v2147_v62, %v2148_v63  ;;  %v2150_v23 = vrot.slane %v10284_v36, 6  ;;  %v7860_v39 = vld [vmem:[%s12078_s7 + $0x22] sm:$0x1] }
 0x375   : > { %v4555_v45 = vsel %vm2210_vm11, %v10355_v33, %v4554_v34  ;;  %v2158_v19 = vsel %vm399_vm2, %v2149_v9, 0  ;;  %v7530_v24 = vsel %vm399_vm2, %v7505_v10, 0.0  ;;  %v7532_v25 = vsel %vm399_vm2, %v7506_v11, 0.0 }
 0x376   : > { %v7523_v0 = vadd.f32 %v7522_v60, %v7521_v58  ;;  %v4566_v26 = vsel %vm399_vm2, %v4555_v45, 0  ;;  %v4614_v27 = vrot.slane %v10381_v14, 7  ;;  %v4615_v28 = vrot.slane %v10286_v37, 7 }
 0x377   : > { %8474 = vmatpush3.bf16.xpose.msra.mxu0 %v2097_v59  ;;  %v7534_v30 = vsel %vm399_vm2, %v7507_v16, 0.0  ;;  %v2151_v46 = vsel %vm540_vm1, %v2148_v63, %v2150_v23  ;;  %v7536_v47 = vsel %vm399_vm2, %v7508_v31, 0.0  ;;  %v7538_v48 = vsel %vm399_vm2, %v7509_v21, 0.0  ;;  %v7550_v31 = vld [vmem:[%s12079_s8] sm:$0x1] }
 0x378   : > { %8812 = vmatpush3.bf16.xpose.msra.mxu1 %v4563_v55  ;;  %8479 = vmatprep.subr.bf16.mxu0 %v9757_v20  ;;  %v7525_v4 = vadd.f32 %v7524_v61, %v7523_v0  ;;  %v4616_v35 = vsel %vm2294_vm12, %v4614_v27, %v4615_v28  ;;  %v2161_v51 = vsel %vm399_vm2, %v2151_v46, 0  ;;  %v2152_v55 = vrot.slane %v10310_v54, 6 }
 0x379   : > { %8813 = vmatprep.subr.bf16.mxu1 %v9757_v20  ;;  %v4625_v52 = vsel %vm399_vm2, %v4616_v35, 0  ;;  %v2212_v58 = vshrl.u32 %v10363_v50, 16  ;;  %v2215_v59 = vshll.u32 %v10363_v50, 16  ;;  %v2363_v60 = vrot.slane %v10266_v6, 7 }
 0x37a   : > { %v7527_v12 = vadd.f32 %v7526_v3, %v7525_v4  ;;  %v7541_v61 = vsel %vm7540_vm13, %v7510_v13, 0.0  ;;  %v4617_v62 = vrot.slane %v10328_v44, 7  ;;  %v2219_v50 = vrot.slane %v10266_v6, 6 }
 0x37b   : > { %v10419_v54 = vor.u32 %v2363_v60, %v10270_v43  ;;  %v2220_v0 = vrot.slane %v10270_v43, 7  ;;  %v2153_v3 = vsel %vm540_vm1, %v2150_v23, %v2152_v55  ;;  %v2214_v42 = vrot.slane %v2212_v58, 6 }
 0x37c   : > { %v7529_v17 = vadd.f32 %v7528_v15, %v7527_v12  ;;  %v2217_v4 = vrot.slane %v2215_v59, 7  ;;  %v2164_v10 = vsel %vm399_vm2, %v2153_v3, 0  ;;  %v4619_v11 = vrot.slane %v10342_v22, 7  ;;  %v7794_v22 = vld [vmem:[%s12078_s7 + $0x1] sm:$0x1] }
 0x37d   : > { %v2221_v16 = vor.u32 %v2220_v0, %v2219_v50  ;;  %v2224_v27 = vrot.slane %v10300_v40, 7  ;;  %v4678_v35 = vshrl.u32 %v10381_v14, 16  ;;  %v4684_v59 = vrot.slane %v10340_v18, 7 }
 0x37e   : > { %8476 = vmatmul.mubr.msk.bf16.vlgmr.msra.gmra.mrb[48].mxu0 %vm399_vm2, %v2046_v8  ;;  %v7531_v29 = vadd.f32 %v7530_v24, %v7529_v17  ;;  %v4618_v8 = vsel %vm2294_vm12, %v4615_v28, %v4617_v62  ;;  %v2218_v15 = vor.u32 %v2217_v4, %v2214_v42  ;;  %v4620_v23 = vsel %vm2294_vm12, %v4617_v62, %v4619_v11  ;;  %v2291_v4 = vld [vmem:[#allocation3 + $0x10] sm:$0x80] }
 0x37f   : > { %8480 = vmatpush3.bf16.xpose.msra.mxu0 %v2158_v19  ;;  %8485 = vmatprep.mubr.msk.bf16.mxu0 %vm9758_vm9, %v9757_v20  ;;  %v4628_v45 = vsel %vm399_vm2, %v4618_v8, 0  ;;  %v2494_v19 = vrot.slane %v10270_v43, 1  ;;  %v10439_v28 = vrot.slane %v10308_v53, 7  ;;  %v4631_v46 = vsel %vm399_vm2, %v4620_v23, 0 }
 0x380   : > { %8814 = vmatpush3.bf16.xpose.msra.mxu1 %v4566_v26  ;;  %8481 = vmatprep.subr.bf16.mxu0 %v9757_v20  ;;  %v7533_v32 = vadd.f32 %v7532_v25, %v7531_v29  ;;  %v2222_v25 = vsel %vm2210_vm11, %v2218_v15, %v2221_v16  ;;  %v2223_v26 = vrot.slane %v10297_v41, 6  ;;  %v10441_v29 = vld [vmem:[#allocation3 + $0x28] sm:$0x7f]  ;;  %v10480_v0 = vor.u32 %v4684_v59, %v10337_v5 }
 0x381   : > { %8819 = vmatprep.subr.bf16.mxu1 %v9757_v20  ;;  %v10444_v43 = vor.u32 %v2494_v19, %v10266_v6  ;;  %v10462_v13 = vor.u32 %v10439_v28, %v10305_v49  ;;  %vm2577_vm3 = vcmask 1046528   ;;  %vm7558_vm13 = vcmask 0  }
 0x382   : > { %v7535_v38 = vadd.f32 %v7534_v30, %v7533_v32  ;;  %v2240_v32 = vsel %vm399_vm2, %v2222_v25, 0  ;;  %v4686_v42 = vsel %vm2358_vm15, %v10439_v28, %v10480_v0 }
 0x383   : > { %v4702_v11 = vsel %vm399_vm2, %v4686_v42, 0 }
 0x384   : > { %v7537_v56 = vadd.f32 %v7536_v47, %v7535_v38  ;;  %v10453_v38 = vor.u32 %v2224_v27, %v2223_v26  ;;  %v2231_v47 = vshll.u32 %v10441_v29, 16  ;;  %v7864_v26 = vld [vmem:[%s12078_s7 + $0x24] sm:$0x1] }
 0x386   : > { %v7539_v57 = vadd.f32 %v7538_v48, %v7537_v56  ;;  %v4680_v56 = vrot.slane %v4678_v35, 7  ;;  %v2233_v55 = vrot.slane %v2231_v47, 7 }
 0x387   : > { %8482 = vmatpush3.bf16.xpose.msra.mxu0 %v2161_v51  ;;  %8816 = vmatmul.mubr.msk.bf16.vlgmr.msra.gmra.mrb[16].mxu1 %vm399_vm2, %v7860_v39  ;;  %v2228_v39 = vshrl.u32 %v10441_v29, 16 }
 0x388   : > { %8820 = vmatpush3.bf16.xpose.msra.mxu1 %v4625_v52  ;;  %8483 = vmatprep.subr.bf16.mxu0 %v9757_v20  ;;  %v7542_v63 = vadd.f32 %v7541_v61, %v7539_v57  ;;  %v2226_v52 = vsel %vm2210_vm11, %v2221_v16, %v10453_v38  ;;  %v7862_v57 = vld [vmem:[%s12078_s7 + $0x23] sm:$0x1]  ;;  %v4683_v58 = vsel %vm2358_vm15, %v4680_v56, %v10462_v13  ;;  %v10473_v61 = vld [vmem:[#allocation3 + $0x38] sm:$0xff]  ;;  %v7796_v16 = vld [vmem:[%s12078_s7 + $0x2] sm:$0x1] }
 0x389   : > { %8821 = vmatprep.subr.bf16.mxu1 %v9757_v20  ;;  %8825 = vmatprep.mubr.msk.bf16.mxu1 %vm9758_vm9, %v9757_v20  ;;  %v2230_v48 = vrot.slane %v2228_v39, 6  ;;  %v2243_v62 = vsel %vm399_vm2, %v2226_v52, 0  ;;  %v7798_v39 = vld [vmem:[%s12078_s7 + $0x3] sm:$0x1]  ;;  %v4757_v52 = vsel %vm399_vm2, %v10473_v61, 0 }
 0x38a   : > { %v7543_v34 = vrot.slane %v7542_v63, 4 }
 0x38b   : > { %v2234_v50 = vor.u32 %v2233_v55, %v2230_v48 }
 0x38c   : > { %v7544_v9 = vadd.f32 %v7543_v34, %v7542_v63  ;;  %v4699_v63 = vsel %vm399_vm2, %v4683_v58, 0  ;;  %v10483_v34 = vshrl.u32 %v10473_v61, 16  ;;  %v7866_v58 = vld [vmem:[%s12078_s7 + $0x25] sm:$0x1] }
 0x38d   : > { %v2235_v3 = vsel %vm2210_vm11, %v10453_v38, %v2234_v50 }
 0x38e   : > { %v7545_v12 = vrot.slane %v7544_v9, 2  ;;  %v4690_v8 = vrot.slane %v10483_v34, 7 }
 0x38f   : > { %8484 = vmatpush3.bf16.xpose.msra.mxu0 %v2164_v10  ;;  %v10496_v10 = vshll.u32 %v10473_v61, 16 }
 0x390   : > { %8822 = vmatpush3.bf16.xpose.msra.mxu1 %v4628_v45  ;;  %8489 = vmatprep.subr.bf16.mxu0 %v9757_v20  ;;  %v7546_v17 = vadd.f32 %v7545_v12, %v7544_v9  ;;  %v2246_v9 = vsel %vm399_vm2, %v2235_v3, 0  ;;  %v2295_v12 = vrot.slane %v2291_v4, 7  ;;  %v2296_v45 = vrot.slane %v10260_v2, 7 }
 0x391   : > { %8823 = vmatprep.subr.bf16.mxu1 %v9757_v20  ;;  %v4693_v15 = vor.u32 %v10496_v10, %v4690_v8  ;;  %v4824_v50 = vrot.slane %v10496_v10, 1 }
 0x392   : > { %v7547_v24 = vrot.slane %v7546_v17, 1 }
 0x393   : > { %v4694_v19 = vsel %vm2358_vm15, %v4684_v59, %v4693_v15 }
 0x394   : > { %v7548_v30 = vadd.f32 %v7547_v24, %v7546_v17  ;;  %v2297_v17 = vsel %vm2294_vm12, %v2295_v12, %v2296_v45  ;;  %v10513_v24 = vsel %vm399_vm2, %v4694_v19, 0  ;;  %v4889_v19 = vld [vmem:[#allocation3 + $0x28] sm:$0xfe] }
 0x395   : > { %v2306_v23 = vsel %vm399_vm2, %v2297_v17, 0 }
 0x396   : > { %8486 = vmatmul.mubr.msk.bf16.vlgmr.msra.gmra.mrb[48].mxu0 %vm399_vm2, %v7794_v22  ;;  %v7549_v21 = vmul.f32 0.008196721, %v7548_v30  ;;  %v2298_v22 = vrot.slane %v10284_v36, 7  ;;  %v10529_v30 = vsel %vm399_vm2, %v10286_v37, 0 }
 0x397   : > { %8490 = vmatpush3.bf16.xpose.msra.mxu0 %v2240_v32  ;;  %8495 = vmatprep.mubr.msk.bf16.mxu0 %vm9758_vm9, %v9757_v20 }
 0x398   : > { %8824 = vmatpush3.bf16.xpose.msra.mxu1 %v4631_v46  ;;  %8491 = vmatprep.subr.bf16.mxu0 %v9757_v20  ;;  %v7551_v14 = vmul.f32 %v7550_v31, %v7549_v21  ;;  %v2299_v25 = vsel %vm2294_vm12, %v2296_v45, %v2298_v22  ;;  %v2300_v31 = vrot.slane %v10441_v29, 7  ;;  %v2360_v46 = vshrl.u32 %v2291_v4, 16 }
 0x399   : > { %8829 = vmatprep.subr.bf16.mxu1 %v9757_v20  ;;  %v2309_v27 = vsel %vm399_vm2, %v2299_v25, 0  ;;  %v4755_v21 = vsel %vm399_vm2, %v10328_v44, 0  ;;  %v4828_v45 = vor.u32 %v4824_v50, %v10483_v34 }
 0x39a   : > { %v7553_v51 = vsel %vm7552_vm14, %v7551_v14, 0.0  ;;  %v2301_v32 = vsel %vm2294_vm12, %v2298_v22, %v2300_v31  ;;  %v2362_v29 = vrot.slane %v2360_v46, 7  ;;  %v2366_v14 = vrot.slane %v10297_v41, 7 }
 0x39b   : > { %7554 = vadd.xlane.f32.xlu0 %v7553_v51  ;;  %v2312_v35 = vsel %vm399_vm2, %v2301_v32, 0  ;;  %v10552_v51 = vrot.slane %v10305_v49, 1  ;;  %v4894_v22 = vrot.slane %v4889_v19, 1  ;;  %v4897_v31 = vrot.slane %v10473_v61, 1 }
 0x39c   : > { %v2365_v47 = vsel %vm2358_vm15, %v2362_v29, %v10419_v54  ;;  %v10557_v48 = vor.u32 %v2366_v14, %v10300_v40  ;;  %v4816_v54 = vrot.slane %v10337_v5, 1  ;;  %v2376_v3 = vsel %vm2358_vm15, %v2366_v14, %v10462_v13  ;;  %v7800_v13 = vld [vmem:[%s12078_s7 + $0x4] sm:$0x1] }
 0x39d   : > { %v2381_v56 = vsel %vm399_vm2, %v2365_v47, 0  ;;  %v10566_v55 = vor.u32 %v10552_v51, %v10308_v53  ;;  %v4958_v29 = vshrl.u32 %v4889_v19, 16  ;;  %v7802_v47 = vld [vmem:[%s12078_s7 + $0x5] sm:$0x1]  ;;  %vm2788_vm14 = vsmask.f32 5376 }
 0x39e   : > { %v10585_v6 = vor.u32 %v4816_v54, %v10340_v18 }
 0x39f   : > { %8492 = vmatpush3.bf16.xpose.msra.mxu0 %v2243_v62  ;;  %8826 = vmatmul.mubr.msk.bf16.vlgmr.msra.gmra.mrb[16].mxu1 %vm399_vm2, %v7862_v57  ;;  %v2368_v57 = vsel %vm2358_vm15, %v2363_v60, %v10557_v48  ;;  %v4817_v59 = vsel %vm2488_vm0, %v10566_v55, %v4816_v54  ;;  %v4805_v60 = vld [vmem:[#allocation3 + $0x40] sm:$0x1] }
 0x3a0   : > { %8830 = vmatpush3.bf16.xpose.msra.mxu1 %v4699_v63  ;;  %8493 = vmatprep.subr.bf16.mxu0 %v9757_v20  ;;  %v2384_v62 = vsel %vm399_vm2, %v2368_v57, 0  ;;  %v10580_v63 = vsel %vm399_vm2, %v4817_v59, 0  ;;  %v4825_v42 = vsel %vm2488_vm0, %v10585_v6, %v4824_v50  ;;  %v4830_v4 = vshll.u32 %v4805_v60, 16 }
 0x3a1   : > { %8831 = vmatprep.subr.bf16.mxu1 %v9757_v20  ;;  %8835 = vmatprep.mubr.msk.bf16.mxu1 %vm9758_vm9, %v9757_v20  ;;  %v4960_v57 = vrot.slane %v4958_v29, 1  ;;  %v7804_v29 = vld [vmem:[%s12078_s7 + $0x6] sm:$0x1] }
 0x3a2   : > { %v4832_v12 = vrot.slane %v4830_v4, 1  ;;  %v7870_v4 = vld [vmem:[%s12078_s7 + $0x27] sm:$0x1] }
 0x3a4   : > { %v4833_v15 = vsel %vm2488_vm0, %v4828_v45, %v4832_v12  ;;  %v4969_v12 = vrot.slane %v10483_v34, 1  ;;  %v4970_v45 = vrot.slane %v10496_v10, 2 }
 0x3a5   : > { %v4844_v17 = vsel %vm399_vm2, %v4833_v15, 0 }
 0x3a7   : > { %8494 = vmatpush3.bf16.xpose.msra.mxu0 %v2246_v9  ;;  %v10596_v9 = vsel %vm399_vm2, %v2376_v3, 0 }
 0x3a8   : > { %8832 = vmatpush3.bf16.xpose.msra.mxu1 %v4702_v11  ;;  %8499 = vmatprep.subr.bf16.mxu0 %v9757_v20  ;;  %v4841_v11 = vsel %vm399_vm2, %v4825_v42, 0 }
 0x3a9   : > { %8833 = vmatprep.subr.bf16.mxu1 %v9757_v20 }
 0x3ae   : > { %8496 = vmatmul.mubr.msk.bf16.vlgmr.msra.gmra.mrb[48].mxu0 %vm399_vm2, %v7796_v16  ;;  %v2435_v16 = vsel %vm399_vm2, %v10260_v2, 0  ;;  %v7868_v2 = vld [vmem:[%s12078_s7 + $0x26] sm:$0x1] }
 0x3af   : > { %8500 = vmatpush3.bf16.xpose.msra.mxu0 %v2306_v23  ;;  %8505 = vmatprep.mubr.msk.bf16.mxu0 %vm9758_vm9, %v9757_v20  ;;  %v4895_v23 = vrot.slane %v10328_v44, 1 }
 0x3b0   : > { %8834 = vmatpush3.bf16.xpose.msra.mxu1 %v10513_v24  ;;  %8501 = vmatprep.subr.bf16.mxu0 %v9757_v20 }
 0x3b1   : > { %8839 = vmatprep.subr.bf16.mxu1 %v9757_v20  ;;  %v4896_v25 = vsel %vm2577_vm3, %v4894_v22, %v4895_v23  ;;  %v4898_v32 = vsel %vm2577_vm3, %v4895_v23, %v4897_v31 }
 0x3b2   : > { %v4908_v46 = vsel %vm399_vm2, %v4898_v32, 0  ;;  %v2572_v32 = vld [vmem:[#allocation3 + $0x18] sm:$0xfe] }
 0x3b7   : > { %8502 = vmatpush3.bf16.xpose.msra.mxu0 %v2309_v27  ;;  %8836 = vmatmul.mubr.msk.bf16.vlgmr.msra.gmra.mrb[16].mxu1 %vm399_vm2, %v7864_v26  ;;  %v2437_v26 = vsel %vm399_vm2, %v10284_v36, 0  ;;  %v4905_v27 = vsel %vm399_vm2, %v4896_v25, 0 }
 0x3b8   : > { %8840 = vmatpush3.bf16.xpose.msra.mxu1 %v10529_v30  ;;  %8503 = vmatprep.subr.bf16.mxu0 %v9757_v20 }
 0x3b9   : > { %8841 = vmatprep.subr.bf16.mxu1 %v9757_v20  ;;  %8845 = vmatprep.mubr.msk.bf16.mxu1 %vm9758_vm9, %v9757_v20 }
 0x3bf   : > { %8504 = vmatpush3.bf16.xpose.msra.mxu0 %v2312_v35  ;;  %v2499_v35 = vrot.slane %v10300_v40, 1 }
 0x3c0   : > { %8842 = vmatpush3.bf16.xpose.msra.mxu1 %v4755_v21  ;;  %8509 = vmatprep.subr.bf16.mxu0 %v9757_v20  ;;  %v4899_v21 = vrot.slane %v4805_v60, 1  ;;  %v10652_v60 = vld [vmem:[#allocation3 + $0x30] sm:$0x1] }
 0x3c1   : > { %8843 = vmatprep.subr.bf16.mxu1 %v9757_v20  ;;  %v2500_v14 = vsel %vm2488_vm0, %v10444_v43, %v2499_v35  ;;  %v2513_v42 = vshll.u32 %v10652_v60, 16 }
 0x3c2   : > { %v2521_v54 = vsel %vm399_vm2, %v2500_v14, 0 }
 0x3c6   : > { %8506 = vmatmul.mubr.msk.bf16.vlgmr.msra.gmra.mrb[48].mxu0 %vm399_vm2, %v7798_v39  ;;  %v4961_v39 = vshll.u32 %v4889_v19, 16  ;;  %v4971_v19 = vor.u32 %v4970_v45, %v4969_v12  ;;  %v2650_v45 = vrot.slane %v10297_v41, 1 }
 0x3c7   : > { %8510 = vmatpush3.bf16.xpose.msra.mxu0 %v2381_v56  ;;  %8515 = vmatprep.mubr.msk.bf16.mxu0 %vm9758_vm9, %v9757_v20  ;;  %v4965_v56 = vrot.slane %v10340_v18, 1 }
 0x3c8   : > { %8844 = vmatpush3.bf16.xpose.msra.mxu1 %v4757_v52  ;;  %8511 = vmatprep.subr.bf16.mxu0 %v9757_v20  ;;  %v4966_v52 = vrot.slane %v10337_v5, 2 }
 0x3c9   : > { %8849 = vmatprep.subr.bf16.mxu1 %v9757_v20 }
 0x3ca   : > { %v10650_v43 = vor.u32 %v4966_v52, %v4965_v56  ;;  %v2581_v56 = vrot.slane %v10286_v37, 1  ;;  %v5037_v52 = vld [vmem:[#allocation3 + $0x28] sm:$0xfc] }
 0x3cc   : > { %v4972_v25 = vsel %vm12083_vm4, %v10650_v43, %v4971_v19 }
 0x3cf   : > { %8512 = vmatpush3.bf16.xpose.msra.mxu0 %v2384_v62  ;;  %8846 = vmatmul.mubr.msk.bf16.vlgmr.msra.gmra.mrb[16].mxu1 %vm399_vm2, %v7866_v58  ;;  %v4963_v58 = vrot.slane %v4961_v39, 2  ;;  %v2503_v62 = vor.u32 %v2499_v35, %v10297_v41  ;;  %v2579_v35 = vrot.slane %v10284_v36, 1 }
 0x3d0   : > { %8850 = vmatpush3.bf16.xpose.msra.mxu1 %v10580_v63  ;;  %8513 = vmatprep.subr.bf16.mxu0 %v9757_v20 }
 0x3d1   : > { %8851 = vmatprep.subr.bf16.mxu1 %v9757_v20  ;;  %8855 = vmatprep.mubr.msk.bf16.mxu1 %vm9758_vm9, %v9757_v20  ;;  %v4964_v50 = vor.u32 %v4963_v58, %v4960_v57  ;;  %v2508_v3 = vsel %vm2488_vm0, %v2503_v62, %v10552_v51  ;;  %v5040_v57 = vrot.slane %v5037_v52, 2  ;;  %v2582_v58 = vsel %vm2577_vm3, %v2579_v35, %v2581_v56 }
 0x3d2   : > { %v2524_v15 = vsel %vm399_vm2, %v2508_v3, 0  ;;  %v2592_v62 = vsel %vm399_vm2, %v2582_v58, 0  ;;  %v2583_v3 = vrot.slane %v10652_v60, 1 }
 0x3d4   : > { %v2584_v12 = vsel %vm2577_vm3, %v2581_v56, %v2583_v3 }
 0x3d7   : > { %8514 = vmatpush3.bf16.xpose.msra.mxu0 %v10596_v9 }
 0x3d8   : > { %8852 = vmatpush3.bf16.xpose.msra.mxu1 %v4841_v11  ;;  %8519 = vmatprep.subr.bf16.mxu0 %v9757_v20  ;;  %v4968_v11 = vsel %vm12083_vm4, %v4964_v50, %v10650_v43 }
 0x3d9   : > { %8853 = vmatprep.subr.bf16.mxu1 %v9757_v20 }
 0x3de   : > { %8516 = vmatmul.mubr.msk.bf16.vlgmr.msra.gmra.mrb[48].mxu0 %vm399_vm2, %v7800_v13  ;;  %v10665_v13 = vld [vmem:[#allocation3 + $0x40] sm:$0x3] }
 0x3df   : > { %8520 = vmatpush3.bf16.xpose.msra.mxu0 %v2435_v16  ;;  %8525 = vmatprep.mubr.msk.bf16.mxu0 %vm9758_vm9, %v9757_v20  ;;  %v4986_v16 = vsel %vm399_vm2, %v4968_v11, 0  ;;  %v4974_v23 = vshrl.u32 %v10665_v13, 16  ;;  %v4977_v22 = vshll.u32 %v10665_v13, 16  ;;  %v2646_v11 = vshll.u32 %v2572_v32, 16 }
 0x3e0   : > { %8854 = vmatpush3.bf16.xpose.msra.mxu1 %v4844_v17  ;;  %8521 = vmatprep.subr.bf16.mxu0 %v9757_v20  ;;  %v2515_v17 = vrot.slane %v2513_v42, 1  ;;  %v5043_v42 = vrot.slane %v10473_v61, 2 }
 0x3e1   : > { %8859 = vmatprep.subr.bf16.mxu1 %v9757_v20 }
 0x3e7   : > { %8522 = vmatpush3.bf16.xpose.msra.mxu0 %v2437_v26  ;;  %8856 = vmatmul.mubr.msk.bf16.vlgmr.msra.gmra.mrb[16].mxu1 %vm399_vm2, %v7868_v2  ;;  %v2516_v2 = vsel %vm2488_vm0, %v10566_v55, %v2515_v17  ;;  %v4976_v26 = vrot.slane %v4974_v23, 1  ;;  %v2578_v55 = vrot.slane %v2572_v32, 1  ;;  %v2648_v17 = vrot.slane %v2646_v11, 2 }
 0x3e8   : > { %8860 = vmatpush3.bf16.xpose.msra.mxu1 %v4905_v27  ;;  %8523 = vmatprep.subr.bf16.mxu0 %v9757_v20  ;;  %v4979_v27 = vrot.slane %v4977_v22, 2 }
 0x3e9   : > { %8861 = vmatprep.subr.bf16.mxu1 %v9757_v20  ;;  %8865 = vmatprep.mubr.msk.bf16.mxu1 %vm9758_vm9, %v9757_v20  ;;  %v2580_v39 = vsel %vm2577_vm3, %v2578_v55, %v2579_v35  ;;  %v2655_v35 = vrot.slane %v10305_v49, 2  ;;  %v5112_v55 = vrot.slane %v10337_v5, 3 }
 0x3ea   : > { %v2589_v14 = vsel %vm399_vm2, %v2580_v39, 0 }
 0x3ef   : > { %8524 = vmatpush3.bf16.xpose.msra.mxu0 %v10529_v30  ;;  %v4900_v30 = vsel %vm2577_vm3, %v4897_v31, %v4899_v21  ;;  %v2527_v31 = vsel %vm399_vm2, %v2516_v2, 0  ;;  %v4980_v21 = vor.u32 %v4979_v27, %v4976_v26  ;;  %v5045_v2 = vrot.slane %v10665_v13, 2 }
 0x3f0   : > { %8862 = vmatpush3.bf16.xpose.msra.mxu1 %v4908_v46  ;;  %8529 = vmatprep.subr.bf16.mxu0 %v9757_v20  ;;  %v4911_v59 = vsel %vm399_vm2, %v4900_v30, 0  ;;  %v4989_v46 = vsel %vm399_vm2, %v4972_v25, 0  ;;  %v5104_v26 = vshrl.u32 %v5037_v52, 16  ;;  %v5107_v27 = vshll.u32 %v5037_v52, 16 }
 0x3f1   : > { %8863 = vmatprep.subr.bf16.mxu1 %v9757_v20  ;;  %v5046_v13 = vsel %vm1408_vm8, %v5043_v42, %v5045_v2 }
 0x3f2   : > { %v5057_v56 = vsel %vm399_vm2, %v5046_v13, 0 }
 0x3f6   : > { %8526 = vmatmul.mubr.msk.bf16.vlgmr.msra.gmra.mrb[48].mxu0 %vm399_vm2, %v7802_v47  ;;  %v4981_v47 = vsel %vm12083_vm4, %v4971_v19, %v4980_v21  ;;  %v2595_v19 = vsel %vm399_vm2, %v2584_v12, 0  ;;  %v5111_v21 = vrot.slane %v10340_v18, 2  ;;  %v5115_v12 = vrot.slane %v10483_v34, 2 }
 0x3f7   : > { %8530 = vmatpush3.bf16.xpose.msra.mxu0 %v2521_v54  ;;  %8535 = vmatprep.mubr.msk.bf16.mxu0 %vm9758_vm9, %v9757_v20  ;;  %v4992_v30 = vsel %vm399_vm2, %v4981_v47, 0  ;;  %v5041_v54 = vrot.slane %v10328_v44, 2  ;;  %v5106_v47 = vrot.slane %v5104_v26, 2 }
 0x3f8   : > { %8864 = vmatpush3.bf16.xpose.msra.mxu1 %v4911_v59  ;;  %8531 = vmatprep.subr.bf16.mxu0 %v9757_v20  ;;  %v7872_v59 = vld [vmem:[%s12078_s7 + $0x28] sm:$0x1]  ;;  %v10747_v58 = vor.u32 %v5112_v55, %v5111_v21 }
 0x3f9   : > { %8869 = vmatprep.subr.bf16.mxu1 %v9757_v20  ;;  %v5042_v37 = vsel %vm1408_vm8, %v5040_v57, %v5041_v54  ;;  %v5044_v60 = vsel %vm1408_vm8, %v5041_v54, %v5043_v42  ;;  %v7808_v55 = vld [vmem:[%s12078_s7 + $0x8] sm:$0x1] }
 0x3fa   : > { %v5051_v50 = vsel %vm399_vm2, %v5042_v37, 0  ;;  %v5054_v23 = vsel %vm399_vm2, %v5044_v60, 0 }
 0x3ff   : > { %8532 = vmatpush3.bf16.xpose.msra.mxu0 %v2524_v15  ;;  %8866 = vmatmul.mubr.msk.bf16.vlgmr.msra.gmra.mrb[16].mxu1 %vm399_vm2, %v7870_v4  ;;  %v2643_v4 = vshrl.u32 %v2572_v32, 16  ;;  %v2651_v15 = vrot.slane %v10300_v40, 2 }
 0x400   : > { %8870 = vmatpush3.bf16.xpose.msra.mxu1 %v4986_v16  ;;  %8533 = vmatprep.subr.bf16.mxu0 %v9757_v20 }
 0x401   : > { %8871 = vmatprep.subr.bf16.mxu1 %v9757_v20  ;;  %8875 = vmatprep.mubr.msk.bf16.mxu1 %vm9758_vm9, %v9757_v20  ;;  %v2645_v16 = vrot.slane %v2643_v4, 1  ;;  %v2652_v22 = vor.u32 %v2651_v15, %v2650_v45  ;;  %v7874_v4 = vld [vmem:[%s12078_s7 + $0x29] sm:$0x1]  ;;  %v5116_v45 = vrot.slane %v10496_v10, 3  ;;  %v10763_v15 = vld [vmem:[#allocation3 + $0x40] sm:$0x7] }
 0x403   : > { %v2649_v25 = vor.u32 %v2648_v17, %v2645_v16 }
 0x405   : > { %v2653_v32 = vsel %vm12083_vm4, %v2649_v25, %v2652_v22 }
 0x406   : > { %v2671_v39 = vsel %vm399_vm2, %v2653_v32, 0  ;;  %v2722_v32 = vld [vmem:[#allocation3 + $0x18] sm:$0xfc] }
 0x407   : > { %8534 = vmatpush3.bf16.xpose.msra.mxu0 %v2527_v31  ;;  %v7806_v31 = vld [vmem:[%s12078_s7 + $0x7] sm:$0x1]  ;;  %v2725_v21 = vrot.slane %v2722_v32, 2 }
 0x408   : > { %8872 = vmatpush3.bf16.xpose.msra.mxu1 %v4989_v46  ;;  %8539 = vmatprep.subr.bf16.mxu0 %v9757_v20  ;;  %v2654_v46 = vrot.slane %v10308_v53, 1 }
 0x409   : > { %8873 = vmatprep.subr.bf16.mxu1 %v9757_v20 }
 0x40a   : > { %v10740_v52 = vor.u32 %v2655_v35, %v2654_v46  ;;  %v2726_v35 = vrot.slane %v10284_v36, 2 }
 0x40e   : > { %8536 = vmatmul.mubr.msk.bf16.vlgmr.msra.gmra.mrb[48].mxu0 %vm399_vm2, %v7804_v29  ;;  %v10735_v29 = vld [vmem:[#allocation3 + $0x30] sm:$0x3] }
 0x40f   : > { %8540 = vmatpush3.bf16.xpose.msra.mxu0 %v2589_v14  ;;  %8545 = vmatprep.mubr.msk.bf16.mxu0 %vm9758_vm9, %v9757_v20  ;;  %v5109_v14 = vrot.slane %v5107_v27, 3  ;;  %v2659_v54 = vshrl.u32 %v10735_v29, 16  ;;  %v2662_v57 = vshll.u32 %v10735_v29, 16 }
 0x410   : > { %8874 = vmatpush3.bf16.xpose.msra.mxu1 %v4992_v30  ;;  %8541 = vmatprep.subr.bf16.mxu0 %v9757_v20  ;;  %v7556_v30 = vld [vmem:[%s394_s21] sm:$0x1]  ;;  %s7943_s21 = sshll.u32 %s9836_s17, 5  ;;  %s7561_s17 = scalar_lea.sflag [#allocation5], %s375_s30 }
 0x411   : > { %8879 = vmatprep.subr.bf16.mxu1 %v9757_v20  ;;  %v2661_v3 = vrot.slane %v2659_v54, 1  ;;  %v2664_v42 = vrot.slane %v2662_v57, 2  ;;  %v5183_v54 = vld [vmem:[#allocation3 + $0x28] sm:$0xf8]  ;;  %v5187_v57 = vrot.slane %v10328_v44, 3  ;;  %v2730_v44 = vrot.slane %v10735_v29, 2  ;;  %s12029_s2 = scalar_lea.hbm %s12080_s9, %s7943_s21 }
 0x413   : > { %v2665_v17 = vor.u32 %v2664_v42, %v2661_v3 }
 0x415   : > { %v2666_v2 = vsel %vm12083_vm4, %v10740_v52, %v2665_v17 }
 0x417   : > { %8542 = vmatpush3.bf16.xpose.msra.mxu0 %v2592_v62  ;;  %8876 = vmatmul.mubr.msk.bf16.vlgmr.msra.gmra.mrb[16].mxu1 %vm399_vm2, %v7872_v59  ;;  %v5110_v62 = vor.u32 %v5109_v14, %v5106_v47 }
 0x418   : > { %8880 = vmatpush3.bf16.xpose.msra.mxu1 %v5051_v50  ;;  %8543 = vmatprep.subr.bf16.mxu0 %v9757_v20  ;;  %v2657_v50 = vsel %vm12083_vm4, %v2652_v22, %v10740_v52  ;;  %v5123_v22 = vshll.u32 %v10763_v15, 16 }
 0x419   : > { %8881 = vmatprep.subr.bf16.mxu1 %v9757_v20  ;;  %8885 = vmatprep.mubr.msk.bf16.mxu1 %vm9758_vm9, %v9757_v20  ;;  %v5114_v11 = vsel %vm2788_vm14, %v5110_v62, %v10747_v58  ;;  %v2674_v60 = vsel %vm399_vm2, %v2657_v50, 0  ;;  %v7876_v62 = vld [vmem:[%s12078_s7 + $0x2a] sm:$0x1] }
 0x41a   : > { %v5132_v16 = vsel %vm399_vm2, %v5114_v11, 0  ;;  %v5125_v27 = vrot.slane %v5123_v22, 3  ;;  %v2790_v11 = vshrl.u32 %v2722_v32, 16 }
 0x41c   : > { %v2792_v17 = vrot.slane %v2790_v11, 2  ;;  %v5261_v11 = vrot.slane %v10483_v34, 3 }
 0x41f   : > { %8544 = vmatpush3.bf16.xpose.msra.mxu0 %v2595_v19  ;;  %v5117_v19 = vor.u32 %v5116_v45, %v5115_v12  ;;  %v2793_v12 = vshll.u32 %v2722_v32, 16  ;;  %v7810_v32 = vld [vmem:[%s12078_s7 + $0x9] sm:$0x1] }
 0x420   : > { %8882 = vmatpush3.bf16.xpose.msra.mxu1 %v5054_v23  ;;  %8549 = vmatprep.subr.bf16.mxu0 %v9757_v20  ;;  %v5120_v23 = vshrl.u32 %v10763_v15, 16 }
 0x421   : > { %8883 = vmatprep.subr.bf16.mxu1 %v9757_v20  ;;  %v5118_v25 = vsel %vm2788_vm14, %v10747_v58, %v5117_v19 }
 0x422   : > { %v5122_v26 = vrot.slane %v5120_v23, 2  ;;  %v5135_v46 = vsel %vm399_vm2, %v5118_v25, 0  ;;  %v5191_v25 = vrot.slane %v10763_v15, 3  ;;  %v5258_v15 = vrot.slane %v10337_v5, 4 }
 0x424   : > { %v5126_v13 = vor.u32 %v5125_v27, %v5122_v26  ;;  %v5250_v27 = vshrl.u32 %v5183_v54, 16 }
 0x426   : > { %8546 = vmatmul.mubr.msk.bf16.vlgmr.msra.gmra.mrb[48].mxu0 %vm399_vm2, %v7806_v31  ;;  %v2677_v31 = vsel %vm399_vm2, %v2666_v2, 0  ;;  %v5127_v47 = vsel %vm2788_vm14, %v5117_v19, %v5126_v13  ;;  %v2795_v19 = vrot.slane %v2793_v12, 3  ;;  %v2802_v13 = vrot.slane %v10305_v49, 3 }
 0x427   : > { %8550 = vmatpush3.bf16.xpose.msra.mxu0 %v2671_v39  ;;  %8555 = vmatprep.mubr.msk.bf16.mxu0 %vm9758_vm9, %v9757_v20  ;;  %v2727_v39 = vsel %vm1408_vm8, %v2725_v21, %v2726_v35  ;;  %v5138_v36 = vsel %vm399_vm2, %v5127_v47, 0  ;;  %v5262_v12 = vrot.slane %v10496_v10, 4 }
 0x428   : > { %8884 = vmatpush3.bf16.xpose.msra.mxu1 %v5057_v56  ;;  %8551 = vmatprep.subr.bf16.mxu0 %v9757_v20  ;;  %v7555_v59 = vpop.xlane.xlu0 %7554  ;;  %v2736_v14 = vsel %vm399_vm2, %v2727_v39, 0  ;;  %v2796_v26 = vor.u32 %v2795_v19, %v2792_v17  ;;  %v10831_v39 = vld [vmem:[#allocation3 + $0x30] sm:$0x7] }
 0x429   : > { %8889 = vmatprep.subr.bf16.mxu1 %v9757_v20  ;;  %v7557_v37 = vadd.f32 %v7556_v30, %v7555_v59  ;;  %v10791_v30 = vld [vmem:[#allocation3 + $0x28] sm:$0xff]  ;;  %v5186_v59 = vrot.slane %v5183_v54, 3  ;;  %v5263_v17 = vor.u32 %v5262_v12, %v5261_v11 }
 0x42a   : > { %v2728_v56 = vrot.slane %v10791_v30, 2  ;;  %v7880_v11 = vld [vmem:[%s12078_s7 + $0x2c] sm:$0x1] }
 0x42b   : > { %7559 = vst.msk [vmem:[%s397_s28] sm:$0x1] %vm7558_vm13, %v7557_v37  ;;  %v5188_v50 = vsel %vm12082_vm6, %v5186_v59, %v5187_v57  ;;  %v2809_v59 = vshll.u32 %v10831_v39, 16  ;;  %vm2935_vm13 = vsmask.f32 4352 }
 0x42c   : > { %v2729_v37 = vsel %vm1408_vm8, %v2726_v35, %v2728_v56  ;;  %v5197_v42 = vsel %vm399_vm2, %v5188_v50, 0  ;;  %v2731_v45 = vsel %vm1408_vm8, %v2728_v56, %v2730_v44  ;;  %v2801_v35 = vrot.slane %v10308_v53, 2  ;;  %v7878_v44 = vld [vmem:[%s12078_s7 + $0x2b] sm:$0x1] }
 0x42d   : > { %v2739_v3 = vsel %vm399_vm2, %v2729_v37, 0  ;;  %v2742_v23 = vsel %vm399_vm2, %v2731_v45, 0  ;;  %v10855_v45 = vld [vmem:[#allocation3 + $0x40] sm:$0xf] }
 0x42e   : > { %v5266_v19 = vshrl.u32 %v10855_v45, 16 }
 0x42f   : > { %8552 = vmatpush3.bf16.xpose.msra.mxu0 %v2674_v60  ;;  %8886 = vmatmul.mubr.msk.bf16.vlgmr.msra.gmra.mrb[16].mxu1 %vm399_vm2, %v7874_v4  ;;  %v5189_v4 = vrot.slane %v10473_v61, 3  ;;  %v2797_v60 = vrot.slane %v10297_v41, 2 }
 0x430   : > { %8890 = vmatpush3.bf16.xpose.msra.mxu1 %v5132_v16  ;;  %8553 = vmatprep.subr.bf16.mxu0 %v9757_v20  ;;  %v2798_v16 = vrot.slane %v10300_v40, 3 }
 0x431   : > { %8891 = vmatprep.subr.bf16.mxu1 %v9757_v20  ;;  %8895 = vmatprep.mubr.msk.bf16.mxu1 %vm9758_vm9, %v9757_v20  ;;  %v5190_v29 = vsel %vm12082_vm6, %v5187_v57, %v5189_v4  ;;  %v5192_v21 = vsel %vm12082_vm6, %v5189_v4, %v5191_v25  ;;  %v2806_v57 = vshrl.u32 %v10831_v39, 16  ;;  %v5268_v25 = vrot.slane %v5266_v19, 3 }
 0x432   : > { %v5200_v22 = vsel %vm399_vm2, %v5190_v29, 0  ;;  %v2799_v2 = vor.u32 %v2798_v16, %v2797_v60  ;;  %v5203_v56 = vsel %vm399_vm2, %v5192_v21, 0  ;;  %v5335_v19 = vrot.slane %v10473_v61, 4 }
 0x437   : > { %8554 = vmatpush3.bf16.xpose.msra.mxu0 %v2677_v31  ;;  %v5253_v31 = vshll.u32 %v5183_v54, 16  ;;  %v10836_v54 = vor.u32 %v2802_v13, %v2801_v35 }
 0x438   : > { %8892 = vmatpush3.bf16.xpose.msra.mxu1 %v5135_v46  ;;  %8559 = vmatprep.subr.bf16.mxu0 %v9757_v20  ;;  %v2800_v46 = vsel %vm2788_vm14, %v2796_v26, %v2799_v2 }
 0x439   : > { %8893 = vmatprep.subr.bf16.mxu1 %v9757_v20  ;;  %v2818_v47 = vsel %vm399_vm2, %v2800_v46, 0  ;;  %v2804_v50 = vsel %vm2788_vm14, %v2799_v2, %v10836_v54  ;;  %v10872_v46 = vld [vmem:[#allocation3 + $0x20] sm:$0xff] }
 0x43a   : > { %v2821_v60 = vsel %vm399_vm2, %v2804_v50, 0  ;;  %v2873_v35 = vrot.slane %v10872_v46, 3  ;;  %v10894_v50 = vld [vmem:[#allocation3 + $0x48] sm:$0xff] }
 0x43b   : > { %v7355_v61 = vrot.slane %v10894_v50, 2 }
 0x43e   : > { %8556 = vmatmul.mubr.msk.bf16.vlgmr.msra.gmra.mrb[48].mxu0 %vm399_vm2, %v7808_v55  ;;  %v5257_v55 = vrot.slane %v10340_v18, 3 }
 0x43f   : > { %8560 = vmatpush3.bf16.xpose.msra.mxu0 %v2736_v14  ;;  %8565 = vmatprep.mubr.msk.bf16.mxu0 %vm9758_vm9, %v9757_v20  ;;  %v5252_v14 = vrot.slane %v5250_v27, 3 }
 0x440   : > { %8894 = vmatpush3.bf16.xpose.msra.mxu1 %v5138_v36  ;;  %8561 = vmatprep.subr.bf16.mxu0 %v9757_v20  ;;  %v5255_v36 = vrot.slane %v5253_v31, 4  ;;  %v10843_v37 = vor.u32 %v5258_v15, %v5257_v55  ;;  %v2869_v31 = vld [vmem:[#allocation3 + $0x18] sm:$0xf8]  ;;  %v7812_v55 = vld [vmem:[%s12078_s7 + $0xa] sm:$0x1] }
 0x441   : > { %8899 = vmatprep.subr.bf16.mxu1 %v9757_v20  ;;  %v2872_v21 = vrot.slane %v2869_v31, 3 }
 0x442   : > { %v5264_v2 = vsel %vm2935_vm13, %v10843_v37, %v5263_v17 }
 0x443   : > { %v2874_v15 = vsel %vm12082_vm6, %v2872_v21, %v2873_v35 }
 0x447   : > { %8562 = vmatpush3.bf16.xpose.msra.mxu0 %v2739_v3  ;;  %8896 = vmatmul.mubr.msk.bf16.vlgmr.msra.gmra.mrb[16].mxu1 %vm399_vm2, %v7876_v62  ;;  %v5256_v62 = vor.u32 %v5255_v36, %v5252_v14  ;;  %v2808_v3 = vrot.slane %v2806_v57, 2  ;;  %v2883_v14 = vsel %vm399_vm2, %v2874_v15, 0  ;;  %v10886_v57 = vld [vmem:[#allocation3 + $0x28] sm:$0xf0] }
 0x448   : > { %8900 = vmatpush3.bf16.xpose.msra.mxu1 %v5197_v42  ;;  %8563 = vmatprep.subr.bf16.mxu0 %v9757_v20  ;;  %v2811_v42 = vrot.slane %v2809_v59, 3  ;;  %v10891_v59 = vld [vmem:[#allocation3 + $0x30] sm:$0xff] }
 0x449   : > { %8901 = vmatprep.subr.bf16.mxu1 %v9757_v20  ;;  %8905 = vmatprep.mubr.msk.bf16.mxu1 %vm9758_vm9, %v9757_v20  ;;  %v5260_v4 = vsel %vm2935_vm13, %v5256_v62, %v10843_v37  ;;  %v5333_v62 = vrot.slane %v10891_v59, 4 }
 0x44a   : > { %v5278_v16 = vsel %vm399_vm2, %v5260_v4, 0  ;;  %v2812_v29 = vor.u32 %v2811_v42, %v2808_v3  ;;  %v5332_v3 = vrot.slane %v10886_v57, 4  ;;  %v10903_v4 = vshll.u32 %v10894_v50, 16 }
 0x44c   : > { %v5334_v12 = vsel %vm689_vm5, %v5332_v3, %v5333_v62 }
 0x44f   : > { %8564 = vmatpush3.bf16.xpose.msra.mxu0 %v2742_v23  ;;  %v5269_v23 = vshll.u32 %v10855_v45, 16 }
 0x450   : > { %8902 = vmatpush3.bf16.xpose.msra.mxu1 %v5200_v22  ;;  %8569 = vmatprep.subr.bf16.mxu0 %v9757_v20  ;;  %v2813_v22 = vsel %vm2788_vm14, %v10836_v54, %v2812_v29  ;;  %v10911_v29 = vld [vmem:[#allocation3 + $0x40] sm:$0xff] }
 0x451   : > { %8903 = vmatprep.subr.bf16.mxu1 %v9757_v20  ;;  %v5271_v26 = vrot.slane %v5269_v23, 4  ;;  %v2824_v27 = vsel %vm399_vm2, %v2813_v22, 0  ;;  %v7282_v22 = vrot.slane %v10903_v4, 2  ;;  %v10934_v21 = vshll.u32 %v10911_v29, 16 }
 0x453   : > { %v5272_v13 = vor.u32 %v5271_v26, %v5268_v25  ;;  %v7353_v26 = vrot.slane %v10911_v29, 2  ;;  %v7424_v3 = vrot.slane %v10934_v21, 3 }
 0x456   : > { %8566 = vmatmul.mubr.msk.bf16.vlgmr.msra.gmra.mrb[48].mxu0 %vm399_vm2, %v7810_v32  ;;  %v5281_v32 = vsel %vm399_vm2, %v5264_v2, 0  ;;  %v2937_v2 = vshrl.u32 %v2869_v31, 16 }
 0x457   : > { %8570 = vmatpush3.bf16.xpose.msra.mxu0 %v2818_v47  ;;  %8575 = vmatprep.mubr.msk.bf16.mxu0 %vm9758_vm9, %v9757_v20  ;;  %v5273_v47 = vsel %vm2935_vm13, %v5263_v17, %v5272_v13  ;;  %v5343_v17 = vsel %vm399_vm2, %v5334_v12, 0  ;;  %v5336_v13 = vsel %vm689_vm5, %v5333_v62, %v5335_v19  ;;  %v5337_v12 = vrot.slane %v10855_v45, 4 }
 0x458   : > { %8904 = vmatpush3.bf16.xpose.msra.mxu1 %v5203_v56  ;;  %8571 = vmatprep.subr.bf16.mxu0 %v9757_v20  ;;  %v5284_v36 = vsel %vm399_vm2, %v5273_v47, 0  ;;  %v2875_v56 = vrot.slane %v10791_v30, 3  ;;  %v2939_v15 = vrot.slane %v2937_v2, 3  ;;  %v7814_v2 = vld [vmem:[%s12078_s7 + $0xb] sm:$0x1]  ;;  %v2949_v45 = vrot.slane %v10305_v49, 4 }
 0x459   : > { %8909 = vmatprep.subr.bf16.mxu1 %v9757_v20 }
 0x45a   : > { %v2876_v42 = vsel %vm12082_vm6, %v2873_v35, %v2875_v56  ;;  %v10929_v35 = vshrl.u32 %v10911_v29, 16 }
 0x45f   : > { %8572 = vmatpush3.bf16.xpose.msra.mxu0 %v2821_v60  ;;  %8906 = vmatmul.mubr.msk.bf16.vlgmr.msra.gmra.mrb[16].mxu1 %vm399_vm2, %v7878_v44  ;;  %v10900_v44 = vshrl.u32 %v10894_v50, 16  ;;  %v2886_v60 = vsel %vm399_vm2, %v2876_v42, 0 }
 0x460   : > { %8910 = vmatpush3.bf16.xpose.msra.mxu1 %v5278_v16  ;;  %8573 = vmatprep.subr.bf16.mxu0 %v9757_v20  ;;  %v2877_v16 = vrot.slane %v10831_v39, 3  ;;  %v2940_v39 = vshll.u32 %v2869_v31, 16  ;;  %v2945_v31 = vrot.slane %v10300_v40, 4 }
 0x461   : > { %8911 = vmatprep.subr.bf16.mxu1 %v9757_v20  ;;  %8915 = vmatprep.mubr.msk.bf16.mxu1 %vm9758_vm9, %v9757_v20  ;;  %v7281_v23 = vrot.slane %v10900_v44, 1  ;;  %v7427_v42 = vrot.slane %v10900_v44, 2 }
 0x462   : > { %v2942_v47 = vrot.slane %v2940_v39, 4 }
 0x463   : > { %v10922_v25 = vor.u32 %v7282_v22, %v7281_v23  ;;  %v5396_v23 = vshrl.u32 %v10886_v57, 16  ;;  %v5399_v22 = vshll.u32 %v10886_v57, 16  ;;  %v5404_v57 = vrot.slane %v10337_v5, 5 }
 0x467   : > { %8574 = vmatpush3.bf16.xpose.msra.mxu0 %v2824_v27  ;;  %v2878_v27 = vsel %vm12082_vm6, %v2875_v56, %v2877_v16  ;;  %v7423_v56 = vrot.slane %v10929_v35, 2  ;;  %vm3082_vm6 = vsmask.f32 3328 }
 0x468   : > { %8912 = vmatpush3.bf16.xpose.msra.mxu1 %v5281_v32  ;;  %8579 = vmatprep.subr.bf16.mxu0 %v9757_v20  ;;  %v2944_v32 = vrot.slane %v10297_v41, 3 }
 0x469   : > { %8913 = vmatprep.subr.bf16.mxu1 %v9757_v20  ;;  %v10952_v16 = vor.u32 %v7424_v3, %v7423_v56 }
 0x46a   : > { %v2946_v62 = vor.u32 %v2945_v31, %v2944_v32  ;;  %v5403_v31 = vrot.slane %v10340_v18, 4 }
 0x46e   : > { %8576 = vmatmul.mubr.msk.bf16.vlgmr.msra.gmra.mrb[48].mxu0 %vm399_vm2, %v7812_v55  ;;  %v10941_v55 = vsel %vm1408_vm8, %v7353_v26, %v7355_v61 }
 0x46f   : > { %8580 = vmatpush3.bf16.xpose.msra.mxu0 %v2883_v14  ;;  %8585 = vmatprep.mubr.msk.bf16.mxu0 %vm9758_vm9, %v9757_v20  ;;  %v2889_v14 = vsel %vm399_vm2, %v2878_v27, 0  ;;  %v2948_v27 = vrot.slane %v10308_v53, 3 }
 0x470   : > { %8914 = vmatpush3.bf16.xpose.msra.mxu1 %v5284_v36  ;;  %8581 = vmatprep.subr.bf16.mxu0 %v9757_v20  ;;  %v5346_v36 = vsel %vm399_vm2, %v5336_v13, 0  ;;  %v5338_v13 = vsel %vm689_vm5, %v5335_v19, %v5337_v12 }
 0x471   : > { %8919 = vmatprep.subr.bf16.mxu1 %v9757_v20  ;;  %v5349_v56 = vsel %vm399_vm2, %v5338_v13, 0  ;;  %v10977_v3 = vor.u32 %v2949_v45, %v2948_v27  ;;  %v5407_v27 = vrot.slane %v10483_v34, 4  ;;  %v5408_v45 = vrot.slane %v10496_v10, 5  ;;  %v10996_v13 = vld [vmem:[#allocation3 + $0x40] sm:$0x1f] }
 0x477   : > { %8582 = vmatpush3.bf16.xpose.msra.mxu0 %v2886_v60  ;;  %8916 = vmatmul.mubr.msk.bf16.vlgmr.msra.gmra.mrb[16].mxu1 %vm399_vm2, %v7880_v11  ;;  %v7428_v11 = vrot.slane %v10903_v4, 3  ;;  %v2943_v60 = vor.u32 %v2942_v47, %v2939_v15  ;;  %v10972_v15 = vld [vmem:[#allocation3 + $0x30] sm:$0xf] }
 0x478   : > { %8920 = vmatpush3.bf16.xpose.msra.mxu1 %v5343_v17  ;;  %8583 = vmatprep.subr.bf16.mxu0 %v9757_v20  ;;  %v2956_v19 = vshll.u32 %v10972_v15, 16 }
 0x479   : > { %8921 = vmatprep.subr.bf16.mxu1 %v9757_v20  ;;  %8925 = vmatprep.mubr.msk.bf16.mxu1 %vm9758_vm9, %v9757_v20  ;;  %v10954_v17 = vor.u32 %v7428_v11, %v7427_v42  ;;  %v2947_v39 = vsel %vm2935_vm13, %v2943_v60, %v2946_v62  ;;  %v2953_v42 = vshrl.u32 %v10972_v15, 16  ;;  %v10984_v11 = vor.u32 %v5404_v57, %v5403_v31 }
 0x47a   : > { %v2965_v47 = vsel %vm399_vm2, %v2947_v39, 0  ;;  %v2951_v60 = vsel %vm2935_vm13, %v2946_v62, %v10977_v3 }
 0x47b   : > { %v10967_v32 = vsel %vm2788_vm14, %v10952_v16, %v10954_v17  ;;  %v2968_v31 = vsel %vm399_vm2, %v2951_v60, 0 }
 0x47f   : > { %8584 = vmatpush3.bf16.xpose.msra.mxu0 %v2889_v14  ;;  %v5398_v14 = vrot.slane %v5396_v23, 4  ;;  %v2955_v23 = vrot.slane %v2953_v42, 3 }
 0x480   : > { %8922 = vmatpush3.bf16.xpose.msra.mxu1 %v5346_v36  ;;  %8589 = vmatprep.subr.bf16.mxu0 %v9757_v20  ;;  %v5401_v36 = vrot.slane %v5399_v22, 5  ;;  %v2958_v22 = vrot.slane %v2956_v19, 4 }
 0x481   : > { %8923 = vmatprep.subr.bf16.mxu1 %v9757_v20 }
 0x482   : > { %v5402_v12 = vor.u32 %v5401_v36, %v5398_v14  ;;  %v2959_v57 = vor.u32 %v2958_v22, %v2955_v23  ;;  %v5412_v14 = vshrl.u32 %v10996_v13, 16  ;;  %v5415_v36 = vshll.u32 %v10996_v13, 16  ;;  %v3016_v23 = vld [vmem:[#allocation3 + $0x18] sm:$0xf0] }
 0x484   : > { %v5406_v39 = vsel %vm3082_vm6, %v5402_v12, %v10984_v11  ;;  %v5414_v19 = vrot.slane %v5412_v14, 4  ;;  %v5417_v12 = vrot.slane %v5415_v36, 5  ;;  %v3022_v36 = vrot.slane %v10791_v30, 4 }
 0x485   : > { %v5424_v62 = vsel %vm399_vm2, %v5406_v39, 0 }
 0x486   : > { %8586 = vmatmul.mubr.msk.bf16.vlgmr.msra.gmra.mrb[48].mxu0 %vm399_vm2, %v7814_v2  ;;  %v7882_v2 = vld [vmem:[%s12078_s7 + $0x2d] sm:$0x1]  ;;  %v5418_v39 = vor.u32 %v5417_v12, %v5414_v19  ;;  %v7884_v12 = vld [vmem:[%s12078_s7 + $0x2e] sm:$0x1] }
 0x487   : > { %8590 = vmatpush3.bf16.xpose.msra.mxu0 %v2965_v47  ;;  %8595 = vmatprep.mubr.msk.bf16.mxu0 %vm9758_vm9, %v9757_v20  ;;  %v5409_v47 = vor.u32 %v5408_v45, %v5407_v27  ;;  %v3019_v27 = vrot.slane %v3016_v23, 4  ;;  %v7816_v45 = vld [vmem:[%s12078_s7 + $0xc] sm:$0x1] }
 0x488   : > { %8924 = vmatpush3.bf16.xpose.msra.mxu1 %v5349_v56  ;;  %8591 = vmatprep.subr.bf16.mxu0 %v9757_v20  ;;  %v2960_v56 = vsel %vm2935_vm13, %v10977_v3, %v2959_v57 }
 0x489   : > { %8929 = vmatprep.subr.bf16.mxu1 %v9757_v20  ;;  %v5410_v42 = vsel %vm3082_vm6, %v10984_v11, %v5409_v47  ;;  %v2971_v60 = vsel %vm399_vm2, %v2960_v56, 0  ;;  %v5475_v56 = vld [vmem:[#allocation3 + $0x28] sm:$0xe0] }
 0x48a   : > { %v5427_v22 = vsel %vm399_vm2, %v5410_v42, 0  ;;  %v5479_v42 = vrot.slane %v10891_v59, 5 }
 0x48f   : > { %8592 = vmatpush3.bf16.xpose.msra.mxu0 %v2968_v31  ;;  %8926 = vmatmul.mubr.msk.bf16.vlgmr.msra.gmra.mrb[16].mxu1 %vm399_vm2, %v7882_v2  ;;  %v3020_v2 = vrot.slane %v10872_v46, 4 }
 0x490   : > { %8930 = vmatpush3.bf16.xpose.msra.mxu1 %v5424_v62  ;;  %8593 = vmatprep.subr.bf16.mxu0 %v9757_v20  ;;  %v5419_v62 = vsel %vm3082_vm6, %v5409_v47, %v5418_v39  ;;  %v5478_v47 = vrot.slane %v5475_v56, 5 }
 0x491   : > { %8931 = vmatprep.subr.bf16.mxu1 %v9757_v20  ;;  %8935 = vmatprep.mubr.msk.bf16.mxu1 %vm9758_vm9, %v9757_v20  ;;  %v3021_v31 = vsel %vm689_vm5, %v3019_v27, %v3020_v2  ;;  %v5430_v14 = vsel %vm399_vm2, %v5419_v62, 0  ;;  %v3023_v19 = vsel %vm689_vm5, %v3020_v2, %v3022_v36  ;;  %v3024_v27 = vrot.slane %v10972_v15, 4 }
 0x492   : > { %v3030_v57 = vsel %vm399_vm2, %v3021_v31, 0  ;;  %v3084_v31 = vshrl.u32 %v3016_v23, 16  ;;  %v3087_v62 = vshll.u32 %v3016_v23, 16  ;;  %v3092_v15 = vrot.slane %v10300_v40, 5 }
 0x493   : > { %v5483_v23 = vrot.slane %v10996_v13, 5  ;;  %v5545_v40 = vshll.u32 %v5475_v56, 16  ;;  %v5550_v13 = vrot.slane %v10337_v5, 6 }
 0x497   : > { %8594 = vmatpush3.bf16.xpose.msra.mxu0 %v2971_v60  ;;  %v5480_v60 = vsel %vm1103_vm7, %v5478_v47, %v5479_v42 }
 0x498   : > { %8932 = vmatpush3.bf16.xpose.msra.mxu1 %v5427_v22  ;;  %8599 = vmatprep.subr.bf16.mxu0 %v9757_v20  ;;  %v3033_v22 = vsel %vm399_vm2, %v3023_v19, 0  ;;  %v5489_v39 = vsel %vm399_vm2, %v5480_v60, 0  ;;  %v3086_v19 = vrot.slane %v3084_v31, 4  ;;  %v3095_v31 = vrot.slane %v10308_v53, 4 }
 0x499   : > { %8933 = vmatprep.subr.bf16.mxu1 %v9757_v20 }
 0x49e   : > { %8596 = vmatmul.mubr.msk.bf16.vlgmr.msra.gmra.mrb[48].mxu0 %vm399_vm2, %v7816_v45  ;;  %v11040_v45 = vld [vmem:[#allocation3 + $0x38] sm:$0xff] }
 0x49f   : > { %8600 = vmatpush3.bf16.xpose.msra.mxu0 %v3030_v57  ;;  %8605 = vmatprep.mubr.msk.bf16.mxu0 %vm9758_vm9, %v9757_v20  ;;  %v5481_v2 = vrot.slane %v11040_v45, 5  ;;  %v3025_v57 = vsel %vm689_vm5, %v3022_v36, %v3024_v27  ;;  %v5542_v36 = vshrl.u32 %v5475_v56, 16 }
 0x4a0   : > { %8934 = vmatpush3.bf16.xpose.msra.mxu1 %v5430_v14  ;;  %8601 = vmatprep.subr.bf16.mxu0 %v9757_v20  ;;  %v3091_v14 = vrot.slane %v10297_v41, 4  ;;  %v3036_v60 = vsel %vm399_vm2, %v3025_v57, 0 }
 0x4a1   : > { %8939 = vmatprep.subr.bf16.mxu1 %v9757_v20  ;;  %v5482_v47 = vsel %vm1103_vm7, %v5479_v42, %v5481_v2  ;;  %v7818_v42 = vld [vmem:[%s12078_s7 + $0xd] sm:$0x1]  ;;  %v5484_v57 = vsel %vm1103_vm7, %v5481_v2, %v5483_v23 }
 0x4a7   : > { %8602 = vmatpush3.bf16.xpose.msra.mxu0 %v3033_v22  ;;  %8936 = vmatmul.mubr.msk.bf16.vlgmr.msra.gmra.mrb[16].mxu1 %vm399_vm2, %v7884_v12  ;;  %v3089_v12 = vrot.slane %v3087_v62, 5  ;;  %v5492_v22 = vsel %vm399_vm2, %v5482_v47, 0  ;;  %v3096_v62 = vrot.slane %v10305_v49, 5  ;;  %v5544_v47 = vrot.slane %v5542_v36, 5 }
 0x4a8   : > { %8940 = vmatpush3.bf16.xpose.msra.mxu1 %v5489_v39  ;;  %8603 = vmatprep.subr.bf16.mxu0 %v9757_v20  ;;  %v3093_v39 = vor.u32 %v3092_v15, %v3091_v14  ;;  %v5549_v14 = vrot.slane %v10340_v18, 5  ;;  %v11064_v15 = vld [vmem:[#allocation3 + $0x30] sm:$0x1f] }
 0x4a9   : > { %8941 = vmatprep.subr.bf16.mxu1 %v9757_v20  ;;  %8945 = vmatprep.mubr.msk.bf16.mxu1 %vm9758_vm9, %v9757_v20  ;;  %v3090_v41 = vor.u32 %v3089_v12, %v3086_v19  ;;  %v5547_v19 = vrot.slane %v5545_v40, 6  ;;  %v5495_v12 = vsel %vm399_vm2, %v5484_v57, 0  ;;  %v3103_v2 = vshll.u32 %v11064_v15, 16  ;;  %v7886_v40 = vld [vmem:[%s12078_s7 + $0x2f] sm:$0x1] }
 0x4aa   : > { %v11076_v5 = vor.u32 %v5550_v13, %v5549_v14 }
 0x4ab   : > { %v3094_v27 = vsel %vm3082_vm6, %v3090_v41, %v3093_v39  ;;  %v5548_v18 = vor.u32 %v5547_v19, %v5544_v47  ;;  %v3105_v36 = vrot.slane %v3103_v2, 5 }
 0x4ac   : > { %v3112_v56 = vsel %vm399_vm2, %v3094_v27, 0  ;;  %v5553_v27 = vrot.slane %v10483_v34, 5 }
 0x4af   : > { %8604 = vmatpush3.bf16.xpose.msra.mxu0 %v3036_v60  ;;  %v11069_v60 = vor.u32 %v3096_v62, %v3095_v31  ;;  %v5554_v31 = vrot.slane %v10496_v10, 6  ;;  %v11088_v62 = vld [vmem:[#allocation3 + $0x40] sm:$0x3f] }
 0x4b0   : > { %8942 = vmatpush3.bf16.xpose.msra.mxu1 %v5492_v22  ;;  %8609 = vmatprep.subr.bf16.mxu0 %v9757_v20  ;;  %v3100_v22 = vshrl.u32 %v11064_v15, 16  ;;  %v5561_v47 = vshll.u32 %v11088_v62, 16 }
 0x4b1   : > { %8943 = vmatprep.subr.bf16.mxu1 %v9757_v20  ;;  %v3098_v23 = vsel %vm3082_vm6, %v3093_v39, %v11069_v60  ;;  %v5555_v13 = vor.u32 %v5554_v31, %v5553_v27  ;;  %v7820_v27 = vld [vmem:[%s12078_s7 + $0xe] sm:$0x1] }
 0x4b2   : > { %v3102_v41 = vrot.slane %v3100_v22, 4  ;;  %v3115_v57 = vsel %vm399_vm2, %v3098_v23, 0  ;;  %v5563_v2 = vrot.slane %v5561_v47, 6  ;;  %v3163_v23 = vld [vmem:[#allocation3 + $0x18] sm:$0xe0] }
 0x4b3   : > { %v5621_v47 = vld [vmem:[#allocation3 + $0x28] sm:$0xc0] }
 0x4b4   : > { %v3106_v14 = vor.u32 %v3105_v36, %v3102_v41  ;;  %v3167_v36 = vrot.slane %v10872_v46, 5 }
 0x4b6   : > { %8606 = vmatmul.mubr.msk.bf16.vlgmr.msra.gmra.mrb[48].mxu0 %vm399_vm2, %v7818_v42  ;;  %v5552_v42 = vsel %vm2051_vm10, %v5548_v18, %v11076_v5  ;;  %v3107_v19 = vsel %vm3082_vm6, %v11069_v60, %v3106_v14 }
 0x4b7   : > { %8610 = vmatpush3.bf16.xpose.msra.mxu0 %v3112_v56  ;;  %8615 = vmatprep.mubr.msk.bf16.mxu0 %vm9758_vm9, %v9757_v20  ;;  %v5570_v39 = vsel %vm399_vm2, %v5552_v42, 0  ;;  %v5558_v56 = vshrl.u32 %v11088_v62, 16  ;;  %v3118_v18 = vsel %vm399_vm2, %v3107_v19, 0  ;;  %v3166_v42 = vrot.slane %v3163_v23, 5 }
 0x4b8   : > { %8944 = vmatpush3.bf16.xpose.msra.mxu1 %v5495_v12  ;;  %8611 = vmatprep.subr.bf16.mxu0 %v9757_v20  ;;  %v5556_v12 = vsel %vm2051_vm10, %v11076_v5, %v5555_v13  ;;  %v5625_v19 = vrot.slane %v10891_v59, 6 }
 0x4b9   : > { %8949 = vmatprep.subr.bf16.mxu1 %v9757_v20  ;;  %v5560_v22 = vrot.slane %v5558_v56, 5  ;;  %v5573_v41 = vsel %vm399_vm2, %v5556_v12, 0  ;;  %v3168_v31 = vsel %vm1103_vm7, %v3166_v42, %v3167_v36  ;;  %v3169_v56 = vrot.slane %v10791_v30, 5 }
 0x4ba   : > { %v3230_v42 = vshrl.u32 %v3163_v23, 16 }
 0x4bb   : > { %v3170_v12 = vsel %vm1103_vm7, %v3167_v36, %v3169_v56  ;;  %v5627_v36 = vrot.slane %v11040_v45, 6 }
 0x4bf   : > { %8612 = vmatpush3.bf16.xpose.msra.mxu0 %v3115_v57  ;;  %8946 = vmatmul.mubr.msk.bf16.vlgmr.msra.gmra.mrb[16].mxu1 %vm399_vm2, %v7886_v40  ;;  %v5564_v40 = vor.u32 %v5563_v2, %v5560_v22  ;;  %v7888_v22 = vld [vmem:[%s12078_s7 + $0x30] sm:$0x1] }
 0x4c0   : > { %8950 = vmatpush3.bf16.xpose.msra.mxu1 %v5570_v39  ;;  %8613 = vmatprep.subr.bf16.mxu0 %v9757_v20  ;;  %v3177_v39 = vsel %vm399_vm2, %v3168_v31, 0 }
 0x4c1   : > { %8951 = vmatprep.subr.bf16.mxu1 %v9757_v20  ;;  %8955 = vmatprep.mubr.msk.bf16.mxu1 %vm9758_vm9, %v9757_v20  ;;  %v5565_v57 = vsel %vm2051_vm10, %v5555_v13, %v5564_v40  ;;  %v5624_v13 = vrot.slane %v5621_v47, 6  ;;  %v3171_v40 = vrot.slane %v11064_v15, 5 }
 0x4c2   : > { %v5576_v14 = vsel %vm399_vm2, %v5565_v57, 0  ;;  %v5628_v57 = vsel %vm540_vm1, %v5625_v19, %v5627_v36 }
 0x4c3   : > { %v5626_v2 = vsel %vm540_vm1, %v5624_v13, %v5625_v19  ;;  %v3172_v31 = vsel %vm1103_vm7, %v3169_v56, %v3171_v40  ;;  %v5638_v13 = vsel %vm399_vm2, %v5628_v57, 0  ;;  %v7822_v56 = vld [vmem:[%s12078_s7 + $0xf] sm:$0x1] }
 0x4c4   : > { %v3183_v15 = vsel %vm399_vm2, %v3172_v31, 0 }
 0x4c7   : > { %8614 = vmatpush3.bf16.xpose.msra.mxu0 %v3118_v18  ;;  %v3180_v18 = vsel %vm399_vm2, %v3170_v12, 0  ;;  %v5629_v12 = vrot.slane %v11088_v62, 6 }
 0x4c8   : > { %8952 = vmatpush3.bf16.xpose.msra.mxu1 %v5573_v41  ;;  %8619 = vmatprep.subr.bf16.mxu0 %v9757_v20  ;;  %v5635_v41 = vsel %vm399_vm2, %v5626_v2, 0  ;;  %v5691_v2 = vshll.u32 %v5621_v47, 16 }
 0x4c9   : > { %8953 = vmatprep.subr.bf16.mxu1 %v9757_v20  ;;  %v5630_v40 = vsel %vm540_vm1, %v5627_v36, %v5629_v12 }
 0x4ca   : > { %v5641_v31 = vsel %vm399_vm2, %v5630_v40, 0 }
 0x4ce   : > { %8616 = vmatmul.mubr.msk.bf16.vlgmr.msra.gmra.mrb[48].mxu0 %vm399_vm2, %v7820_v27  ;;  %v3233_v27 = vshll.u32 %v3163_v23, 16 }
 0x4cf   : > { %8620 = vmatpush3.bf16.xpose.msra.mxu0 %v3177_v39  ;;  %8625 = vmatprep.mubr.msk.bf16.mxu0 %vm9758_vm9, %v9757_v20  ;;  %v3232_v39 = vrot.slane %v3230_v42, 5  ;;  %v11151_v42 = vld [vmem:[#allocation3 + $0x30] sm:$0x3f] }
 0x4d0   : > { %8954 = vmatpush3.bf16.xpose.msra.mxu1 %v5576_v14  ;;  %8621 = vmatprep.subr.bf16.mxu0 %v9757_v20  ;;  %v3235_v14 = vrot.slane %v3233_v27, 6  ;;  %v5693_v27 = vrot.slane %v5691_v2, 7  ;;  %v11174_v2 = vld [vmem:[#allocation3 + $0x40] sm:$0x7f] }
 0x4d1   : > { %8959 = vmatprep.subr.bf16.mxu1 %v9757_v20  ;;  %v5707_v40 = vshll.u32 %v11174_v2, 16 }
 0x4d2   : > { %v3236_v23 = vor.u32 %v3235_v14, %v3232_v39  ;;  %v3246_v39 = vshrl.u32 %v11151_v42, 16 }
 0x4d4   : > { %v3240_v19 = vsel %vm2051_vm10, %v3236_v23, %v10319_v1  ;;  %v3248_v14 = vrot.slane %v3246_v39, 5  ;;  %v5699_v23 = vrot.slane %v10483_v34, 6  ;;  %v3309_v39 = vld [vmem:[#allocation3 + $0x18] sm:$0xc0] }
 0x4d5   : > { %v3258_v62 = vsel %vm399_vm2, %v3240_v19, 0 }
 0x4d7   : > { %8622 = vmatpush3.bf16.xpose.msra.mxu0 %v3180_v18  ;;  %8956 = vmatmul.mubr.msk.bf16.vlgmr.msra.gmra.mrb[16].mxu1 %vm399_vm2, %v7888_v22  ;;  %v5688_v22 = vshrl.u32 %v5621_v47, 16  ;;  %v3241_v18 = vrot.slane %v10308_v53, 5  ;;  %v3249_v53 = vshll.u32 %v11151_v42, 16 }
 0x4d8   : > { %8960 = vmatpush3.bf16.xpose.msra.mxu1 %v5635_v41  ;;  %8623 = vmatprep.subr.bf16.mxu0 %v9757_v20  ;;  %v3242_v41 = vrot.slane %v10305_v49, 6 }
 0x4d9   : > { %8961 = vmatprep.subr.bf16.mxu1 %v9757_v20  ;;  %8965 = vmatprep.mubr.msk.bf16.mxu1 %vm9758_vm9, %v9757_v20  ;;  %v5690_v47 = vrot.slane %v5688_v22, 6  ;;  %v5700_v22 = vrot.slane %v10496_v10, 7 }
 0x4da   : > { %v11156_v57 = vor.u32 %v3242_v41, %v3241_v18  ;;  %v5704_v41 = vshrl.u32 %v11174_v2, 16 }
 0x4db   : > { %v5694_v49 = vor.u32 %v5693_v27, %v5690_v47  ;;  %v5701_v18 = vor.u32 %v5700_v22, %v5699_v23  ;;  %v5709_v27 = vrot.slane %v5707_v40, 7  ;;  %v3315_v22 = vrot.slane %v10791_v30, 6 }
 0x4dc   : > { %v3244_v36 = vsel %vm2051_vm10, %v10319_v1, %v11156_v57  ;;  %v5706_v47 = vrot.slane %v5704_v41, 6  ;;  %v7892_v41 = vld [vmem:[%s12078_s7 + $0x32] sm:$0x1] }
 0x4dd   : > { %v5698_v12 = vsel %vm2210_vm11, %v5694_v49, %v10355_v33  ;;  %v3313_v49 = vrot.slane %v10872_v46, 6 }
 0x4de   : > { %v5716_v1 = vsel %vm399_vm2, %v5698_v12, 0 }
 0x4df   : > { %8624 = vmatpush3.bf16.xpose.msra.mxu0 %v3183_v15  ;;  %v3251_v15 = vrot.slane %v3249_v53, 6 }
 0x4e0   : > { %8962 = vmatpush3.bf16.xpose.msra.mxu1 %v5638_v13  ;;  %8629 = vmatprep.subr.bf16.mxu0 %v9757_v20  ;;  %v7890_v13 = vld [vmem:[%s12078_s7 + $0x31] sm:$0x1] }
 0x4e1   : > { %8963 = vmatprep.subr.bf16.mxu1 %v9757_v20  ;;  %v3252_v19 = vor.u32 %v3251_v15, %v3248_v14  ;;  %v3312_v14 = vrot.slane %v3309_v39, 6 }
 0x4e3   : > { %v3253_v10 = vsel %vm2051_vm10, %v11156_v57, %v3252_v19  ;;  %v3314_v15 = vsel %vm540_vm1, %v3312_v14, %v3313_v49 }
 0x4e4   : > { %v3323_v12 = vsel %vm399_vm2, %v3314_v15, 0  ;;  %v5775_v15 = vrot.slane %v11174_v2, 7 }
 0x4e6   : > { %8626 = vmatmul.mubr.msk.bf16.vlgmr.msra.gmra.mrb[48].mxu0 %vm399_vm2, %v7822_v56  ;;  %v3261_v56 = vsel %vm399_vm2, %v3244_v36, 0  ;;  %v5710_v36 = vor.u32 %v5709_v27, %v5706_v47  ;;  %v5773_v47 = vrot.slane %v11040_v45, 7  ;;  %v3376_v27 = vshrl.u32 %v3309_v39, 16 }
 0x4e7   : > { %8630 = vmatpush3.bf16.xpose.msra.mxu0 %v3258_v62  ;;  %8635 = vmatprep.mubr.msk.bf16.mxu0 %vm9758_vm9, %v9757_v20  ;;  %v5702_v62 = vsel %vm2210_vm11, %v10355_v33, %v5701_v18  ;;  %v7824_v33 = vld [vmem:[%s12078_s7 + $0x10] sm:$0x1] }
 0x4e8   : > { %8964 = vmatpush3.bf16.xpose.msra.mxu1 %v5641_v31  ;;  %8631 = vmatprep.subr.bf16.mxu0 %v9757_v20  ;;  %v3264_v31 = vsel %vm399_vm2, %v3253_v10, 0  ;;  %v5719_v53 = vsel %vm399_vm2, %v5702_v62, 0  ;;  %v3317_v62 = vrot.slane %v11151_v42, 6 }
 0x4e9   : > { %8969 = vmatprep.subr.bf16.mxu1 %v9757_v20 }
 0x4ef   : > { %8632 = vmatpush3.bf16.xpose.msra.mxu0 %v3261_v56  ;;  %8966 = vmatmul.mubr.msk.bf16.vlgmr.msra.gmra.mrb[16].mxu1 %vm399_vm2, %v7890_v13  ;;  %v5711_v13 = vsel %vm2210_vm11, %v5701_v18, %v5710_v36  ;;  %v5767_v56 = vld [vmem:[#allocation3 + $0x28] sm:$0x80]  ;;  %v3316_v18 = vsel %vm540_vm1, %v3313_v49, %v3315_v22  ;;  %v3378_v36 = vrot.slane %v3376_v27, 6  ;;  %v11254_v27 = vld [vmem:[#allocation3 + $0x40] sm:$0xff] }
 0x4f0   : > { %8970 = vmatpush3.bf16.xpose.msra.mxu1 %v5716_v1  ;;  %8633 = vmatprep.subr.bf16.mxu0 %v9757_v20  ;;  %v5722_v23 = vsel %vm399_vm2, %v5711_v13, 0  ;;  %v5771_v1 = vrot.slane %v10891_v59, 7  ;;  %v5770_v19 = vrot.slane %v5767_v56, 7  ;;  %v3326_v40 = vsel %vm399_vm2, %v3316_v18, 0  ;;  %v7826_v13 = vld [vmem:[%s12078_s7 + $0x11] sm:$0x1] }
 0x4f1   : > { %8971 = vmatprep.subr.bf16.mxu1 %v9757_v20  ;;  %8975 = vmatprep.mubr.msk.bf16.mxu1 %vm9758_vm9, %v9757_v20 }
 0x4f2   : > { %v5772_v30 = vsel %vm2294_vm12, %v5770_v19, %v5771_v1  ;;  %v5774_v49 = vsel %vm2294_vm12, %v5771_v1, %v5773_v47  ;;  %v5834_v19 = vshrl.u32 %v5767_v56, 16  ;;  %v3390_v56 = vsel %vm2210_vm11, %v10453_v38, %v10322_v7 }
 0x4f3   : > { %v5781_v10 = vsel %vm399_vm2, %v5772_v30, 0 }
 0x4f4   : > { %v5836_v30 = vrot.slane %v5834_v19, 7 }
 0x4f7   : > { %8634 = vmatpush3.bf16.xpose.msra.mxu0 %v3264_v31  ;;  %v3379_v31 = vshll.u32 %v3309_v39, 16 }
 0x4f8   : > { %8972 = vmatpush3.bf16.xpose.msra.mxu1 %v5719_v53  ;;  %8639 = vmatprep.subr.bf16.mxu0 %v9757_v20  ;;  %v3318_v53 = vsel %vm540_vm1, %v3315_v22, %v3317_v62  ;;  %v11235_v22 = vld [vmem:[#allocation3 + $0x30] sm:$0x7f] }
 0x4f9   : > { %8973 = vmatprep.subr.bf16.mxu1 %v9757_v20  ;;  %v3381_v14 = vrot.slane %v3379_v31, 7  ;;  %v3329_v42 = vsel %vm399_vm2, %v3318_v53, 0  ;;  %v3392_v18 = vshrl.u32 %v11235_v22, 16  ;;  %v7894_v62 = vld [vmem:[%s12078_s7 + $0x33] sm:$0x1]  ;;  %v3407_v31 = vsel %vm399_vm2, %v3390_v56, 0 }
 0x4fb   : > { %v3382_v39 = vor.u32 %v3381_v14, %v3378_v36 }
 0x4fe   : > { %8636 = vmatmul.mubr.msk.bf16.vlgmr.msra.gmra.mrb[48].mxu0 %vm399_vm2, %v7824_v33  ;;  %v5784_v33 = vsel %vm399_vm2, %v5774_v49, 0 }
 0x4ff   : > { %8640 = vmatpush3.bf16.xpose.msra.mxu0 %v3323_v12  ;;  %8645 = vmatprep.mubr.msk.bf16.mxu0 %vm9758_vm9, %v9757_v20  ;;  %v3386_v12 = vsel %vm2210_vm11, %v3382_v39, %v10453_v38  ;;  %v5844_v38 = vshrl.u32 %v11254_v27, 16 }
 0x500   : > { %8974 = vmatpush3.bf16.xpose.msra.mxu1 %v5722_v23  ;;  %8641 = vmatprep.subr.bf16.mxu0 %v9757_v20  ;;  %v5776_v23 = vsel %vm2294_vm12, %v5773_v47, %v5775_v15  ;;  %v3404_v1 = vsel %vm399_vm2, %v3386_v12, 0  ;;  %v5839_v47 = vsel %vm2358_vm15, %v5836_v30, %v10480_v0  ;;  %v3459_v15 = vrot.slane %v10872_v46, 7 }
 0x501   : > { %8979 = vmatprep.subr.bf16.mxu1 %v9757_v20  ;;  %v5787_v2 = vsel %vm399_vm2, %v5776_v23, 0  ;;  %v5855_v53 = vsel %vm399_vm2, %v5839_v47, 0  ;;  %v5846_v36 = vrot.slane %v5844_v38, 7  ;;  %v7830_v47 = vld [vmem:[%s12078_s7 + $0x13] sm:$0x1] }
 0x507   : > { %8642 = vmatpush3.bf16.xpose.msra.mxu0 %v3326_v40  ;;  %8976 = vmatmul.mubr.msk.bf16.vlgmr.msra.gmra.mrb[16].mxu1 %vm399_vm2, %v7892_v41  ;;  %v3395_v41 = vshll.u32 %v11235_v22, 16  ;;  %v3394_v40 = vrot.slane %v3392_v18, 6  ;;  %v5909_v18 = vsel %vm399_vm2, %v10891_v59, 0  ;;  %v5911_v59 = vsel %vm399_vm2, %v11040_v45, 0 }
 0x508   : > { %8980 = vmatpush3.bf16.xpose.msra.mxu1 %v5781_v10  ;;  %8643 = vmatprep.subr.bf16.mxu0 %v9757_v20 }
 0x509   : > { %8981 = vmatprep.subr.bf16.mxu1 %v9757_v20  ;;  %8985 = vmatprep.mubr.msk.bf16.mxu1 %vm9758_vm9, %v9757_v20  ;;  %v3397_v10 = vrot.slane %v3395_v41, 7  ;;  %v3463_v41 = vrot.slane %v11235_v22, 7 }
 0x50b   : > { %v3398_v49 = vor.u32 %v3397_v10, %v3394_v40  ;;  %v11303_v40 = vld [vmem:[#allocation3 + $0x30] sm:$0xff] }
 0x50c   : > { %v5965_v22 = vshll.u32 %v11303_v40, 16  ;;  %v5963_v38 = vshrl.u32 %v11303_v40, 16 }
 0x50d   : > { %v3399_v0 = vsel %vm2210_vm11, %v10322_v7, %v3398_v49  ;;  %v7828_v7 = vld [vmem:[%s12078_s7 + $0x12] sm:$0x1] }
 0x50e   : > { %v3410_v14 = vsel %vm399_vm2, %v3399_v0, 0  ;;  %v11320_v0 = vshll.u32 %v11040_v45, 16 }
 0x50f   : > { %8644 = vmatpush3.bf16.xpose.msra.mxu0 %v3329_v42  ;;  %v3455_v42 = vld [vmem:[#allocation3 + $0x18] sm:$0x80] }
 0x510   : > { %8982 = vmatpush3.bf16.xpose.msra.mxu1 %v5784_v33  ;;  %8649 = vmatprep.subr.bf16.mxu0 %v9757_v20  ;;  %v5847_v33 = vshll.u32 %v11254_v27, 16  ;;  %v3522_v56 = vshrl.u32 %v3455_v42, 16 }
 0x511   : > { %8983 = vmatprep.subr.bf16.mxu1 %v9757_v20 }
 0x512   : > { %v5849_v39 = vor.u32 %v5847_v33, %v5846_v36  ;;  %v5913_v36 = vsel %vm399_vm2, %v11254_v27, 0  ;;  %v3534_v33 = vrot.slane %v5963_v38, 7 }
 0x514   : > { %v5850_v23 = vsel %vm2358_vm15, %v4690_v8, %v5849_v39  ;;  %v7896_v8 = vld [vmem:[%s12078_s7 + $0x34] sm:$0x1] }
 0x515   : > { %v5861_v46 = vsel %vm399_vm2, %v5850_v23, 0 }
 0x516   : > { %8646 = vmatmul.mubr.msk.bf16.vlgmr.msra.gmra.mrb[48].mxu0 %vm399_vm2, %v7826_v13  ;;  %v3458_v13 = vrot.slane %v3455_v42, 7  ;;  %v5972_v42 = vrot.slane %v11320_v0, 1 }
 0x517   : > { %8650 = vmatpush3.bf16.xpose.msra.mxu0 %v3404_v1  ;;  %8655 = vmatprep.mubr.msk.bf16.mxu0 %vm9758_vm9, %v9757_v20  ;;  %v11282_v1 = vld [vmem:[#allocation3 + $0x28] sm:$0xff] }
 0x518   : > { %8984 = vmatpush3.bf16.xpose.msra.mxu1 %v5787_v2  ;;  %8651 = vmatprep.subr.bf16.mxu0 %v9757_v20  ;;  %v3460_v12 = vsel %vm2294_vm12, %v3458_v13, %v3459_v15  ;;  %v3461_v19 = vrot.slane %v11282_v1, 7 }
 0x519   : > { %8989 = vmatprep.subr.bf16.mxu1 %v9757_v20 }
 0x51a   : > { %v3462_v34 = vsel %vm2294_vm12, %v3459_v15, %v3461_v19  ;;  %v3464_v30 = vsel %vm2294_vm12, %v3461_v19, %v3463_v41  ;;  %v7898_v15 = vld [vmem:[%s12078_s7 + $0x35] sm:$0x1] }
 0x51b   : > { %v3472_v2 = vsel %vm399_vm2, %v3462_v34, 0  ;;  %v3475_v10 = vsel %vm399_vm2, %v3464_v30, 0  ;;  %v7832_v30 = vld [vmem:[%s12078_s7 + $0x14] sm:$0x1] }
 0x51f   : > { %8652 = vmatpush3.bf16.xpose.msra.mxu0 %v3407_v31  ;;  %8986 = vmatmul.mubr.msk.bf16.vlgmr.msra.gmra.mrb[16].mxu1 %vm399_vm2, %v7894_v62  ;;  %v3524_v62 = vrot.slane %v3522_v56, 7 }
 0x520   : > { %8990 = vmatpush3.bf16.xpose.msra.mxu1 %v5855_v53  ;;  %8653 = vmatprep.subr.bf16.mxu0 %v9757_v20  ;;  %v5967_v53 = vrot.slane %v5965_v22, 1 }
 0x521   : > { %8991 = vmatprep.subr.bf16.mxu1 %v9757_v20  ;;  %8995 = vmatprep.mubr.msk.bf16.mxu1 %vm9758_vm9, %v9757_v20  ;;  %v3527_v31 = vsel %vm2358_vm15, %v3524_v62, %v10557_v48 }
 0x522   : > { %v3543_v49 = vsel %vm399_vm2, %v3527_v31, 0  ;;  %v5968_v48 = vor.u32 %v5967_v53, %v5963_v38  ;;  %v6051_v31 = vrot.slane %v11040_v45, 1  ;;  %v7900_v53 = vld [vmem:[%s12078_s7 + $0x36] sm:$0x1]  ;;  %v3646_v38 = vld [vmem:[#allocation3 + $0x20] sm:$0xff] }
 0x524   : > { %v5973_v27 = vsel %vm2488_vm0, %v5968_v48, %v5972_v42 }
 0x525   : > { %v5994_v13 = vsel %vm399_vm2, %v5973_v27, 0 }
 0x527   : > { %8654 = vmatpush3.bf16.xpose.msra.mxu0 %v3410_v14  ;;  %v11327_v14 = vld [vmem:[#allocation3 + $0x40] sm:$0xff] }
 0x528   : > { %8992 = vmatpush3.bf16.xpose.msra.mxu1 %v10513_v24  ;;  %8659 = vmatprep.subr.bf16.mxu0 %v9757_v20  ;;  %v3469_v24 = vsel %vm399_vm2, %v3460_v12, 0  ;;  %v11336_v39 = vshll.u32 %v11327_v14, 16  ;;  %v11343_v12 = vshrl.u32 %v11040_v45, 16 }
 0x529   : > { %8993 = vmatprep.subr.bf16.mxu1 %v9757_v20 }
 0x52a   : > { %v5980_v23 = vrot.slane %v11336_v39, 1 }
 0x52e   : > { %8656 = vmatmul.mubr.msk.bf16.vlgmr.msra.gmra.mrb[48].mxu0 %vm399_vm2, %v7828_v7  ;;  %v3537_v7 = vor.u32 %v5965_v22, %v3534_v33  ;;  %v6053_v33 = vrot.slane %v11327_v14, 1 }
 0x52f   : > { %8660 = vmatpush3.bf16.xpose.msra.mxu0 %v3469_v24  ;;  %8665 = vmatprep.mubr.msk.bf16.mxu0 %vm9758_vm9, %v9757_v20 }
 0x530   : > { %8994 = vmatpush3.bf16.xpose.msra.mxu1 %v5861_v46  ;;  %8661 = vmatprep.subr.bf16.mxu0 %v9757_v20  ;;  %v3538_v24 = vsel %vm2358_vm15, %v10439_v28, %v3537_v7  ;;  %v5961_v46 = vld [vmem:[#allocation3 + $0x48] sm:$0x1]  ;;  %v6054_v27 = vsel %vm2577_vm3, %v6051_v31, %v6053_v33  ;;  %v3601_v7 = vsel %vm399_vm2, %v11303_v40, 0 }
 0x531   : > { %8999 = vmatprep.subr.bf16.mxu1 %v9757_v20  ;;  %v3549_v34 = vsel %vm399_vm2, %v3538_v24, 0  ;;  %v6055_v24 = vrot.slane %v5961_v46, 1 }
 0x533   : > { %v6056_v40 = vsel %vm2577_vm3, %v6053_v33, %v6055_v24 }
 0x537   : > { %8662 = vmatpush3.bf16.xpose.msra.mxu0 %v3472_v2  ;;  %8996 = vmatmul.mubr.msk.bf16.vlgmr.msra.gmra.mrb[16].mxu1 %vm399_vm2, %v7896_v8  ;;  %v11355_v8 = vshrl.u32 %v11327_v14, 16  ;;  %v5986_v2 = vshll.u32 %v5961_v46, 16  ;;  %v6121_v46 = vrot.slane %v11343_v12, 1 }
 0x538   : > { %9000 = vmatpush3.bf16.xpose.msra.mxu1 %v5909_v18  ;;  %8663 = vmatprep.subr.bf16.mxu0 %v9757_v20 }
 0x539   : > { %9001 = vmatprep.subr.bf16.mxu1 %v9757_v20  ;;  %9005 = vmatprep.mubr.msk.bf16.mxu1 %vm9758_vm9, %v9757_v20  ;;  %v5984_v41 = vor.u32 %v11355_v8, %v5980_v23  ;;  %v5988_v28 = vrot.slane %v5986_v2, 1  ;;  %v7834_v2 = vld [vmem:[%s12078_s7 + $0x15] sm:$0x1] }
 0x53b   : > { %v5989_v56 = vsel %vm2488_vm0, %v5984_v41, %v5988_v28 }
 0x53c   : > { %v6000_v62 = vsel %vm399_vm2, %v5989_v56, 0 }
 0x53f   : > { %8664 = vmatpush3.bf16.xpose.msra.mxu0 %v3475_v10  ;;  %v6045_v10 = vld [vmem:[#allocation3 + $0x30] sm:$0xfe] }
 0x540   : > { %9002 = vmatpush3.bf16.xpose.msra.mxu1 %v5911_v59  ;;  %8669 = vmatprep.subr.bf16.mxu0 %v9757_v20  ;;  %v9683_v59 = vld [vmem:[#allocation3 + $0x20] sm:$0xff] }
 0x541   : > { %9003 = vmatprep.subr.bf16.mxu1 %v9757_v20  ;;  %v3597_v22 = vsel %vm399_vm2, %v9683_v59, 0 }
 0x546   : > { %8666 = vmatmul.mubr.msk.bf16.vlgmr.msra.gmra.mrb[48].mxu0 %vm399_vm2, %v7830_v47  ;;  %v6050_v47 = vrot.slane %v6045_v10, 1 }
 0x547   : > { %8670 = vmatpush3.bf16.xpose.msra.mxu0 %v3543_v49  ;;  %8675 = vmatprep.mubr.msk.bf16.mxu0 %vm9758_vm9, %v9757_v20 }
 0x548   : > { %9004 = vmatpush3.bf16.xpose.msra.mxu1 %v5913_v36  ;;  %8671 = vmatprep.subr.bf16.mxu0 %v9757_v20  ;;  %v6052_v49 = vsel %vm2577_vm3, %v6050_v47, %v6051_v31  ;;  %v3599_v36 = vsel %vm399_vm2, %v11282_v1, 0  ;;  %v6125_v31 = vrot.slane %v11355_v8, 1 }
 0x549   : > { %9009 = vmatprep.subr.bf16.mxu1 %v9757_v20  ;;  %v6061_v48 = vsel %vm399_vm2, %v6052_v49, 0 }
 0x54f   : > { %8672 = vmatpush3.bf16.xpose.msra.mxu0 %v10596_v9  ;;  %9006 = vmatmul.mubr.msk.bf16.vlgmr.msra.gmra.mrb[16].mxu1 %vm399_vm2, %v7898_v15  ;;  %v5976_v9 = vor.u32 %v11343_v12, %v5972_v42  ;;  %v3653_v42 = vshll.u32 %v3646_v38, 16 }
 0x550   : > { %9010 = vmatpush3.bf16.xpose.msra.mxu1 %v5994_v13  ;;  %8673 = vmatprep.subr.bf16.mxu0 %v9757_v20  ;;  %v3651_v13 = vshrl.u32 %v3646_v38, 16  ;;  %v11416_v38 = vld [vmem:[#allocation3 + $0x48] sm:$0x3] }
 0x551   : > { %9011 = vmatprep.subr.bf16.mxu1 %v9757_v20  ;;  %9015 = vmatprep.mubr.msk.bf16.mxu1 %vm9758_vm9, %v9757_v20  ;;  %v5981_v19 = vsel %vm2488_vm0, %v5976_v9, %v5980_v23  ;;  %v3655_v15 = vrot.slane %v3653_v42, 1  ;;  %v6064_v23 = vsel %vm399_vm2, %v6054_v27, 0  ;;  %v6130_v42 = vshrl.u32 %v11416_v38, 16 }
 0x552   : > { %v5997_v18 = vsel %vm399_vm2, %v5981_v19, 0  ;;  %v6114_v19 = vshrl.u32 %v6045_v10, 16  ;;  %v6133_v33 = vshll.u32 %v11416_v38, 16 }
 0x553   : > { %v3656_v9 = vor.u32 %v3655_v15, %v3651_v13  ;;  %v3733_v13 = vld [vmem:[#allocation3 + $0x20] sm:$0xfe] }
 0x554   : > { %v6116_v41 = vrot.slane %v6114_v19, 1  ;;  %v3738_v19 = vrot.slane %v3733_v13, 1 }
 0x557   : > { %8674 = vmatpush3.bf16.xpose.msra.mxu0 %v3549_v34  ;;  %v6117_v34 = vshll.u32 %v6045_v10, 16  ;;  %v6067_v10 = vsel %vm399_vm2, %v6056_v40, 0 }
 0x558   : > { %9012 = vmatpush3.bf16.xpose.msra.mxu1 %v5997_v18  ;;  %8679 = vmatprep.subr.bf16.mxu0 %v9757_v20  ;;  %v3661_v18 = vsel %vm2488_vm0, %v3656_v9, %v10552_v51 }
 0x559   : > { %9013 = vmatprep.subr.bf16.mxu1 %v9757_v20  ;;  %v6119_v28 = vrot.slane %v6117_v34, 2  ;;  %v3682_v56 = vsel %vm399_vm2, %v3661_v18, 0  ;;  %v3739_v34 = vrot.slane %v11282_v1, 1 }
 0x55b   : > { %v6120_v51 = vor.u32 %v6119_v28, %v6116_v41  ;;  %v3740_v18 = vsel %vm2577_vm3, %v3738_v19, %v3739_v34  ;;  %v6193_v41 = vld [vmem:[#allocation3 + $0x30] sm:$0xfc] }
 0x55c   : > { %v3749_v28 = vsel %vm399_vm2, %v3740_v18, 0 }
 0x55e   : > { %8676 = vmatmul.mubr.msk.bf16.vlgmr.msra.gmra.mrb[48].mxu0 %vm399_vm2, %v7832_v30  ;;  %v6122_v30 = vrot.slane %v11320_v0, 2 }
 0x55f   : > { %8680 = vmatpush3.bf16.xpose.msra.mxu0 %v3597_v22  ;;  %8685 = vmatprep.mubr.msk.bf16.mxu0 %vm9758_vm9, %v9757_v20  ;;  %v11407_v22 = vld [vmem:[#allocation3 + $0x38] sm:$0x1] }
 0x560   : > { %9014 = vmatpush3.bf16.xpose.msra.mxu1 %v6000_v62  ;;  %8681 = vmatprep.subr.bf16.mxu0 %v9757_v20  ;;  %v6123_v59 = vor.u32 %v6122_v30, %v6121_v46  ;;  %v7902_v62 = vld [vmem:[%s12078_s7 + $0x37] sm:$0x1]  ;;  %v3674_v49 = vshll.u32 %v11407_v22, 16 }
 0x561   : > { %9019 = vmatprep.subr.bf16.mxu1 %v9757_v20  ;;  %v11443_v30 = vld [vmem:[#allocation3 + $0x30] sm:$0xff] }
 0x562   : > { %v6124_v47 = vsel %vm12083_vm4, %v6120_v51, %v6123_v59  ;;  %v3676_v15 = vrot.slane %v3674_v49, 1  ;;  %v6197_v51 = vrot.slane %v11040_v45, 2  ;;  %v3743_v49 = vrot.slane %v11407_v22, 1 }
 0x563   : > { %v3802_v45 = vshrl.u32 %v3733_v13, 16 }
 0x567   : > { %8682 = vmatpush3.bf16.xpose.msra.mxu0 %v3599_v36  ;;  %9016 = vmatmul.mubr.msk.bf16.vlgmr.msra.gmra.mrb[16].mxu1 %vm399_vm2, %v7900_v53  ;;  %v6126_v53 = vrot.slane %v11336_v39, 2  ;;  %v6142_v36 = vsel %vm399_vm2, %v6124_v47, 0 }
 0x568   : > { %9020 = vmatpush3.bf16.xpose.msra.mxu1 %v6061_v48  ;;  %8683 = vmatprep.subr.bf16.mxu0 %v9757_v20 }
 0x569   : > { %9021 = vmatprep.subr.bf16.mxu1 %v9757_v20  ;;  %9025 = vmatprep.mubr.msk.bf16.mxu1 %vm9758_vm9, %v9757_v20  ;;  %v6127_v48 = vor.u32 %v6126_v53, %v6125_v31 }
 0x56b   : > { %v6128_v27 = vsel %vm12083_vm4, %v6123_v59, %v6127_v48 }
 0x56c   : > { %v6145_v24 = vsel %vm399_vm2, %v6128_v27, 0 }
 0x56f   : > { %8684 = vmatpush3.bf16.xpose.msra.mxu0 %v3601_v7  ;;  %v6132_v7 = vrot.slane %v6130_v42, 1 }
 0x570   : > { %9022 = vmatpush3.bf16.xpose.msra.mxu1 %v6064_v23  ;;  %8689 = vmatprep.subr.bf16.mxu0 %v9757_v20  ;;  %v6135_v23 = vrot.slane %v6133_v33, 2  ;;  %v3804_v33 = vrot.slane %v3802_v45, 1  ;;  %v6272_v45 = vrot.slane %v11336_v39, 3 }
 0x571   : > { %9023 = vmatprep.subr.bf16.mxu1 %v9757_v20 }
 0x576   : > { %8686 = vmatmul.mubr.msk.bf16.vlgmr.msra.gmra.mrb[48].mxu0 %vm399_vm2, %v7834_v2  ;;  %v6136_v2 = vor.u32 %v6135_v23, %v6132_v7  ;;  %v6201_v7 = vrot.slane %v11416_v38, 2  ;;  %v6260_v23 = vshrl.u32 %v6193_v41, 16  ;;  %v11480_v38 = vld [vmem:[#allocation3 + $0x38] sm:$0x3] }
 0x577   : > { %8690 = vmatpush3.bf16.xpose.msra.mxu0 %v3682_v56  ;;  %8695 = vmatprep.mubr.msk.bf16.mxu0 %vm9758_vm9, %v9757_v20  ;;  %v3741_v56 = vrot.slane %v11443_v30, 1 }
 0x578   : > { %9024 = vmatpush3.bf16.xpose.msra.mxu1 %v6067_v10  ;;  %8691 = vmatprep.subr.bf16.mxu0 %v9757_v20  ;;  %v6137_v40 = vsel %vm12083_vm4, %v6127_v48, %v6136_v2  ;;  %v6196_v10 = vrot.slane %v6193_v41, 2  ;;  %v6199_v48 = vrot.slane %v11327_v14, 2 }
 0x579   : > { %9029 = vmatprep.subr.bf16.mxu1 %v9757_v20  ;;  %v6148_v46 = vsel %vm399_vm2, %v6137_v40, 0  ;;  %v3742_v59 = vsel %vm2577_vm3, %v3739_v34, %v3741_v56  ;;  %v3744_v42 = vsel %vm2577_vm3, %v3741_v56, %v3743_v49  ;;  %v6267_v34 = vrot.slane %v11343_v12, 2 }
 0x57a   : > { %v6198_v47 = vsel %vm1408_vm8, %v6196_v10, %v6197_v51  ;;  %v3752_v31 = vsel %vm399_vm2, %v3742_v59, 0  ;;  %v3755_v22 = vsel %vm399_vm2, %v3744_v42, 0  ;;  %v6202_v2 = vsel %vm1408_vm8, %v6199_v48, %v6201_v7 }
 0x57b   : > { %v6207_v53 = vsel %vm399_vm2, %v6198_v47, 0  ;;  %v6268_v40 = vrot.slane %v11320_v0, 3  ;;  %v3821_v56 = vshll.u32 %v11480_v38, 16  ;;  %v3816_v59 = vsel %vm12083_vm4, %v10740_v52, %v10650_v43 }
 0x57c   : > { %v6271_v49 = vrot.slane %v11355_v8, 2 }
 0x57d   : > { %v3823_v47 = vrot.slane %v3821_v56, 2 }
 0x57f   : > { %8692 = vmatpush3.bf16.xpose.msra.mxu0 %v10580_v63  ;;  %9026 = vmatmul.mubr.msk.bf16.vlgmr.msra.gmra.mrb[16].mxu1 %vm399_vm2, %v7902_v62  ;;  %v3677_v63 = vsel %vm2488_vm0, %v10585_v6, %v3676_v15  ;;  %v7836_v6 = vld [vmem:[%s12078_s7 + $0x16] sm:$0x1]  ;;  %v7904_v62 = vld [vmem:[%s12078_s7 + $0x38] sm:$0x1] }
 0x580   : > { %9030 = vmatpush3.bf16.xpose.msra.mxu1 %v6142_v36  ;;  %8693 = vmatprep.subr.bf16.mxu0 %v9757_v20  ;;  %v3688_v9 = vsel %vm399_vm2, %v3677_v63, 0  ;;  %v3805_v36 = vshll.u32 %v3733_v13, 16  ;;  %v6200_v63 = vsel %vm1408_vm8, %v6197_v51, %v6199_v48  ;;  %v6269_v51 = vor.u32 %v6268_v40, %v6267_v34  ;;  %v6339_v40 = vld [vmem:[#allocation3 + $0x30] sm:$0xf8] }
 0x581   : > { %9031 = vmatprep.subr.bf16.mxu1 %v9757_v20  ;;  %9035 = vmatprep.mubr.msk.bf16.mxu1 %vm9758_vm9, %v9757_v20  ;;  %v6210_v27 = vsel %vm399_vm2, %v6200_v63, 0  ;;  %v3833_v48 = vsel %vm399_vm2, %v3816_v59, 0  ;;  %v3885_v34 = vrot.slane %v11282_v1, 2  ;;  %v6342_v56 = vrot.slane %v6339_v40, 3 }
 0x582   : > { %v3807_v15 = vrot.slane %v3805_v36, 2  ;;  %v11500_v36 = vld [vmem:[#allocation3 + $0x48] sm:$0x7] }
 0x583   : > { %v6279_v63 = vshll.u32 %v11500_v36, 16 }
 0x584   : > { %v3808_v13 = vor.u32 %v3807_v15, %v3804_v33  ;;  %v6273_v33 = vor.u32 %v6272_v45, %v6271_v49  ;;  %v6276_v15 = vshrl.u32 %v11500_v36, 16  ;;  %v3889_v49 = vrot.slane %v11480_v38, 2 }
 0x586   : > { %v3812_v19 = vsel %vm12083_vm4, %v3808_v13, %v10740_v52  ;;  %v3881_v13 = vld [vmem:[#allocation3 + $0x20] sm:$0xfc]  ;;  %v6278_v7 = vrot.slane %v6276_v15, 2 }
 0x587   : > { %8694 = vmatpush3.bf16.xpose.msra.mxu0 %v3688_v9  ;;  %v6263_v9 = vshll.u32 %v6193_v41, 16  ;;  %v3830_v41 = vsel %vm399_vm2, %v3812_v19, 0  ;;  %v3884_v19 = vrot.slane %v3881_v13, 2  ;;  %v3948_v45 = vshrl.u32 %v3881_v13, 16 }
 0x588   : > { %9032 = vmatpush3.bf16.xpose.msra.mxu1 %v6145_v24  ;;  %8699 = vmatprep.subr.bf16.mxu0 %v9757_v20  ;;  %v7838_v24 = vld [vmem:[%s12078_s7 + $0x17] sm:$0x1] }
 0x589   : > { %9033 = vmatprep.subr.bf16.mxu1 %v9757_v20  ;;  %v6265_v18 = vrot.slane %v6263_v9, 3 }
 0x58e   : > { %8696 = vmatmul.mubr.msk.bf16.vlgmr.msra.gmra.mrb[48].mxu0 %vm399_vm2, %v7836_v6  ;;  %v6262_v6 = vrot.slane %v6260_v23, 2  ;;  %v6281_v23 = vrot.slane %v6279_v63, 3 }
 0x58f   : > { %8700 = vmatpush3.bf16.xpose.msra.mxu0 %v3749_v28  ;;  %8705 = vmatprep.mubr.msk.bf16.mxu0 %vm9758_vm9, %v9757_v20  ;;  %v6213_v28 = vsel %vm399_vm2, %v6202_v2, 0 }
 0x590   : > { %9034 = vmatpush3.bf16.xpose.msra.mxu1 %v6148_v46  ;;  %8701 = vmatprep.subr.bf16.mxu0 %v9757_v20  ;;  %v3818_v46 = vshrl.u32 %v11480_v38, 16  ;;  %v6266_v10 = vor.u32 %v6265_v18, %v6262_v6  ;;  %v6282_v2 = vor.u32 %v6281_v23, %v6278_v7  ;;  %v3886_v6 = vsel %vm1408_vm8, %v3884_v19, %v3885_v34 }
 0x591   : > { %9039 = vmatprep.subr.bf16.mxu1 %v9757_v20  ;;  %v6406_v7 = vshrl.u32 %v6339_v40, 16  ;;  %v6409_v23 = vshll.u32 %v6339_v40, 16  ;;  %v6413_v19 = vrot.slane %v11343_v12, 3 }
 0x592   : > { %v6283_v18 = vsel %vm2788_vm14, %v6273_v33, %v6282_v2 }
 0x593   : > { %v6408_v2 = vrot.slane %v6406_v7, 3 }
 0x597   : > { %8702 = vmatpush3.bf16.xpose.msra.mxu0 %v3752_v31  ;;  %9036 = vmatmul.mubr.msk.bf16.vlgmr.msra.gmra.mrb[16].mxu1 %vm399_vm2, %v7904_v62  ;;  %v3820_v62 = vrot.slane %v3818_v46, 1  ;;  %v7906_v31 = vld [vmem:[%s12078_s7 + $0x39] sm:$0x1]  ;;  %v3887_v46 = vrot.slane %v11443_v30, 2 }
 0x598   : > { %9040 = vmatpush3.bf16.xpose.msra.mxu1 %v6207_v53  ;;  %8703 = vmatprep.subr.bf16.mxu0 %v9757_v20  ;;  %v6270_v53 = vsel %vm2788_vm14, %v6266_v10, %v6269_v51  ;;  %v11531_v10 = vld [vmem:[#allocation3 + $0x38] sm:$0xff] }
 0x599   : > { %9041 = vmatprep.subr.bf16.mxu1 %v9757_v20  ;;  %9045 = vmatprep.mubr.msk.bf16.mxu1 %vm9758_vm9, %v9757_v20  ;;  %v6288_v52 = vsel %vm399_vm2, %v6270_v53, 0  ;;  %v3824_v42 = vor.u32 %v3823_v47, %v3820_v62  ;;  %v3888_v59 = vsel %vm1408_vm8, %v3885_v34, %v3887_v46  ;;  %v7908_v62 = vld [vmem:[%s12078_s7 + $0x3a] sm:$0x1] }
 0x59f   : > { %8704 = vmatpush3.bf16.xpose.msra.mxu0 %v3755_v22  ;;  %v3825_v22 = vsel %vm12083_vm4, %v10650_v43, %v3824_v42  ;;  %v7840_v43 = vld [vmem:[%s12078_s7 + $0x18] sm:$0x1]  ;;  %vm12090_vm4 = vcmask 1044480   ;;  %v3890_v42 = vsel %vm1408_vm8, %v3887_v46, %v3889_v49  ;;  %v6418_v49 = vrot.slane %v11336_v39, 4 }
 0x5a0   : > { %9042 = vmatpush3.bf16.xpose.msra.mxu1 %v6210_v27  ;;  %8709 = vmatprep.subr.bf16.mxu0 %v9757_v20  ;;  %v6274_v27 = vsel %vm2788_vm14, %v6269_v51, %v6273_v33  ;;  %v3836_v9 = vsel %vm399_vm2, %v3825_v22, 0  ;;  %v6343_v51 = vrot.slane %v11531_v10, 3  ;;  %v3950_v33 = vrot.slane %v3948_v45, 2  ;;  %v11584_v45 = vld [vmem:[#allocation3 + $0x48] sm:$0xf] }
 0x5a1   : > { %9043 = vmatprep.subr.bf16.mxu1 %v9757_v20  ;;  %v3901_v38 = vsel %vm399_vm2, %v3890_v42, 0 }
 0x5a2   : > { %v6344_v47 = vsel %vm12090_vm4, %v6342_v56, %v6343_v51 }
 0x5a3   : > { %v6353_v53 = vsel %vm399_vm2, %v6344_v47, 0  ;;  %v7910_v47 = vld [vmem:[%s12078_s7 + $0x3b] sm:$0x1] }
 0x5a6   : > { %8706 = vmatmul.mubr.msk.bf16.vlgmr.msra.gmra.mrb[48].mxu0 %vm399_vm2, %v7838_v24  ;;  %v6291_v24 = vsel %vm399_vm2, %v6274_v27, 0 }
 0x5a7   : > { %8710 = vmatpush3.bf16.xpose.msra.mxu0 %v3830_v41  ;;  %8715 = vmatprep.mubr.msk.bf16.mxu0 %vm9758_vm9, %v9757_v20  ;;  %v3895_v41 = vsel %vm399_vm2, %v3886_v6, 0  ;;  %v6414_v6 = vrot.slane %v11320_v0, 4 }
 0x5a8   : > { %9044 = vmatpush3.bf16.xpose.msra.mxu1 %v6213_v28  ;;  %8711 = vmatprep.subr.bf16.mxu0 %v9757_v20  ;;  %v6294_v28 = vsel %vm399_vm2, %v6283_v18, 0 }
 0x5a9   : > { %9049 = vmatprep.subr.bf16.mxu1 %v9757_v20  ;;  %v6415_v56 = vor.u32 %v6414_v6, %v6413_v19 }
 0x5af   : > { %8712 = vmatpush3.bf16.xpose.msra.mxu0 %v3833_v48  ;;  %9046 = vmatmul.mubr.msk.bf16.vlgmr.msra.gmra.mrb[16].mxu1 %vm399_vm2, %v7906_v31  ;;  %v3898_v31 = vsel %vm399_vm2, %v3888_v59, 0  ;;  %v3951_v48 = vshll.u32 %v3881_v13, 16  ;;  %v6347_v13 = vrot.slane %v11500_v36, 3  ;;  %v11564_v36 = vld [vmem:[#allocation3 + $0x38] sm:$0x7] }
 0x5b0   : > { %9050 = vmatpush3.bf16.xpose.msra.mxu1 %v6288_v52  ;;  %8713 = vmatprep.subr.bf16.mxu0 %v9757_v20  ;;  %v6345_v52 = vrot.slane %v11327_v14, 3 }
 0x5b1   : > { %9051 = vmatprep.subr.bf16.mxu1 %v9757_v20  ;;  %9055 = vmatprep.mubr.msk.bf16.mxu1 %vm9758_vm9, %v9757_v20  ;;  %v3953_v15 = vrot.slane %v3951_v48, 3 }
 0x5b2   : > { %v6346_v63 = vsel %vm12090_vm4, %v6343_v51, %v6345_v52  ;;  %v6348_v34 = vsel %vm12090_vm4, %v6345_v52, %v6347_v13  ;;  %v3962_v51 = vsel %vm2788_vm14, %v10836_v54, %v10747_v58 }
 0x5b3   : > { %v6356_v22 = vsel %vm399_vm2, %v6346_v63, 0  ;;  %v3954_v27 = vor.u32 %v3953_v15, %v3950_v33  ;;  %v6359_v40 = vsel %vm399_vm2, %v6348_v34, 0  ;;  %v3979_v48 = vsel %vm399_vm2, %v3962_v51, 0 }
 0x5b4   : > { %v6422_v33 = vshrl.u32 %v11584_v45, 16  ;;  %v6425_v15 = vshll.u32 %v11584_v45, 16 }
 0x5b6   : > { %v6427_v13 = vrot.slane %v6425_v15, 4 }
 0x5b7   : > { %8714 = vmatpush3.bf16.xpose.msra.mxu0 %v3836_v9  ;;  %v7842_v9 = vld [vmem:[%s12078_s7 + $0x19] sm:$0x1] }
 0x5b8   : > { %9052 = vmatpush3.bf16.xpose.msra.mxu1 %v6291_v24  ;;  %8719 = vmatprep.subr.bf16.mxu0 %v9757_v20  ;;  %v3958_v24 = vsel %vm2788_vm14, %v3954_v27, %v10836_v54  ;;  %v6424_v27 = vrot.slane %v6422_v33, 3 }
 0x5b9   : > { %9053 = vmatprep.subr.bf16.mxu1 %v9757_v20  ;;  %v3976_v18 = vsel %vm399_vm2, %v3958_v24, 0  ;;  %v4031_v24 = vrot.slane %v11282_v1, 3 }
 0x5ba   : > { %v6428_v19 = vor.u32 %v6427_v13, %v6424_v27  ;;  %v7846_v27 = vld [vmem:[%s12078_s7 + $0x1b] sm:$0x1] }
 0x5be   : > { %8716 = vmatmul.mubr.msk.bf16.vlgmr.msra.gmra.mrb[48].mxu0 %vm399_vm2, %v7840_v43  ;;  %v6411_v43 = vrot.slane %v6409_v23, 4 }
 0x5bf   : > { %8720 = vmatpush3.bf16.xpose.msra.mxu0 %v3895_v41  ;;  %8725 = vmatprep.mubr.msk.bf16.mxu0 %vm9758_vm9, %v9757_v20  ;;  %v3964_v41 = vshrl.u32 %v11564_v36, 16 }
 0x5c0   : > { %9054 = vmatpush3.bf16.xpose.msra.mxu1 %v6294_v28  ;;  %8721 = vmatprep.subr.bf16.mxu0 %v9757_v20  ;;  %v3967_v28 = vshll.u32 %v11564_v36, 16  ;;  %v6412_v46 = vor.u32 %v6411_v43, %v6408_v2  ;;  %v6485_v43 = vld [vmem:[#allocation3 + $0x30] sm:$0xf0] }
 0x5c1   : > { %9059 = vmatprep.subr.bf16.mxu1 %v9757_v20  ;;  %v3966_v59 = vrot.slane %v3964_v41, 2  ;;  %v6488_v41 = vrot.slane %v6485_v43, 4 }
 0x5c7   : > { %8722 = vmatpush3.bf16.xpose.msra.mxu0 %v3898_v31  ;;  %9056 = vmatmul.mubr.msk.bf16.vlgmr.msra.gmra.mrb[16].mxu1 %vm399_vm2, %v7908_v62  ;;  %v3969_v62 = vrot.slane %v3967_v28, 3  ;;  %v6416_v31 = vsel %vm2935_vm13, %v6412_v46, %v6415_v56  ;;  %v6489_v28 = vrot.slane %v11531_v10, 4 }
 0x5c8   : > { %9060 = vmatpush3.bf16.xpose.msra.mxu1 %v6353_v53  ;;  %8723 = vmatprep.subr.bf16.mxu0 %v9757_v20  ;;  %v6417_v53 = vrot.slane %v11355_v8, 3  ;;  %v6434_v54 = vsel %vm399_vm2, %v6416_v31, 0 }
 0x5c9   : > { %9061 = vmatprep.subr.bf16.mxu1 %v9757_v20  ;;  %9065 = vmatprep.mubr.msk.bf16.mxu1 %vm9758_vm9, %v9757_v20  ;;  %v3970_v52 = vor.u32 %v3969_v62, %v3966_v59  ;;  %v6490_v51 = vsel %vm689_vm5, %v6488_v41, %v6489_v28  ;;  %v4035_v62 = vrot.slane %v11564_v36, 3 }
 0x5ca   : > { %v6419_v42 = vor.u32 %v6418_v49, %v6417_v53  ;;  %v6491_v49 = vrot.slane %v11327_v14, 4 }
 0x5cb   : > { %v3971_v63 = vsel %vm2788_vm14, %v10747_v58, %v3970_v52  ;;  %v7844_v58 = vld [vmem:[%s12078_s7 + $0x1a] sm:$0x1] }
 0x5cc   : > { %v3982_v7 = vsel %vm399_vm2, %v3971_v63, 0  ;;  %v6429_v2 = vsel %vm2935_vm13, %v6419_v42, %v6428_v19  ;;  %v6492_v52 = vsel %vm689_vm5, %v6489_v28, %v6491_v49  ;;  %v6493_v63 = vrot.slane %v11584_v45, 4  ;;  %v11646_v45 = vld [vmem:[#allocation3 + $0x38] sm:$0xf] }
 0x5cd   : > { %v6502_v33 = vsel %vm399_vm2, %v6492_v52, 0  ;;  %v6560_v19 = vrot.slane %v11320_v0, 5  ;;  %v4173_v52 = vld [vmem:[#allocation3 + $0x20] sm:$0xf0] }
 0x5cf   : > { %8724 = vmatpush3.bf16.xpose.msra.mxu0 %v3901_v38  ;;  %v6420_v38 = vsel %vm2935_vm13, %v6415_v56, %v6419_v42  ;;  %v7912_v56 = vld [vmem:[%s12078_s7 + $0x3c] sm:$0x1] }
 0x5d0   : > { %9062 = vmatpush3.bf16.xpose.msra.mxu1 %v6356_v22  ;;  %8729 = vmatprep.subr.bf16.mxu0 %v9757_v20  ;;  %v4027_v22 = vld [vmem:[#allocation3 + $0x20] sm:$0xf8]  ;;  %v6437_v23 = vsel %vm399_vm2, %v6420_v38, 0  ;;  %v6552_v38 = vshrl.u32 %v6485_v43, 16 }
 0x5d1   : > { %9063 = vmatprep.subr.bf16.mxu1 %v9757_v20  ;;  %v4094_v31 = vshrl.u32 %v4027_v22, 16  ;;  %v4097_v53 = vshll.u32 %v4027_v22, 16 }
 0x5d3   : > { %v4096_v36 = vrot.slane %v4094_v31, 3 }
 0x5d6   : > { %8726 = vmatmul.mubr.msk.bf16.vlgmr.msra.gmra.mrb[48].mxu0 %vm399_vm2, %v7842_v9  ;;  %v4030_v9 = vrot.slane %v4027_v22, 3  ;;  %v6555_v22 = vshll.u32 %v6485_v43, 16  ;;  %v4113_v43 = vshll.u32 %v11646_v45, 16 }
 0x5d7   : > { %8730 = vmatpush3.bf16.xpose.msra.mxu0 %v3976_v18  ;;  %8735 = vmatprep.mubr.msk.bf16.mxu0 %vm9758_vm9, %v9757_v20  ;;  %v6440_v18 = vsel %vm399_vm2, %v6429_v2, 0  ;;  %v4110_v2 = vshrl.u32 %v11646_v45, 16 }
 0x5d8   : > { %9064 = vmatpush3.bf16.xpose.msra.mxu1 %v6359_v40  ;;  %8731 = vmatprep.subr.bf16.mxu0 %v9757_v20  ;;  %v4032_v34 = vsel %vm12090_vm4, %v4030_v9, %v4031_v24  ;;  %v4033_v40 = vrot.slane %v11443_v30, 3  ;;  %v6554_v9 = vrot.slane %v6552_v38, 4  ;;  %v4115_v28 = vrot.slane %v4113_v43, 4 }
 0x5d9   : > { %9069 = vmatprep.subr.bf16.mxu1 %v9757_v20  ;;  %v4041_v6 = vsel %vm399_vm2, %v4032_v34, 0  ;;  %v4112_v41 = vrot.slane %v4110_v2, 3  ;;  %v4176_v38 = vrot.slane %v4173_v52, 4  ;;  %v7916_v2 = vld [vmem:[%s12078_s7 + $0x3e] sm:$0x1] }
 0x5da   : > { %v4034_v46 = vsel %vm12090_vm4, %v4031_v24, %v4033_v40  ;;  %v6557_v24 = vrot.slane %v6555_v22, 5  ;;  %v4177_v22 = vrot.slane %v11282_v1, 4 }
 0x5db   : > { %v4044_v59 = vsel %vm399_vm2, %v4034_v46, 0  ;;  %v7914_v46 = vld [vmem:[%s12078_s7 + $0x3d] sm:$0x1]  ;;  %v4116_v31 = vor.u32 %v4115_v28, %v4112_v41  ;;  %v4240_v41 = vshrl.u32 %v4173_v52, 16  ;;  %v4243_v28 = vshll.u32 %v4173_v52, 16 }
 0x5df   : > { %8732 = vmatpush3.bf16.xpose.msra.mxu0 %v3979_v48  ;;  %9066 = vmatmul.mubr.msk.bf16.vlgmr.msra.gmra.mrb[16].mxu1 %vm399_vm2, %v7910_v47  ;;  %v6499_v47 = vsel %vm399_vm2, %v6490_v51, 0  ;;  %v4036_v48 = vsel %vm12090_vm4, %v4033_v40, %v4035_v62  ;;  %v4108_v40 = vsel %vm2935_vm13, %v10977_v3, %v10843_v37  ;;  %v6563_v51 = vrot.slane %v11355_v8, 4  ;;  %v11666_v62 = vld [vmem:[#allocation3 + $0x48] sm:$0x1f] }
 0x5e0   : > { %9070 = vmatpush3.bf16.xpose.msra.mxu1 %v6434_v54  ;;  %8733 = vmatprep.subr.bf16.mxu0 %v9757_v20  ;;  %v4099_v54 = vrot.slane %v4097_v53, 4  ;;  %v4047_v42 = vsel %vm399_vm2, %v4036_v48, 0  ;;  %v6571_v48 = vshll.u32 %v11666_v62, 16 }
 0x5e1   : > { %9071 = vmatprep.subr.bf16.mxu1 %v9757_v20  ;;  %9075 = vmatprep.mubr.msk.bf16.mxu1 %vm9758_vm9, %v9757_v20 }
 0x5e2   : > { %v4100_v15 = vor.u32 %v4099_v54, %v4096_v36  ;;  %v4117_v36 = vsel %vm2935_vm13, %v10843_v37, %v4116_v31  ;;  %v7848_v37 = vld [vmem:[%s12078_s7 + $0x1c] sm:$0x1] }
 0x5e4   : > { %v4104_v13 = vsel %vm2935_vm13, %v4100_v15, %v10977_v3  ;;  %v4128_v15 = vsel %vm399_vm2, %v4117_v36, 0 }
 0x5e7   : > { %8734 = vmatpush3.bf16.xpose.msra.mxu0 %v3982_v7  ;;  %v6559_v7 = vrot.slane %v11343_v12, 4 }
 0x5e8   : > { %9072 = vmatpush3.bf16.xpose.msra.mxu1 %v6437_v23  ;;  %8739 = vmatprep.subr.bf16.mxu0 %v9757_v20  ;;  %v6494_v23 = vsel %vm689_vm5, %v6491_v49, %v6493_v63  ;;  %v6568_v49 = vshrl.u32 %v11666_v62, 16 }
 0x5e9   : > { %9073 = vmatprep.subr.bf16.mxu1 %v9757_v20  ;;  %v6505_v34 = vsel %vm399_vm2, %v6494_v23, 0  ;;  %v6631_v23 = vld [vmem:[#allocation3 + $0x30] sm:$0xe0] }
 0x5ee   : > { %8736 = vmatmul.mubr.msk.bf16.vlgmr.msra.gmra.mrb[48].mxu0 %vm399_vm2, %v7844_v58  ;;  %v4122_v58 = vsel %vm399_vm2, %v4104_v13, 0  ;;  %v4178_v13 = vsel %vm689_vm5, %v4176_v38, %v4177_v22 }
 0x5ef   : > { %8740 = vmatpush3.bf16.xpose.msra.mxu0 %v4041_v6  ;;  %8745 = vmatprep.mubr.msk.bf16.mxu0 %vm9758_vm9, %v9757_v20  ;;  %v6558_v6 = vor.u32 %v6557_v24, %v6554_v9  ;;  %v4187_v9 = vsel %vm399_vm2, %v4178_v13, 0  ;;  %v4179_v24 = vrot.slane %v11443_v30, 4 }
 0x5f0   : > { %9074 = vmatpush3.bf16.xpose.msra.mxu1 %v6440_v18  ;;  %8741 = vmatprep.subr.bf16.mxu0 %v9757_v20  ;;  %v6561_v18 = vor.u32 %v6560_v19, %v6559_v7  ;;  %v6634_v19 = vrot.slane %v6631_v23, 5 }
 0x5f1   : > { %9079 = vmatprep.subr.bf16.mxu1 %v9757_v20 }
 0x5f7   : > { %8742 = vmatpush3.bf16.xpose.msra.mxu0 %v4044_v59  ;;  %9076 = vmatmul.mubr.msk.bf16.vlgmr.msra.gmra.mrb[16].mxu1 %vm399_vm2, %v7912_v56  ;;  %v6562_v56 = vsel %vm3082_vm6, %v6558_v6, %v6561_v18  ;;  %v6564_v59 = vrot.slane %v11336_v39, 5 }
 0x5f8   : > { %9080 = vmatpush3.bf16.xpose.msra.mxu1 %v6499_v47  ;;  %8743 = vmatprep.subr.bf16.mxu0 %v9757_v20  ;;  %v4125_v47 = vsel %vm399_vm2, %v4108_v40, 0  ;;  %v6580_v3 = vsel %vm399_vm2, %v6562_v56, 0  ;;  %v4181_v40 = vrot.slane %v11646_v45, 4 }
 0x5f9   : > { %9081 = vmatprep.subr.bf16.mxu1 %v9757_v20  ;;  %9085 = vmatprep.mubr.msk.bf16.mxu1 %vm9758_vm9, %v9757_v20  ;;  %v6565_v53 = vor.u32 %v6564_v59, %v6563_v51  ;;  %v4242_v51 = vrot.slane %v4240_v41, 4  ;;  %v4245_v59 = vrot.slane %v4243_v28, 5 }
 0x5fa   : > { %v4182_v56 = vsel %vm689_vm5, %v4179_v24, %v4181_v40 }
 0x5fb   : > { %v6566_v54 = vsel %vm3082_vm6, %v6561_v18, %v6565_v53  ;;  %v4193_v45 = vsel %vm399_vm2, %v4182_v56, 0  ;;  %v4246_v31 = vor.u32 %v4245_v59, %v4242_v51 }
 0x5fc   : > { %v6583_v63 = vsel %vm399_vm2, %v6566_v54, 0  ;;  %v6705_v54 = vrot.slane %v11343_v12, 5 }
 0x5fd   : > { %v4250_v36 = vsel %vm3082_vm6, %v4246_v31, %v11069_v60 }
 0x5ff   : > { %8744 = vmatpush3.bf16.xpose.msra.mxu0 %v4047_v42  ;;  %v6570_v42 = vrot.slane %v6568_v49, 4  ;;  %v6701_v49 = vshll.u32 %v6631_v23, 16 }
 0x600   : > { %9082 = vmatpush3.bf16.xpose.msra.mxu1 %v6502_v33  ;;  %8749 = vmatprep.subr.bf16.mxu0 %v9757_v20  ;;  %v6573_v33 = vrot.slane %v6571_v48, 5  ;;  %v7850_v48 = vld [vmem:[%s12078_s7 + $0x1d] sm:$0x1] }
 0x601   : > { %9083 = vmatprep.subr.bf16.mxu1 %v9757_v20 }
 0x606   : > { %8746 = vmatmul.mubr.msk.bf16.vlgmr.msra.gmra.mrb[48].mxu0 %vm399_vm2, %v7846_v27  ;;  %v6574_v27 = vor.u32 %v6573_v33, %v6570_v42  ;;  %v6703_v33 = vrot.slane %v6701_v49, 6 }
 0x607   : > { %8750 = vmatpush3.bf16.xpose.msra.mxu0 %v4122_v58  ;;  %8755 = vmatprep.mubr.msk.bf16.mxu0 %vm9758_vm9, %v9757_v20  ;;  %v6635_v58 = vrot.slane %v11531_v10, 5 }
 0x608   : > { %9084 = vmatpush3.bf16.xpose.msra.mxu1 %v6505_v34  ;;  %8751 = vmatprep.subr.bf16.mxu0 %v9757_v20  ;;  %v6575_v7 = vsel %vm3082_vm6, %v6565_v53, %v6574_v27  ;;  %v4180_v34 = vsel %vm689_vm5, %v4177_v22, %v4179_v24  ;;  %v6698_v53 = vshrl.u32 %v6631_v23, 16 }
 0x609   : > { %9089 = vmatprep.subr.bf16.mxu1 %v9757_v20  ;;  %v6586_v1 = vsel %vm399_vm2, %v6575_v7, 0  ;;  %v6636_v43 = vsel %vm1103_vm7, %v6634_v19, %v6635_v58  ;;  %v4190_v6 = vsel %vm399_vm2, %v4180_v34, 0  ;;  %v4254_v7 = vsel %vm3082_vm6, %v11069_v60, %v10984_v11  ;;  %v11748_v34 = vld [vmem:[#allocation3 + $0x48] sm:$0x3f] }
 0x60a   : > { %v6645_v18 = vsel %vm399_vm2, %v6636_v43, 0  ;;  %v6700_v42 = vrot.slane %v6698_v53, 5  ;;  %v6709_v19 = vrot.slane %v11355_v8, 5  ;;  %v6717_v40 = vshll.u32 %v11748_v34, 16 }
 0x60c   : > { %v6719_v51 = vrot.slane %v6717_v40, 6 }
 0x60f   : > { %8752 = vmatpush3.bf16.xpose.msra.mxu0 %v4125_v47  ;;  %9086 = vmatmul.mubr.msk.bf16.vlgmr.msra.gmra.mrb[16].mxu1 %vm399_vm2, %v7914_v46  ;;  %v6637_v46 = vrot.slane %v11327_v14, 5  ;;  %v6639_v14 = vrot.slane %v11666_v62, 5  ;;  %v11728_v62 = vld [vmem:[#allocation3 + $0x38] sm:$0x1f] }
 0x610   : > { %9090 = vmatpush3.bf16.xpose.msra.mxu1 %v6580_v3  ;;  %8753 = vmatprep.subr.bf16.mxu0 %v9757_v20  ;;  %v4256_v22 = vshrl.u32 %v11728_v62, 16  ;;  %v4259_v27 = vshll.u32 %v11728_v62, 16 }
 0x611   : > { %9091 = vmatprep.subr.bf16.mxu1 %v9757_v20  ;;  %9095 = vmatprep.mubr.msk.bf16.mxu1 %vm9758_vm9, %v9757_v20  ;;  %v6638_v47 = vsel %vm1103_vm7, %v6635_v58, %v6637_v46  ;;  %v6640_v52 = vsel %vm1103_vm7, %v6637_v46, %v6639_v14  ;;  %v6710_v58 = vrot.slane %v11336_v39, 6  ;;  %v4319_v46 = vld [vmem:[#allocation3 + $0x20] sm:$0xe0] }
 0x612   : > { %v6648_v3 = vsel %vm399_vm2, %v6638_v47, 0  ;;  %v6651_v38 = vsel %vm399_vm2, %v6640_v52, 0  ;;  %v4258_v23 = vrot.slane %v4256_v22, 4  ;;  %v4325_v52 = vrot.slane %v11443_v30, 5 }
 0x613   : > { %v4327_v22 = vrot.slane %v11728_v62, 5 }
 0x615   : > { %v4328_v62 = vsel %vm1103_vm7, %v4325_v52, %v4327_v22 }
 0x617   : > { %8754 = vmatpush3.bf16.xpose.msra.mxu0 %v4128_v15  ;;  %v6706_v15 = vrot.slane %v11320_v0, 6 }
 0x618   : > { %9092 = vmatpush3.bf16.xpose.msra.mxu1 %v6583_v63  ;;  %8759 = vmatprep.subr.bf16.mxu0 %v9757_v20  ;;  %v4268_v63 = vsel %vm399_vm2, %v4250_v36, 0 }
 0x619   : > { %9093 = vmatprep.subr.bf16.mxu1 %v9757_v20  ;;  %v6707_v13 = vor.u32 %v6706_v15, %v6705_v54 }
 0x61e   : > { %8756 = vmatmul.mubr.msk.bf16.vlgmr.msra.gmra.mrb[48].mxu0 %vm399_vm2, %v7848_v37  ;;  %v6704_v37 = vor.u32 %v6703_v33, %v6700_v42  ;;  %v6781_v33 = vrot.slane %v11531_v10, 6 }
 0x61f   : > { %8760 = vmatpush3.bf16.xpose.msra.mxu0 %v4187_v9  ;;  %8765 = vmatprep.mubr.msk.bf16.mxu0 %vm9758_vm9, %v9757_v20  ;;  %v4261_v9 = vrot.slane %v4259_v27, 5 }
 0x620   : > { %9094 = vmatpush3.bf16.xpose.msra.mxu1 %v6586_v1  ;;  %8761 = vmatprep.subr.bf16.mxu0 %v9757_v20  ;;  %v7918_v1 = vld [vmem:[%s12078_s7 + $0x3f] sm:$0x1]  ;;  %v6708_v24 = vsel %vm2051_vm10, %v6704_v37, %v6707_v13  ;;  %v4386_v37 = vshrl.u32 %v4319_v46, 16 }
 0x621   : > { %9099 = vmatprep.subr.bf16.mxu1 %v9757_v20  ;;  %v6726_v60 = vsel %vm399_vm2, %v6708_v24, 0  ;;  %v4262_v43 = vor.u32 %v4261_v9, %v4258_v23 }
 0x622   : > { %v4388_v9 = vrot.slane %v4386_v37, 5 }
 0x623   : > { %v4263_v41 = vsel %vm3082_vm6, %v10984_v11, %v4262_v43  ;;  %v7852_v11 = vld [vmem:[%s12078_s7 + $0x1e] sm:$0x1] }
 0x624   : > { %v4274_v59 = vsel %vm399_vm2, %v4263_v41, 0  ;;  %v6851_v41 = vrot.slane %v11343_v12, 6 }
 0x627   : > { %8762 = vmatpush3.bf16.xpose.msra.mxu0 %v4190_v6  ;;  %9096 = vmatmul.mubr.msk.bf16.vlgmr.msra.gmra.mrb[16].mxu1 %vm399_vm2, %v7916_v2  ;;  %v4271_v2 = vsel %vm399_vm2, %v4254_v7, 0  ;;  %v6711_v6 = vor.u32 %v6710_v58, %v6709_v19  ;;  %v11793_v7 = vld [vmem:[#allocation3 + $0x40] sm:$0xff]  ;;  %v4339_v19 = vsel %vm399_vm2, %v4328_v62, 0 }
 0x628   : > { %9100 = vmatpush3.bf16.xpose.msra.mxu1 %v6645_v18  ;;  %8763 = vmatprep.subr.bf16.mxu0 %v9757_v20  ;;  %v6714_v18 = vshrl.u32 %v11748_v34, 16  ;;  %v6783_v23 = vrot.slane %v11793_v7, 6 }
 0x629   : > { %9101 = vmatprep.subr.bf16.mxu1 %v9757_v20  ;;  %9105 = vmatprep.mubr.msk.bf16.mxu1 %vm9758_vm9, %v9757_v20  ;;  %v6712_v28 = vsel %vm2051_vm10, %v6707_v13, %v6711_v6  ;;  %v4389_v13 = vshll.u32 %v4319_v46, 16 }
 0x62a   : > { %v6716_v56 = vrot.slane %v6714_v18, 5  ;;  %v6729_v47 = vsel %vm399_vm2, %v6712_v28, 0  ;;  %v6784_v24 = vsel %vm540_vm1, %v6781_v33, %v6783_v23  ;;  %v7854_v18 = vld [vmem:[%s12078_s7 + $0x1f] sm:$0x1] }
 0x62b   : > { %v6794_v58 = vsel %vm399_vm2, %v6784_v24, 0 }
 0x62c   : > { %v6720_v14 = vor.u32 %v6719_v51, %v6716_v56  ;;  %v6852_v51 = vrot.slane %v11320_v0, 7 }
 0x62e   : > { %v6721_v49 = vsel %vm2051_vm10, %v6711_v6, %v6720_v14 }
 0x62f   : > { %8764 = vmatpush3.bf16.xpose.msra.mxu0 %v4193_v45  ;;  %v4322_v45 = vrot.slane %v4319_v46, 5  ;;  %v6732_v54 = vsel %vm399_vm2, %v6721_v49, 0 }
 0x630   : > { %9102 = vmatpush3.bf16.xpose.msra.mxu1 %v6648_v3  ;;  %8769 = vmatprep.subr.bf16.mxu0 %v9757_v20  ;;  %v11764_v3 = vld [vmem:[#allocation3 + $0x28] sm:$0xff] }
 0x631   : > { %9103 = vmatprep.subr.bf16.mxu1 %v9757_v20  ;;  %v4323_v31 = vrot.slane %v11764_v3, 5 }
 0x633   : > { %v4324_v53 = vsel %vm1103_vm7, %v4322_v45, %v4323_v31  ;;  %v4326_v15 = vsel %vm1103_vm7, %v4323_v31, %v4325_v52  ;;  %v6855_v52 = vrot.slane %v11355_v8, 6  ;;  %vm7493_vm7 = vcmask 386048  }
 0x634   : > { %v4333_v36 = vsel %vm399_vm2, %v4324_v53, 0  ;;  %v4336_v30 = vsel %vm399_vm2, %v4326_v15, 0  ;;  %v4400_v53 = vsel %vm2051_vm10, %v11156_v57, %v11076_v5 }
 0x635   : > { %v4417_v15 = vsel %vm399_vm2, %v4400_v53, 0 }
 0x636   : > { %8766 = vmatmul.mubr.msk.bf16.vlgmr.msra.gmra.mrb[48].mxu0 %vm399_vm2, %v7850_v48  ;;  %v6777_v48 = vld [vmem:[#allocation3 + $0x30] sm:$0xc0] }
 0x637   : > { %8770 = vmatpush3.bf16.xpose.msra.mxu0 %v4268_v63  ;;  %8775 = vmatprep.mubr.msk.bf16.mxu0 %vm9758_vm9, %v9757_v20  ;;  %v6780_v42 = vrot.slane %v6777_v48, 6  ;;  %v7920_v63 = vld [vmem:[%s12078_s7 + $0x40] sm:$0x1]  ;;  %v6844_v43 = vshrl.u32 %v6777_v48, 16  ;;  %v6847_v6 = vshll.u32 %v6777_v48, 16 }
 0x638   : > { %9104 = vmatpush3.bf16.xpose.msra.mxu1 %v6651_v38  ;;  %8771 = vmatprep.subr.bf16.mxu0 %v9757_v20 }
 0x639   : > { %9109 = vmatprep.subr.bf16.mxu1 %v9757_v20  ;;  %v6782_v38 = vsel %vm540_vm1, %v6780_v42, %v6781_v33  ;;  %v6846_v46 = vrot.slane %v6844_v43, 6  ;;  %v6849_v56 = vrot.slane %v6847_v6, 7  ;;  %v6856_v42 = vrot.slane %v11336_v39, 7  ;;  %v11834_v33 = vld [vmem:[#allocation3 + $0x48] sm:$0x7f] }
 0x63a   : > { %v6791_v27 = vsel %vm399_vm2, %v6782_v38, 0  ;;  %v6863_v22 = vshll.u32 %v11834_v33, 16  ;;  %v6923_v43 = vld [vmem:[#allocation3 + $0x30] sm:$0x80] }
 0x63b   : > { %v6850_v14 = vor.u32 %v6849_v56, %v6846_v46  ;;  %v6857_v38 = vor.u32 %v6856_v42, %v6855_v52  ;;  %v7924_v56 = vld [vmem:[%s12078_s7 + $0x42] sm:$0x1]  ;;  %v6990_v52 = vshrl.u32 %v6923_v43, 16 }
 0x63f   : > { %8772 = vmatpush3.bf16.xpose.msra.mxu0 %v4271_v2  ;;  %9106 = vmatmul.mubr.msk.bf16.vlgmr.msra.gmra.mrb[16].mxu1 %vm399_vm2, %v7918_v1  ;;  %v4391_v1 = vrot.slane %v4389_v13, 6 }
 0x640   : > { %9110 = vmatpush3.bf16.xpose.msra.mxu1 %v6726_v60  ;;  %8773 = vmatprep.subr.bf16.mxu0 %v9757_v20  ;;  %v6785_v60 = vrot.slane %v11748_v34, 6  ;;  %v11814_v34 = vld [vmem:[#allocation3 + $0x38] sm:$0x3f] }
 0x641   : > { %9111 = vmatprep.subr.bf16.mxu1 %v9757_v20  ;;  %9115 = vmatprep.mubr.msk.bf16.mxu1 %vm9758_vm9, %v9757_v20  ;;  %v4392_v2 = vor.u32 %v4391_v1, %v4388_v9  ;;  %v4402_v45 = vshrl.u32 %v11814_v34, 16  ;;  %v4405_v31 = vshll.u32 %v11814_v34, 16  ;;  %v9688_v1 = vld [vmem:[#allocation3 + $0x20] sm:$0xc0] }
 0x642   : > { %v6786_v28 = vsel %vm540_vm1, %v6783_v23, %v6785_v60  ;;  %v6865_v23 = vrot.slane %v6863_v22, 7  ;;  %v4468_v24 = vrot.slane %v9688_v1, 6  ;;  %v7002_v22 = vrot.slane %v10900_v44, 7 }
 0x643   : > { %v4396_v40 = vsel %vm2051_vm10, %v4392_v2, %v11156_v57  ;;  %v4404_v49 = vrot.slane %v4402_v45, 5  ;;  %v4407_v48 = vrot.slane %v4405_v31, 6  ;;  %v4473_v45 = vrot.slane %v11814_v34, 6 }
 0x644   : > { %v6929_v31 = vrot.slane %v11793_v7, 7  ;;  %v6931_v34 = vrot.slane %v11834_v33, 7 }
 0x647   : > { %8774 = vmatpush3.bf16.xpose.msra.mxu0 %v4274_v59  ;;  %v4414_v59 = vsel %vm399_vm2, %v4396_v40, 0 }
 0x648   : > { %9112 = vmatpush3.bf16.xpose.msra.mxu1 %v6729_v47  ;;  %8779 = vmatprep.subr.bf16.mxu0 %v9757_v20  ;;  %v6797_v47 = vsel %vm399_vm2, %v6786_v28, 0  ;;  %v6927_v28 = vrot.slane %v11531_v10, 7 }
 0x649   : > { %9113 = vmatprep.subr.bf16.mxu1 %v9757_v20 }
 0x64e   : > { %8776 = vmatmul.mubr.msk.bf16.vlgmr.msra.gmra.mrb[48].mxu0 %vm399_vm2, %v7852_v11  ;;  %v6853_v11 = vor.u32 %v6852_v51, %v6851_v41  ;;  %v6926_v41 = vrot.slane %v6923_v43, 7 }
 0x64f   : > { %8780 = vmatpush3.bf16.xpose.msra.mxu0 %v4333_v36  ;;  %8785 = vmatprep.mubr.msk.bf16.mxu0 %vm9758_vm9, %v9757_v20  ;;  %v7922_v36 = vld [vmem:[%s12078_s7 + $0x41] sm:$0x1] }
 0x650   : > { %9114 = vmatpush3.bf16.xpose.msra.mxu1 %v6732_v54  ;;  %8781 = vmatprep.subr.bf16.mxu0 %v9757_v20  ;;  %v6854_v54 = vsel %vm2210_vm11, %v6850_v14, %v6853_v11  ;;  %v6858_v37 = vsel %vm2210_vm11, %v6853_v11, %v6857_v38  ;;  %v6928_v51 = vsel %vm2294_vm12, %v6926_v41, %v6927_v28 }
 0x651   : > { %9119 = vmatprep.subr.bf16.mxu1 %v9757_v20  ;;  %v6872_v57 = vsel %vm399_vm2, %v6854_v54, 0  ;;  %v6875_v9 = vsel %vm399_vm2, %v6858_v37, 0  ;;  %v6930_v11 = vsel %vm2294_vm12, %v6927_v28, %v6929_v31  ;;  %v6993_v54 = vrot.slane %v11343_v12, 7 }
 0x657   : > { %8782 = vmatpush3.bf16.xpose.msra.mxu0 %v4336_v30  ;;  %9116 = vmatmul.mubr.msk.bf16.vlgmr.msra.gmra.mrb[16].mxu1 %vm399_vm2, %v7920_v63  ;;  %v4408_v63 = vor.u32 %v4407_v48, %v4404_v49  ;;  %v6860_v30 = vshrl.u32 %v11834_v33, 16  ;;  %v6940_v49 = vsel %vm399_vm2, %v6930_v11, 0  ;;  %v7858_v48 = vld [vmem:[%s12078_s7 + $0x21] sm:$0x1]  ;;  %v6992_v33 = vrot.slane %v6990_v52, 7 }
 0x658   : > { %9120 = vmatpush3.bf16.xpose.msra.mxu1 %v6791_v27  ;;  %8783 = vmatprep.subr.bf16.mxu0 %v9757_v20 }
 0x659   : > { %9121 = vmatprep.subr.bf16.mxu1 %v9757_v20  ;;  %9125 = vmatprep.mubr.msk.bf16.mxu1 %vm9758_vm9, %v9757_v20  ;;  %v4409_v27 = vsel %vm2051_vm10, %v11076_v5, %v4408_v63  ;;  %v6862_v13 = vrot.slane %v6860_v30, 6  ;;  %v7856_v5 = vld [vmem:[%s12078_s7 + $0x20] sm:$0x1] }
 0x65a   : > { %v4420_v62 = vsel %vm399_vm2, %v4409_v27, 0 }
 0x65f   : > { %8784 = vmatpush3.bf16.xpose.msra.mxu0 %v4339_v19  ;;  %v4469_v19 = vrot.slane %v11764_v3, 6 }
 0x660   : > { %9122 = vmatpush3.bf16.xpose.msra.mxu1 %v6794_v58  ;;  %8789 = vmatprep.subr.bf16.mxu0 %v9757_v20  ;;  %v6866_v58 = vor.u32 %v6865_v23, %v6862_v13  ;;  %v7928_v13 = vld [vmem:[%s12078_s7 + $0x44] sm:$0x1]  ;;  %v7065_v23 = vsel %vm399_vm2, %v11531_v10, 0 }
 0x661   : > { %9123 = vmatprep.subr.bf16.mxu1 %v9757_v20  ;;  %v4470_v2 = vsel %vm540_vm1, %v4468_v24, %v4469_v19 }
 0x662   : > { %v6867_v60 = vsel %vm2210_vm11, %v6857_v38, %v6866_v58  ;;  %v4479_v6 = vsel %vm399_vm2, %v4470_v2, 0  ;;  %v6996_v38 = vrot.slane %v11355_v8, 7  ;;  %v7005_v8 = vor.u32 %v10903_v4, %v7002_v22 }
 0x663   : > { %v6878_v3 = vsel %vm399_vm2, %v6867_v60, 0 }
 0x664   : > { %v6997_v30 = vor.u32 %v6996_v38, %v11336_v39  ;;  %v7006_v37 = vsel %vm2358_vm15, %v6996_v38, %v7005_v8 }
 0x665   : > { %v7017_v39 = vsel %vm399_vm2, %v7006_v37, 0 }
 0x666   : > { %8786 = vmatmul.mubr.msk.bf16.vlgmr.msra.gmra.mrb[48].mxu0 %vm399_vm2, %v7854_v18  ;;  %v9689_v18 = vld [vmem:[#allocation3 + $0x30] sm:$0xff] }
 0x667   : > { %8790 = vmatpush3.bf16.xpose.msra.mxu0 %v4414_v59  ;;  %8795 = vmatprep.mubr.msk.bf16.mxu0 %vm9758_vm9, %v9757_v20  ;;  %v4471_v40 = vrot.slane %v9689_v18, 6  ;;  %v7117_v18 = vld [vmem:[#allocation3 + $0x50] sm:$0x1] }
 0x668   : > { %9124 = vmatpush3.bf16.xpose.msra.mxu1 %v6797_v47  ;;  %8791 = vmatprep.subr.bf16.mxu0 %v9757_v20  ;;  %v6937_v47 = vsel %vm399_vm2, %v6928_v51, 0  ;;  %v7142_v41 = vshll.u32 %v7117_v18, 16 }
 0x669   : > { %9129 = vmatprep.subr.bf16.mxu1 %v9757_v20  ;;  %v4472_v46 = vsel %vm540_vm1, %v4469_v19, %v4471_v40  ;;  %v4474_v14 = vsel %vm540_vm1, %v4471_v40, %v4473_v45  ;;  %v9690_v19 = vld [vmem:[#allocation3 + $0x48] sm:$0xff]  ;;  %v9691_v45 = vld [vmem:[#allocation3 + $0x40] sm:$0xff]  ;;  %vm12091_vm1 = vsmask.f32 6400 }
 0x66a   : > { %v4482_v59 = vsel %vm399_vm2, %v4472_v46, 0  ;;  %v4485_v53 = vsel %vm399_vm2, %v4474_v14, 0  ;;  %v7069_v58 = vsel %vm399_vm2, %v9690_v19, 0  ;;  %v7932_v14 = vld [vmem:[%s12078_s7 + $0x46] sm:$0x1]  ;;  %vm12092_vm5 = vmmov %vm12091_vm1 }
 0x66b   : > { %vm12093_vm6 = vmmov %vm12091_vm1 }
 0x66f   : > { %8792 = vmatpush3.bf16.xpose.msra.mxu0 %v4417_v15  ;;  %9126 = vmatmul.mubr.msk.bf16.vlgmr.msra.gmra.mrb[16].mxu1 %vm399_vm2, %v7922_v36  ;;  %v6932_v36 = vsel %vm2294_vm12, %v6929_v31, %v6931_v34  ;;  %v6994_v15 = vor.u32 %v6993_v54, %v11320_v0  ;;  %v6998_v0 = vsel %vm2358_vm15, %v6993_v54, %v6997_v30  ;;  %v7934_v30 = vld [vmem:[%s12078_s7 + $0x47] sm:$0x1] }
 0x670   : > { %9130 = vmatpush3.bf16.xpose.msra.mxu1 %v6872_v57  ;;  %8793 = vmatprep.subr.bf16.mxu0 %v9757_v20  ;;  %v6943_v42 = vsel %vm399_vm2, %v6932_v36, 0  ;;  %v7926_v57 = vld [vmem:[%s12078_s7 + $0x43] sm:$0x1]  ;;  %v7014_v27 = vsel %vm399_vm2, %v6998_v0, 0 }
 0x671   : > { %9131 = vmatprep.subr.bf16.mxu1 %v9757_v20  ;;  %9135 = vmatprep.mubr.msk.bf16.mxu1 %vm9758_vm9, %v9757_v20  ;;  %v6995_v63 = vsel %vm2358_vm15, %v6992_v33, %v6994_v15  ;;  %v7278_v15 = vrot.slane %v10934_v21, 2 }
 0x672   : > { %v7011_v12 = vsel %vm399_vm2, %v6995_v63, 0 }
 0x677   : > { %8794 = vmatpush3.bf16.xpose.msra.mxu0 %v4420_v62  ;;  %v7067_v62 = vsel %vm399_vm2, %v11793_v7, 0  ;;  %v7930_v7 = vld [vmem:[%s12078_s7 + $0x45] sm:$0x1] }
 0x678   : > { %9132 = vmatpush3.bf16.xpose.msra.mxu1 %v6875_v9  ;;  %8799 = vmatprep.subr.bf16.mxu0 %v9757_v20  ;;  %v7114_v9 = vld [vmem:[#allocation3 + $0x38] sm:$0xff] }
 0x679   : > { %9133 = vmatprep.subr.bf16.mxu1 %v9757_v20  ;;  %v7121_v1 = vshll.u32 %v7114_v9, 16  ;;  %v7119_v10 = vshrl.u32 %v7114_v9, 16 }
 0x67b   : > { %v7123_v24 = vrot.slane %v7121_v1, 1  ;;  %v7349_v1 = vld [vmem:[#allocation3 + $0x38] sm:$0xfc] }
 0x67c   : > { %v7416_v29 = vshrl.u32 %v7349_v1, 16 }
 0x67d   : > { %v7124_v2 = vor.u32 %v7123_v24, %v7119_v10  ;;  %v7352_v24 = vrot.slane %v7349_v1, 2 }
 0x67e   : > { %8796 = vmatmul.mubr.msk.bf16.vlgmr.msra.gmra.mrb[48].mxu0 %vm399_vm2, %v7856_v5  ;;  %v7128_v5 = vrot.slane %v10934_v21, 1  ;;  %v7268_v21 = vld [vmem:[#allocation3 + $0x50] sm:$0x3] }
 0x67f   : > { %8800 = vmatpush3.bf16.xpose.msra.mxu0 %v4479_v6  ;;  %8805 = vmatprep.mubr.msk.bf16.mxu0 %vm9758_vm9, %v9757_v20  ;;  %v7286_v22 = vshrl.u32 %v7268_v21, 16 }
 0x680   : > { %9134 = vmatpush3.bf16.xpose.msra.mxu1 %v6878_v3  ;;  %8801 = vmatprep.subr.bf16.mxu0 %v9757_v20  ;;  %v7129_v60 = vsel %vm2488_vm0, %v7124_v2, %v7128_v5  ;;  %v7132_v6 = vor.u32 %v10929_v35, %v7128_v5  ;;  %v7136_v3 = vrot.slane %v10903_v4, 1  ;;  %v7207_v4 = vrot.slane %v9691_v45, 1 }
 0x681   : > { %9139 = vmatprep.subr.bf16.mxu1 %v9757_v20  ;;  %v7150_v43 = vsel %vm399_vm2, %v7129_v60, 0  ;;  %v7288_v37 = vrot.slane %v7286_v22, 1  ;;  %v7357_v5 = vrot.slane %v7268_v21, 2  ;;  %v7419_v2 = vshll.u32 %v7349_v1, 16 }
 0x682   : > { %v7137_v40 = vsel %vm2488_vm0, %v7132_v6, %v7136_v3  ;;  %v7140_v46 = vor.u32 %v7136_v3, %v10900_v44 }
 0x683   : > { %v7153_v28 = vsel %vm399_vm2, %v7137_v40, 0  ;;  %v7421_v60 = vrot.slane %v7419_v2, 3 }
 0x687   : > { %8802 = vmatpush3.bf16.xpose.msra.mxu0 %v4482_v59  ;;  %9136 = vmatmul.mubr.msk.bf16.vlgmr.msra.gmra.mrb[16].mxu1 %vm399_vm2, %v7924_v56  ;;  %v7144_v56 = vrot.slane %v7142_v41, 1 }
 0x688   : > { %9140 = vmatpush3.bf16.xpose.msra.mxu1 %v6937_v47  ;;  %8803 = vmatprep.subr.bf16.mxu0 %v9757_v20  ;;  %v7201_v47 = vld [vmem:[#allocation3 + $0x38] sm:$0xfe] }
 0x689   : > { %9141 = vmatprep.subr.bf16.mxu1 %v9757_v20  ;;  %9145 = vmatprep.mubr.msk.bf16.mxu1 %vm9758_vm9, %v9757_v20  ;;  %v7145_v51 = vsel %vm2488_vm0, %v7140_v46, %v7144_v56  ;;  %v7206_v31 = vrot.slane %v7201_v47, 1  ;;  %v7270_v36 = vshrl.u32 %v7201_v47, 16  ;;  %v7273_v54 = vshll.u32 %v7201_v47, 16 }
 0x68a   : > { %v7156_v59 = vsel %vm399_vm2, %v7145_v51, 0 }
 0x68b   : > { %v7208_v44 = vsel %vm2577_vm3, %v7206_v31, %v7207_v4  ;;  %v7272_v33 = vrot.slane %v7270_v36, 1 }
 0x68c   : > { %v7217_v11 = vsel %vm399_vm2, %v7208_v44, 0 }
 0x68f   : > { %8804 = vmatpush3.bf16.xpose.msra.mxu0 %v4485_v53  ;;  %v7209_v53 = vrot.slane %v9690_v19, 1  ;;  %v7936_v19 = vld [vmem:[%s12078_s7 + $0x48] sm:$0x1] }
 0x690   : > { %9142 = vmatpush3.bf16.xpose.msra.mxu1 %v6940_v49 }
 0x691   : > { %9143 = vmatprep.subr.bf16.mxu1 %v9757_v20  ;;  %v7210_v49 = vsel %vm2577_vm3, %v7207_v4, %v7209_v53 }
 0x692   : > { %v7220_v34 = vsel %vm399_vm2, %v7210_v49, 0 }
 0x696   : > { %8806 = vmatmul.mubr.msk.bf16.vlgmr.msra.gmra.mrb[48].mxu0 %vm399_vm2, %v7858_v48  ;;  %v7211_v48 = vrot.slane %v7117_v18, 1 }
 0x698   : > { %9144 = vmatpush3.bf16.xpose.msra.mxu1 %v6943_v42  ;;  %v7212_v52 = vsel %vm2577_vm3, %v7209_v53, %v7211_v48  ;;  %v7277_v42 = vrot.slane %v10929_v35, 1 }
 0x699   : > { %9149 = vmatprep.subr.bf16.mxu1 %v9757_v20  ;;  %v7223_v63 = vsel %vm399_vm2, %v7212_v52, 0 }
 0x69a   : > { %v7279_v38 = vor.u32 %v7278_v15, %v7277_v42 }
 0x69c   : > { %v7284_v8 = vsel %vm12092_vm5, %v7279_v38, %v10922_v25 }
 0x69f   : > { %9146 = vmatmul.mubr.msk.bf16.vlgmr.msra.gmra.mrb[16].mxu1 %vm399_vm2, %v7926_v57  ;;  %v7275_v57 = vrot.slane %v7273_v54, 2 }
 0x6a0   : > { %9150 = vmatpush3.bf16.xpose.msra.mxu1 %v7011_v12  ;;  %9155 = vmatprep.mubr.msk.bf16.mxu1 %vm9758_vm9, %v9757_v20 }
 0x6a1   : > { %9151 = vmatprep.subr.bf16.mxu1 %v9757_v20  ;;  %v7276_v12 = vor.u32 %v7275_v57, %v7272_v33 }
 0x6a3   : > { %v7280_v0 = vsel %vm12091_vm1, %v7276_v12, %v7279_v38 }
 0x6a4   : > { %v7298_v35 = vsel %vm399_vm2, %v7280_v0, 0 }
 0x6a8   : > { %9152 = vmatpush3.bf16.xpose.msra.mxu1 %v7014_v27  ;;  %v7289_v27 = vshll.u32 %v7268_v21, 16 }
 0x6a9   : > { %9153 = vmatprep.subr.bf16.mxu1 %v9757_v20 }
 0x6b0   : > { %9154 = vmatpush3.bf16.xpose.msra.mxu1 %v7017_v39  ;;  %v7291_v39 = vrot.slane %v7289_v27, 2 }
 0x6b1   : > { %9159 = vmatprep.subr.bf16.mxu1 %v9757_v20 }
 0x6b7   : > { %9156 = vmatmul.mubr.msk.bf16.vlgmr.msra.gmra.mrb[16].mxu1 %vm399_vm2, %v7928_v13  ;;  %v7301_v13 = vsel %vm399_vm2, %v7284_v8, 0 }
 0x6b8   : > { %9160 = vmatpush3.bf16.xpose.msra.mxu1 %v7065_v23  ;;  %9165 = vmatprep.mubr.msk.bf16.mxu1 %vm9758_vm9, %v9757_v20  ;;  %v7292_v23 = vor.u32 %v7291_v39, %v7288_v37 }
 0x6b9   : > { %9161 = vmatprep.subr.bf16.mxu1 %v9757_v20 }
 0x6c0   : > { %9162 = vmatpush3.bf16.xpose.msra.mxu1 %v7067_v62  ;;  %v7293_v62 = vsel %vm12093_vm6, %v10922_v25, %v7292_v23  ;;  %v7366_v25 = vsel %vm399_vm2, %v10941_v55, 0  ;;  %v7938_v55 = vld [vmem:[%s12078_s7 + $0x49] sm:$0x1] }
 0x6c1   : > { %9163 = vmatprep.subr.bf16.mxu1 %v9757_v20  ;;  %v7304_v9 = vsel %vm399_vm2, %v7293_v62, 0 }
 0x6c8   : > { %9164 = vmatpush3.bf16.xpose.msra.mxu1 %v7069_v58  ;;  %v7354_v58 = vsel %vm1408_vm8, %v7352_v24, %v7353_v26  ;;  %v7358_v26 = vsel %vm1408_vm8, %v7355_v61, %v7357_v5  ;;  %v7414_v61 = vld [vmem:[#allocation3 + $0x50] sm:$0x7] }
 0x6c9   : > { %9169 = vmatprep.subr.bf16.mxu1 %v9757_v20  ;;  %v7363_v10 = vsel %vm399_vm2, %v7354_v58, 0  ;;  %v7432_v18 = vshrl.u32 %v7414_v61, 16  ;;  %v7435_v40 = vshll.u32 %v7414_v61, 16 }
 0x6cb   : > { %v7434_v41 = vrot.slane %v7432_v18, 2 }
 0x6cf   : > { %9166 = vmatmul.mubr.msk.bf16.vlgmr.msra.gmra.mrb[16].mxu1 %vm399_vm2, %v7930_v7  ;;  %v7418_v7 = vrot.slane %v7416_v29, 2 }
 0x6d0   : > { %9170 = vmatpush3.bf16.xpose.msra.mxu1 %v7150_v43  ;;  %9175 = vmatprep.mubr.msk.bf16.mxu1 %vm9758_vm9, %v9757_v20  ;;  %v7369_v43 = vsel %vm399_vm2, %v7358_v26, 0 }
 0x6d1   : > { %9171 = vmatprep.subr.bf16.mxu1 %v9757_v20  ;;  %v7422_v6 = vor.u32 %v7421_v60, %v7418_v7 }
 0x6d3   : > { %v7426_v3 = vsel %vm2788_vm14, %v7422_v6, %v10952_v16  ;;  %v7447_v16 = vsel %vm399_vm2, %v10967_v32, 0 }
 0x6d4   : > { %v7444_v50 = vsel %vm399_vm2, %v7426_v3, 0 }
 0x6d8   : > { %9172 = vmatpush3.bf16.xpose.msra.mxu1 %v7153_v28  ;;  %v7437_v28 = vrot.slane %v7435_v40, 3 }
 0x6d9   : > { %9173 = vmatprep.subr.bf16.mxu1 %v9757_v20 }
 0x6da   : > { %v7438_v46 = vor.u32 %v7437_v28, %v7434_v41 }
 0x6dc   : > { %v7439_v56 = vsel %vm2788_vm14, %v10954_v17, %v7438_v46 }
 0x6dd   : > { %v7450_v51 = vsel %vm399_vm2, %v7439_v56, 0 }
 0x6e0   : > { %9174 = vmatpush3.bf16.xpose.msra.mxu1 %v7156_v59  ;;  %v7940_v59 = vld [vmem:[%s12078_s7 + $0x4a] sm:$0x1] }
 0x6e1   : > { %9179 = vmatprep.subr.bf16.mxu1 %v9757_v20 }
 0x6e7   : > { %9176 = vmatmul.mubr.msk.bf16.vlgmr.msra.gmra.mrb[16].mxu1 %vm399_vm2, %v7932_v14 }
 0x6e8   : > { %9180 = vmatpush3.bf16.xpose.msra.mxu1 %v7217_v11  ;;  %9185 = vmatprep.mubr.msk.bf16.mxu1 %vm9758_vm9, %v9757_v20 }
 0x6e9   : > { %9181 = vmatprep.subr.bf16.mxu1 %v9757_v20 }
 0x6f0   : > { %9182 = vmatpush3.bf16.xpose.msra.mxu1 %v7220_v34 }
 0x6f1   : > { %9183 = vmatprep.subr.bf16.mxu1 %v9757_v20 }
 0x6f8   : > { %9184 = vmatpush3.bf16.xpose.msra.mxu1 %v7223_v63 }
 0x6f9   : > { %9189 = vmatprep.subr.bf16.mxu1 %v9757_v20 }
 0x6ff   : > { %9186 = vmatmul.mubr.msk.bf16.vlgmr.msra.gmra.mrb[16].mxu1 %vm399_vm2, %v7934_v30 }
 0x700   : > { %9190 = vmatpush3.bf16.xpose.msra.mxu1 %v7298_v35  ;;  %9195 = vmatprep.mubr.msk.bf16.mxu1 %vm9758_vm9, %v9757_v20 }
 0x701   : > { %9191 = vmatprep.subr.bf16.mxu1 %v9757_v20 }
 0x708   : > { %9192 = vmatpush3.bf16.xpose.msra.mxu1 %v7301_v13 }
 0x709   : > { %9193 = vmatprep.subr.bf16.mxu1 %v9757_v20 }
 0x710   : > { %9194 = vmatpush3.bf16.xpose.msra.mxu1 %v7304_v9 }
 0x711   : > { %9199 = vmatprep.subr.bf16.mxu1 %v9757_v20 }
 0x717   : > { %9196 = vmatmul.mubr.msk.bf16.vlgmr.msra.gmra.mrb[16].mxu1 %vm399_vm2, %v7936_v19 }
 0x718   : > { %9200 = vmatpush3.bf16.xpose.msra.mxu1 %v7363_v10  ;;  %9205 = vmatprep.mubr.msk.bf16.mxu1 %vm9758_vm9, %v9757_v20 }
 0x719   : > { %9201 = vmatprep.subr.bf16.mxu1 %v9757_v20 }
 0x720   : > { %9202 = vmatpush3.bf16.xpose.msra.mxu1 %v7366_v25 }
 0x721   : > { %9203 = vmatprep.subr.bf16.mxu1 %v9757_v20 }
 0x728   : > { %9204 = vmatpush3.bf16.xpose.msra.mxu1 %v7369_v43 }
 0x729   : > { %9209 = vmatprep.subr.bf16.mxu1 %v9757_v20 }
 0x72f   : > { %9206 = vmatmul.mubr.msk.bf16.vlgmr.msra.gmra.mrb[16].mxu1 %vm399_vm2, %v7938_v55 }
 0x730   : > { %9210 = vmatpush3.bf16.xpose.msra.mxu1 %v7444_v50  ;;  %9215 = vmatprep.mubr.msk.bf16.mxu1 %vm9758_vm9, %v9757_v20 }
 0x731   : > { %9211 = vmatprep.subr.bf16.mxu1 %v9757_v20 }
 0x738   : > { %9212 = vmatpush3.bf16.xpose.msra.mxu1 %v7447_v16 }
 0x739   : > { %9213 = vmatprep.subr.bf16.mxu1 %v9757_v20  ;;  %v2045_v20 = vld [vmem:[%s391_s25] sm:$0x3] }
 0x740   : > { %9214 = vmatpush3.bf16.xpose.msra.mxu1 %v7450_v51 }
 0x747   : > { %9216 = vmatmul.mubr.msk.bf16.vlgmr.msra.gmra.mrb[16].mxu1 %vm399_vm2, %v7940_v59 }
 0x769   : > { %v4521_v47 = vpop.f32.mrb[48].mxu0 }
 0x76a   : > { %v8807_v45 = vpop.f32.mrb[49].mxu0  ;;  %v9267_v17 = vadd.f32 %v4521_v47, %v2045_v20 }
 0x76b   : > { %v4524_v32 = vpop.f32.mrb[50].mxu0 }
 0x76c   : > { %v8808_v4 = vpop.f32.mrb[51].mxu0 }
 0x81a   : > { %v7486_v31 = vpop.f32.mrb[16].mxu1 }
 0x81b   : > { %v9268_v14 = vadd.f32 %v9267_v17, %v7486_v31  ;;  %v9217_v44 = vpop.f32.mrb[17].mxu1 }
 0x81c   : > { %v7489_v11 = vpop.f32.mrb[18].mxu1 }
 0x81d   : > { %v9218_v53 = vpop.f32.mrb[19].mxu1  ;;  %7494 = vst.msk [vmem:[%s377_s26] sm:$0x3] %vm7493_vm7, %v9268_v14 }
 0x81e   : > { %9705 = shalt.err (!%p9702_p3)
}
 0x81f   : > { %s9706_s30 = scalar_lea.hbm %s12029_s2, 32  ;;  %s9710_s21 = scalar_lea.hbm %s12080_s9, 64 }
 0x820   : > { %p9707_p4 = scmp.ne.s32.totalorder %s12029_s2, %s9706_s30  ;;  %p9711_p9 = scmp.lt.u32.totalorder %s12029_s2, %s12080_s9 }
 0x821   : > { %p9712_p10 = scmp.lt.u32.totalorder %s9710_s21, %s9706_s30  ;;  %p9714_p12 = scmp.lt.u32.totalorder %s9706_s30, %s12029_s2 }
 0x822   : > { %p9708_p7 = pnand %p9707_p4, %p9853_p5 }
 0x823   : > { %p9713_p11 = por %p9712_p10, %p9711_p9 }
 0x824   : > { %p9709_p8 = pneg %p9708_p7 }
 0x825   : > { %p9715_p13 = por %p9714_p12, %p9713_p11 }
 0x827   : > { %p9716_p0 = pnand %p9715_p13, %p9709_p8 }
 0x829   : > { %9719 = shalt.err (!%p9716_p0)
}
 0x82a   : > { %9610 = dma.vmem_to_hbm [thread:$0]  (%p9853_p5), %s12031_s0, 32, %s12029_s2, %s7561_s17  }
 0x82b PF: > { %p9616_p1 = scmp.ge.s32.totalorder %s9754_s16, 2  ;;  %s7592_s28 = sand.u32 1, %s9742_s13  }
 0x82c   : > { %s7593_s29 = scalar_lea.sflag [#allocation5], %s7592_s28 }
 0x82d   : > { %p9613_p2 = pnand %p9616_p1, %p9857_p6 }
 0x82f   : > { %9737 = dma.done.wait (!%p9613_p2), %s7593_s29, 32  }
 0x830   : > { %9739 = vsyncadd (!%p9613_p2), %s7593_s29, 4294967264  ;;  %p21_p3 = scmp.ge.s32.totalorder %s9840_s19, 4   ;;  %s12094_s13 = smov %s9746_s14 }
 0x831   : > { %s12095_s14 = smov %s9750_s15  ;;  %s12096_s15 = smov %s9851_s22 }
 0x832   : > { %s12097_s16 = smov %s9840_s19  ;;  %23 = sbr.rel (!%p21_p3) target bundleno = 6 (0x6), region = 189 }
 0x839   :  { %7604 = vsyncpa [#allocation5], 1 }
 0x83a   :  { %7606 = vsyncpa [#allocation5 + $0x1], 1 }

</bundles_post_ra>
